<compile_context>
chip_gen: v5e
topology: v5e:2x2
jax: 0.10.0
libtpu: 0.0.40
codegen_flags: <defaults>
</compile_context>

<pallas_src>
import math

import jax
import jax.numpy as jnp
from jax.experimental import pallas as pl
from jax.experimental.pallas import tpu as pltpu


def _gcn_resnet_kernel(feat_ref, inp_ref, a_ref, w1_ref, w2_ref, out_ref,
                       adj_sc, h1_sc):
    # feat_ref: (B, H*W, TC)  bf16  -- channel chunk of the backbone output
    # inp_ref : (C, 300)      f32   -- word embeddings (inp[0])
    # a_ref   : (C, C)        f32
    # w1_ref  : (300, 1024)   f32
    # w2_ref  : (1024, TC)    bf16  -- channel chunk of gc2 weight
    # out_ref : (B, C)        f32   -- resident accumulator across the k axis
    # adj_sc  : (C, C) f32 ; h1_sc : (C, 1024) bf16  -- per-core caches
    k = pl.program_id(1)

    @pl.when(k == 0)
    def _init():
        # gen_adj: D = A.sum(1)**-0.5 ; adj = (A @ diag(D)).T @ diag(D)
        #       => adj[i, j] = A[j, i] * d[i] * d[j]
        a = a_ref[...]
        d = jax.lax.rsqrt(jnp.sum(a, axis=1))
        adj = d[:, None] * a.T * d[None, :]
        adj_sc[...] = adj

        # gc1 + LeakyReLU(0.2): image-independent -> compute once, cache.
        s1 = jnp.dot(inp_ref[...], w1_ref[...],
                     preferred_element_type=jnp.float32)              # (C, 1024)
        h1 = jnp.dot(adj, s1, preferred_element_type=jnp.float32)     # (C, 1024)
        h1 = jnp.where(h1 >= 0, h1, 0.2 * h1)
        h1_sc[...] = h1.astype(h1_sc.dtype)

        out_ref[...] = jnp.zeros_like(out_ref)

    # nn.MaxPool2d(14,14) on a 14x14 map == global spatial max; channels are
    # lane-dense so this is a sublane/VPU reduce.  Then .view(B, -1) per chunk.
    feat = jnp.max(feat_ref[...], axis=-2).astype(jnp.float32)        # (B, TC)

    # gc2 on this channel chunk: s2 = h1 @ W2[:, chunk] ; h2 = adj @ s2
    s2 = jnp.dot(h1_sc[...], w2_ref[...],
                 preferred_element_type=jnp.float32)                  # (C, TC)
    h2 = jnp.dot(adj_sc[...], s2, preferred_element_type=jnp.float32) # (C, TC)

    # x = x.transpose(0, 1) ; out += feature_chunk @ x_chunk
    out_ref[...] += jax.lax.dot_general(
        feat, h2, (((1,), (1,)), ((), ())),
        preferred_element_type=jnp.float32)                           # (B, C)

    # Final result is complete after the last k step (resident output block).


@jax.jit
def gcn_resnet_forward(feature_nchw, inp, A, w1, w2):
    """feature_nchw: (B, 2048, 14, 14) backbone output; inp: (B, C, 300)."""
    B, Cf, H, W = feature_nchw.shape
    HW = H * W
    C = A.shape[0]
    D_in, D_hid = w1.shape

    # Channels-last + bf16 for the two big HBM streams (in a real deployment
    # the weights would be pre-cast once at load time).
    feat = feature_nchw.reshape(B, Cf, HW).transpose(0, 2, 1).astype(jnp.bfloat16)
    w2b = w2.astype(jnp.bfloat16)
    inp0 = inp[0]

    NCORES = 2            # v7x: one half of the channel stream per TensorCore
    TC = 512              # lane-dense channel chunk (multiple of 128)
    NSTEPS = Cf // (NCORES * TC)
    assert Cf == NCORES * NSTEPS * TC, (Cf, NCORES, TC)

    partial_out = pl.pallas_call(
        _gcn_resnet_kernel,
        out_shape=jax.ShapeDtypeStruct((NCORES, B, C), jnp.float32),
        grid=(NCORES, NSTEPS),
        in_specs=[
            pl.BlockSpec((B, HW, TC),   lambda p, k: (0, 0, p * NSTEPS + k)),
            pl.BlockSpec((C, D_in),     lambda p, k: (0, 0)),
            pl.BlockSpec((C, C),        lambda p, k: (0, 0)),
            pl.BlockSpec((D_in, D_hid), lambda p, k: (0, 0)),
            pl.BlockSpec((D_hid, TC),   lambda p, k: (0, p * NSTEPS + k)),
        ],
        out_specs=pl.BlockSpec((None, B, C), lambda p, k: (p, 0, 0)),
        scratch_shapes=[
            pltpu.VMEM((C, C), jnp.float32),        # adj cache
            pltpu.VMEM((C, D_hid), jnp.bfloat16),   # gc1 activation cache
        ],
        compiler_params=pltpu.CompilerParams(
            dimension_semantics=("parallel", "arbitrary")),
    )(feat, inp0, A, w1, w2b)

    return jnp.sum(partial_out, axis=0)             # (B, C)


def _reference(feature_nchw, inp, A, w1, w2):
    B = feature_nchw.shape[0]
    feat = feature_nchw.reshape(B, feature_nchw.shape[1], -1).max(axis=-1)
    inp0 = inp[0]
    d = jnp.power(A.sum(1), -0.5)
    adj = jnp.matmul(jnp.matmul(A, jnp.diag(d)).T, jnp.diag(d))
    x = adj @ (inp0 @ w1)
    x = jnp.where(x >= 0, x, 0.2 * x)
    x = adj @ (x @ w2)
    return feat @ x.T


if __name__ == "__main__":
    B = 2
    NUM_CLASSES = 16
    IN_CHANNEL = 300
    FEAT_C, FEAT_H, FEAT_W = 2048, 14, 14   # forced by gc2 out / MaxPool2d(14)

    key = jax.random.PRNGKey(0)
    k_w1, k_w2, k_nums, k_co, k_feat, k_inp = jax.random.split(key, 6)

    # GraphConvolution.reset_parameters: uniform(-stdv, stdv), stdv = 1/sqrt(out)
    stdv1 = 1.0 / math.sqrt(1024)
    w1 = jax.random.uniform(k_w1, (IN_CHANNEL, 1024), jnp.float32, -stdv1, stdv1)
    stdv2 = 1.0 / math.sqrt(2048)
    w2 = jax.random.uniform(k_w2, (1024, 2048), jnp.float32, -stdv2, stdv2)

    # gen_A with synthetic co-occurrence statistics (no adj_file / pickle IO).
    t = 0.4
    nums = jax.random.randint(k_nums, (NUM_CLASSES,), 1, 100).astype(jnp.float32)
    co = jax.random.randint(k_co, (NUM_CLASSES, NUM_CLASSES), 0, 100).astype(jnp.float32)
    adj0 = co / nums[:, None]
    adj0 = (adj0 >= t).astype(jnp.float32)
    adj0 = adj0 * 0.25 / (adj0.sum(0, keepdims=True) + 1e-6)
    A = adj0 + jnp.eye(NUM_CLASSES, dtype=jnp.float32)

    # Example inputs: backbone feature map + word-embedding inputs.
    feature = jax.random.normal(k_feat, (B, FEAT_C, FEAT_H, FEAT_W), jnp.float32)
    inp = jax.random.normal(k_inp, (B, NUM_CLASSES, IN_CHANNEL), jnp.float32)

    out = jax.block_until_ready(gcn_resnet_forward(feature, inp, A, w1, w2))
    ref = jax.block_until_ready(_reference(feature, inp, A, w1, w2))

    assert out.shape == (B, NUM_CLASSES), out.shape
    err = float(jnp.max(jnp.abs(out - ref)))
    scale = float(jnp.max(jnp.abs(ref)))
    # bf16 weight/feature streaming -> scale-aware tolerance vs the f32 reference.
    assert err <= 2e-2 * scale + 2e-2, (err, scale)

    print("KERNEL_OK")
</pallas_src>

<mosaic_0001>
module attributes {stable_mosaic.version = 11 : i64} {
  func.func @_gcn_resnet_kernel(%arg0: i32, %arg1: i32, %arg2: memref<2x196x512xbf16, #tpu.memory_space<vmem>>, %arg3: memref<16x300xf32, #tpu.memory_space<vmem>>, %arg4: memref<16x16xf32, #tpu.memory_space<vmem>>, %arg5: memref<300x1024xf32, #tpu.memory_space<vmem>>, %arg6: memref<1024x512xbf16, #tpu.memory_space<vmem>>, %arg7: memref<1x2x16xf32, #tpu.memory_space<vmem>>, %arg8: memref<16x16xf32, #tpu.memory_space<vmem>>, %arg9: memref<16x1024xbf16, #tpu.memory_space<vmem>>) attributes {dimension_semantics = [#tpu.dimension_semantics<parallel>, #tpu.dimension_semantics<arbitrary>], iteration_bounds = array<i64: 2, 2>, scalar_prefetch = 0 : i64, scratch_operands = 2 : i64, tpu.core_type = #tpu.core_type<tc>, window_params = [{transform_indices = @transform_0, window_bounds = array<i64: 2, 196, 512>}, {pipeline_mode = #tpu.pipeline_mode<synchronous>, transform_indices = @transform_1, window_bounds = array<i64: 16, 300>}, {pipeline_mode = #tpu.pipeline_mode<synchronous>, transform_indices = @transform_2, window_bounds = array<i64: 16, 16>}, {pipeline_mode = #tpu.pipeline_mode<synchronous>, transform_indices = @transform_3, window_bounds = array<i64: 300, 1024>}, {transform_indices = @transform_4, window_bounds = array<i64: 1024, 512>}, {transform_indices = @transform_5, window_bounds = array<i64: 1, 2, 16>}]} {
    %c0_i32 = arith.constant 0 : i32
    %0 = arith.cmpi eq, %arg1, %c0_i32 : i32
    %1 = arith.extui %0 : i1 to i32
    %c0_i32_0 = arith.constant 0 : i32
    %2 = arith.cmpi ne, %1, %c0_i32_0 : i32
    scf.if %2 {
      %c0_18 = arith.constant 0 : index
      %c0_19 = arith.constant 0 : index
      %18 = vector.load %arg4[%c0_18, %c0_19] : memref<16x16xf32, #tpu.memory_space<vmem>>, vector<16x16xf32>
      %cst_20 = arith.constant dense<0.000000e+00> : vector<16xf32>
      %19 = vector.multi_reduction <add>, %18, %cst_20 [1] : vector<16x16xf32> to vector<16xf32>
      %20 = math.rsqrt %19 : vector<16xf32>
      %21 = vector.shape_cast %20 : vector<16xf32> to vector<16x1xf32>
      %22 = tpu.transpose %18, [1, 0] : vector<16x16xf32> -> vector<16x16xf32>
      %23 = vector.broadcast %21 : vector<16x1xf32> to vector<16x16xf32>
      %24 = arith.mulf %23, %22 : vector<16x16xf32>
      %25 = vector.shape_cast %20 : vector<16xf32> to vector<1x16xf32>
      %26 = vector.broadcast %25 : vector<1x16xf32> to vector<16x16xf32>
      %27 = arith.mulf %24, %26 : vector<16x16xf32>
      %c0_21 = arith.constant 0 : index
      %c0_22 = arith.constant 0 : index
      %28 = vector.load %arg8[%c0_21, %c0_22] : memref<16x16xf32, #tpu.memory_space<vmem>>, vector<16x16xf32>
      tpu.vector_store %arg8[%c0_21, %c0_22], %27 {strides = array<i32>} : memref<16x16xf32, #tpu.memory_space<vmem>>, vector<16x16xf32>,
      %c0_23 = arith.constant 0 : index
      %c0_24 = arith.constant 0 : index
      %29 = vector.load %arg3[%c0_23, %c0_24] : memref<16x300xf32, #tpu.memory_space<vmem>>, vector<16x300xf32>
      %c0_25 = arith.constant 0 : index
      %c0_26 = arith.constant 0 : index
      %30 = vector.load %arg5[%c0_25, %c0_26] : memref<300x1024xf32, #tpu.memory_space<vmem>>, vector<300x1024xf32>
      %cst_27 = arith.constant dense<0.000000e+00> : vector<16x1024xf32>
      %31 = tpu.matmul %29, %30, %cst_27 {dimension_numbers = #tpu.dot_dimension_numbers<[1], [0], [0], [1], [0, 0, 1, 1], [], []>} : vector<16x300xf32>, vector<300x1024xf32>, vector<16x1024xf32> -> vector<16x1024xf32>
      %cst_28 = arith.constant dense<0.000000e+00> : vector<16x1024xf32>
      %32 = tpu.matmul %27, %31, %cst_28 {dimension_numbers = #tpu.dot_dimension_numbers<[1], [0], [0], [1], [0, 0, 1, 1], [], []>} : vector<16x16xf32>, vector<16x1024xf32>, vector<16x1024xf32> -> vector<16x1024xf32>
      %cst_29 = arith.constant 0.000000e+00 : f32
      %33 = vector.broadcast %cst_29 : f32 to vector<16x1024xf32>
      %34 = arith.cmpf oge, %32, %33 : vector<16x1024xf32>
      %cst_30 = arith.constant 2.000000e-01 : f32
      %35 = vector.broadcast %cst_30 : f32 to vector<16x1024xf32>
      %36 = arith.mulf %35, %32 : vector<16x1024xf32>
      %37 = arith.select %34, %32, %36 : vector<16x1024xi1>, vector<16x1024xf32>
      %38 = arith.truncf %37 : vector<16x1024xf32> to vector<16x1024xbf16>
      %c0_31 = arith.constant 0 : index
      %c0_32 = arith.constant 0 : index
      %39 = vector.load %arg9[%c0_31, %c0_32] : memref<16x1024xbf16, #tpu.memory_space<vmem>>, vector<16x1024xbf16>
      tpu.vector_store %arg9[%c0_31, %c0_32], %38 {strides = array<i32>} : memref<16x1024xbf16, #tpu.memory_space<vmem>>, vector<16x1024xbf16>,
      %cst_33 = arith.constant 0.000000e+00 : f32
      %40 = vector.broadcast %cst_33 : f32 to vector<2x16xf32>
      %c0_34 = arith.constant 0 : index
      %c0_35 = arith.constant 0 : index
      %c0_36 = arith.constant 0 : index
      %41 = vector.load %arg7[%c0_34, %c0_35, %c0_36] : memref<1x2x16xf32, #tpu.memory_space<vmem>>, vector<1x2x16xf32>
      %42 = vector.shape_cast %41 : vector<1x2x16xf32> to vector<2x16xf32>
      %43 = vector.shape_cast %40 : vector<2x16xf32> to vector<1x2x16xf32>
      tpu.vector_store %arg7[%c0_34, %c0_35, %c0_36], %43 {strides = array<i32>} : memref<1x2x16xf32, #tpu.memory_space<vmem>>, vector<1x2x16xf32>,
    } else {
    }
    %c0 = arith.constant 0 : index
    %c0_1 = arith.constant 0 : index
    %c0_2 = arith.constant 0 : index
    %3 = vector.load %arg2[%c0, %c0_1, %c0_2] : memref<2x196x512xbf16, #tpu.memory_space<vmem>>, vector<2x196x512xbf16>
    %cst = arith.constant dense<0xFF80> : vector<2x512xbf16>
    %4 = vector.multi_reduction <maximumf>, %3, %cst [1] : vector<2x196x512xbf16> to vector<2x512xbf16>
    %5 = arith.extf %4 : vector<2x512xbf16> to vector<2x512xf32>
    %c0_3 = arith.constant 0 : index
    %c0_4 = arith.constant 0 : index
    %6 = vector.load %arg9[%c0_3, %c0_4] : memref<16x1024xbf16, #tpu.memory_space<vmem>>, vector<16x1024xbf16>
    %c0_5 = arith.constant 0 : index
    %c0_6 = arith.constant 0 : index
    %7 = vector.load %arg6[%c0_5, %c0_6] : memref<1024x512xbf16, #tpu.memory_space<vmem>>, vector<1024x512xbf16>
    %cst_7 = arith.constant dense<0.000000e+00> : vector<16x512xf32>
    %8 = tpu.matmul %6, %7, %cst_7 {dimension_numbers = #tpu.dot_dimension_numbers<[1], [0], [0], [1], [0, 0, 1, 1], [], []>} : vector<16x1024xbf16>, vector<1024x512xbf16>, vector<16x512xf32> -> vector<16x512xf32>
    %c0_8 = arith.constant 0 : index
    %c0_9 = arith.constant 0 : index
    %9 = vector.load %arg8[%c0_8, %c0_9] : memref<16x16xf32, #tpu.memory_space<vmem>>, vector<16x16xf32>
    %cst_10 = arith.constant dense<0.000000e+00> : vector<16x512xf32>
    %10 = tpu.matmul %9, %8, %cst_10 {dimension_numbers = #tpu.dot_dimension_numbers<[1], [0], [0], [1], [0, 0, 1, 1], [], []>} : vector<16x16xf32>, vector<16x512xf32>, vector<16x512xf32> -> vector<16x512xf32>
    %c0_11 = arith.constant 0 : index
    %c0_12 = arith.constant 0 : index
    %c0_13 = arith.constant 0 : index
    %11 = vector.load %arg7[%c0_11, %c0_12, %c0_13] : memref<1x2x16xf32, #tpu.memory_space<vmem>>, vector<1x2x16xf32>
    %12 = vector.shape_cast %11 : vector<1x2x16xf32> to vector<2x16xf32>
    %cst_14 = arith.constant dense<0.000000e+00> : vector<2x16xf32>
    %13 = tpu.matmul %5, %10, %cst_14 {dimension_numbers = #tpu.dot_dimension_numbers<[1], [1], [0], [0], [0, 0, 1, 0], [], []>} : vector<2x512xf32>, vector<16x512xf32>, vector<2x16xf32> -> vector<2x16xf32>
    %14 = arith.addf %12, %13 : vector<2x16xf32>
    %c0_15 = arith.constant 0 : index
    %c0_16 = arith.constant 0 : index
    %c0_17 = arith.constant 0 : index
    %15 = vector.load %arg7[%c0_15, %c0_16, %c0_17] : memref<1x2x16xf32, #tpu.memory_space<vmem>>, vector<1x2x16xf32>
    %16 = vector.shape_cast %15 : vector<1x2x16xf32> to vector<2x16xf32>
    %17 = vector.shape_cast %14 : vector<2x16xf32> to vector<1x2x16xf32>
    tpu.vector_store %arg7[%c0_15, %c0_16, %c0_17], %17 {strides = array<i32>} : memref<1x2x16xf32, #tpu.memory_space<vmem>>, vector<1x2x16xf32>,
    return
  }
  func.func @transform_0(%arg0: i32, %arg1: i32) -> (i32, i32, i32) {
    %c2_i32 = arith.constant 2 : i32
    %0 = arith.muli %arg0, %c2_i32 : i32
    %1 = arith.addi %0, %arg1 : i32
    %c0_i32 = arith.constant 0 : i32
    %c0_i32_0 = arith.constant 0 : i32
    %c0_i32_1 = arith.constant 0 : i32
    return %c0_i32, %c0_i32_0, %1 : i32, i32, i32
  }
  func.func @transform_1(%arg0: i32, %arg1: i32) -> (i32, i32) {
    %c0_i32 = arith.constant 0 : i32
    %c0_i32_0 = arith.constant 0 : i32
    %c0_i32_1 = arith.constant 0 : i32
    return %c0_i32, %c0_i32_0 : i32, i32
  }
  func.func @transform_2(%arg0: i32, %arg1: i32) -> (i32, i32) {
    %c0_i32 = arith.constant 0 : i32
    %c0_i32_0 = arith.constant 0 : i32
    %c0_i32_1 = arith.constant 0 : i32
    return %c0_i32, %c0_i32_0 : i32, i32
  }
  func.func @transform_3(%arg0: i32, %arg1: i32) -> (i32, i32) {
    %c0_i32 = arith.constant 0 : i32
    %c0_i32_0 = arith.constant 0 : i32
    %c0_i32_1 = arith.constant 0 : i32
    return %c0_i32, %c0_i32_0 : i32, i32
  }
  func.func @transform_4(%arg0: i32, %arg1: i32) -> (i32, i32) {
    %c2_i32 = arith.constant 2 : i32
    %0 = arith.muli %arg0, %c2_i32 : i32
    %1 = arith.addi %0, %arg1 : i32
    %c0_i32 = arith.constant 0 : i32
    %c0_i32_0 = arith.constant 0 : i32
    return %c0_i32, %1 : i32, i32
  }
  func.func @transform_5(%arg0: i32, %arg1: i32) -> (i32, i32, i32) {
    %c0_i32 = arith.constant 0 : i32
    %c0_i32_0 = arith.constant 0 : i32
    %c0_i32_1 = arith.constant 0 : i32
    return %arg0, %c0_i32, %c0_i32_0 : i32, i32, i32
  }
}

</mosaic_0001>

<bundles_post_ra>
// kernel: gcn_resnet_forward.1
= control target key start
LH: loop header
LB: loop body
LE: loop exit
PB: predicated region body
PF: predicated region fallthrough
CT: control target
= control target key end

     0   :  { %s6702_s18 = smov 0   ;;  %s6704_s19 = smov 0   ;;  %s9550_s0 = inlined_call_operand.vmem [shape: bf16[2,196,2048], index: 0, kind: input, shape index: {}]   ;;  %s9551_s1 = inlined_call_operand.vmem [shape: f32[16,300], index: 1, kind: input, shape index: {}]   ;;  %s9552_s2 = inlined_call_operand.vmem [shape: f32[16,16], index: 2, kind: input, shape index: {}]   ;;  %s9553_s3 = inlined_call_operand.vmem [shape: f32[300,1024], index: 3, kind: input, shape index: {}]   ;;  %s9554_s4 = inlined_call_operand.vmem [shape: bf16[1024,2048], index: 4, kind: input, shape index: {}]   ;;  %s9555_s5 = inlined_call_operand.vmem [shape: f32[2,2,16], index: 5, kind: output, shape index: {}]  }
   0x1   :  { %s6706_s20 = smov 0   ;;  %s6708_s21 = smov 0  }
   0x2   :  { %s6710_s22 = smov 0   ;;  %s6712_s23 = smov 0  }
   0x3   :  { %s6714_s24 = smov 0  }
   0x4 LB: > { %s24_s25 = sadd.s32 1, %s6661_s22  ;;  %s27_s26 = sadd.s32 1, %s6665_s23  ;;  %s6669_s24 = sphi %s6714_s24, %s15_s24   ;;  %s6665_s23 = sphi %s6712_s23, %s9562_s23   ;;  %s6661_s22 = sphi %s6710_s22, %s9561_s22   ;;  %s6657_s21 = sphi %s6708_s21, %s9560_s21   ;;  %s6653_s20 = sphi %s6706_s20, %s9559_s20   ;;  %s6649_s19 = sphi %s6704_s19, %s9558_s19   ;;  %s6645_s18 = sphi %s6702_s18, %s9557_s18  }
   0x5   : > { %p25_p0 = scmp.ge.s32.totalorder %s24_s25, 2  ;;  %p45_p1 = scmp.ne.s32.totalorder %s6649_s19, %s6645_s18 }
   0x6   : > { %p46_p2 = scmp.eq.s32.totalorder %s6669_s24, 0  ;;  %s5157_s27 = sshll.u32 %s6665_s23, 1 }
   0x7   : > { %s9564_s25 = smov (%p25_p0, %s24_s25), 0  ;;  %s9566_s26 = smov (!%p25_p0, %s27_s26), %s6665_s23 }
   0x8   : > { %p29_p3 = scmp.ge.s32.totalorder %s9566_s26, 2  ;;  %p6746_p4 = por %p46_p2, %p45_p1 }
   0x9   : > { %s6753_s29 = sadd.s32 %s6661_s22, %s5157_s27  ;;  %s38_s8 = sadd.s32 1, %s6649_s19 }
   0xa   : > { %s9568_s26 = smov (%p29_p3, %s9566_s26), 0  ;;  %p5162_p6 = scmp.ge.s32.totalorder %s6669_s24, 4 }
   0xb   : > { %s5158_s30 = sshll.u32 %s9568_s26, 1 }
   0xc   : > { %s34_s6 = sadd.s32 %s5158_s30, %s9564_s25  ;;  %199 = sbr.rel (%p5162_p6) target bundleno = 381 (0x17d), region = 28 }
   0xd   : > { %s35_s7 = ssub.s32 %s6753_s29, %s34_s6 }
   0xe   : > { %p36_p5 = scmp.eq.s32.totalorder %s35_s7, 0 }
  0x10   : > { %s6760_s9 = scalar_select %p36_p5, %s6649_s19, %s38_s8  }
  0x11   : > { %202 = sbr.rel (!%p6746_p4) target bundleno = 121 (0x79), region = 32  ;;  %s204_s10 = sand.u32 (%p6746_p4), 1, %s6649_s19  }
  0x12   : > { %s6280_s11 = sshll.u32 (%p6746_p4), %s6753_s29, 4  ;;  %s6546_s12 = smul.u32 (%p6746_p4), 800, %s204_s10 }
  0x13   : > { %s6770_s15 = scalar_lea.vmem (%p6746_p4), %s9550_s0, %s6280_s11 }
  0x14   : > { %v224_v0 = vld [vmem:[%s6770_s15] sm:$0xff] (%p6746_p4)  ;;  %v226_v1 = vld [vmem:[%s6770_s15 + $0x8] sm:$0xff] (%p6746_p4)  ;;  %s6775_s16 = scalar_lea.vmem (%p6746_p4), [#allocation4], %s6546_s12 }
  0x15   : > { %v228_v2 = vld [vmem:[%s6770_s15 + $0x40] sm:$0xff] (%p6746_p4)  ;;  %225 = vst [vmem:[%s6775_s16] sm:$0xff] (%p6746_p4), %v224_v0  ;;  %v230_v3 = vld [vmem:[%s6770_s15 + $0x48] sm:$0xff] (%p6746_p4) }
  0x16   : > { %227 = vst [vmem:[%s6775_s16 + $0x8] sm:$0xff] %v226_v1  ;;  %v232_v4 = vld [vmem:[%s6770_s15 + $0x80] sm:$0xff]  ;;  %v234_v5 = vld [vmem:[%s6770_s15 + $0x88] sm:$0xff] }
  0x17   : > { %229 = vst [vmem:[%s6775_s16 + $0x10] sm:$0xff] %v228_v2  ;;  %v236_v6 = vld [vmem:[%s6770_s15 + $0xc0] sm:$0xff]  ;;  %v238_v7 = vld [vmem:[%s6770_s15 + $0xc8] sm:$0xff] }
  0x18   : > { %231 = vst [vmem:[%s6775_s16 + $0x18] sm:$0xff] %v230_v3  ;;  %v240_v8 = vld [vmem:[%s6770_s15 + $0x100] sm:$0xff]  ;;  %v242_v9 = vld [vmem:[%s6770_s15 + $0x108] sm:$0xff] }
  0x19   : > { %233 = vst [vmem:[%s6775_s16 + $0x20] sm:$0xff] %v232_v4  ;;  %v244_v10 = vld [vmem:[%s6770_s15 + $0x140] sm:$0xff]  ;;  %v246_v11 = vld [vmem:[%s6770_s15 + $0x148] sm:$0xff] }
  0x1a   : > { %235 = vst [vmem:[%s6775_s16 + $0x28] sm:$0xff] %v234_v5  ;;  %v248_v12 = vld [vmem:[%s6770_s15 + $0x180] sm:$0xff]  ;;  %v250_v13 = vld [vmem:[%s6770_s15 + $0x188] sm:$0xff] }
  0x1b   : > { %237 = vst [vmem:[%s6775_s16 + $0x30] sm:$0xff] %v236_v6  ;;  %v252_v14 = vld [vmem:[%s6770_s15 + $0x1c0] sm:$0xff]  ;;  %v254_v15 = vld [vmem:[%s6770_s15 + $0x1c8] sm:$0xff] }
  0x1c   : > { %239 = vst [vmem:[%s6775_s16 + $0x38] sm:$0xff] %v238_v7  ;;  %v256_v16 = vld [vmem:[%s6770_s15 + $0x200] sm:$0xff]  ;;  %v258_v17 = vld [vmem:[%s6770_s15 + $0x208] sm:$0xff] }
  0x1d   : > { %241 = vst [vmem:[%s6775_s16 + $0x40] sm:$0xff] %v240_v8  ;;  %v260_v18 = vld [vmem:[%s6770_s15 + $0x240] sm:$0xff]  ;;  %v262_v19 = vld [vmem:[%s6770_s15 + $0x248] sm:$0xff] }
  0x1e   : > { %243 = vst [vmem:[%s6775_s16 + $0x48] sm:$0xff] %v242_v9  ;;  %v264_v20 = vld [vmem:[%s6770_s15 + $0x280] sm:$0xff]  ;;  %v266_v21 = vld [vmem:[%s6770_s15 + $0x288] sm:$0xff] }
  0x1f   : > { %245 = vst [vmem:[%s6775_s16 + $0x50] sm:$0xff] %v244_v10  ;;  %v268_v22 = vld [vmem:[%s6770_s15 + $0x2c0] sm:$0xff]  ;;  %v270_v23 = vld [vmem:[%s6770_s15 + $0x2c8] sm:$0xff] }
  0x20   : > { %247 = vst [vmem:[%s6775_s16 + $0x58] sm:$0xff] %v246_v11  ;;  %v272_v24 = vld [vmem:[%s6770_s15 + $0x300] sm:$0xff]  ;;  %v274_v25 = vld [vmem:[%s6770_s15 + $0x308] sm:$0xff] }
  0x21   : > { %249 = vst [vmem:[%s6775_s16 + $0x60] sm:$0xff] %v248_v12  ;;  %v276_v26 = vld [vmem:[%s6770_s15 + $0x340] sm:$0xff]  ;;  %v278_v27 = vld [vmem:[%s6770_s15 + $0x348] sm:$0xff] }
  0x22   : > { %251 = vst [vmem:[%s6775_s16 + $0x68] sm:$0xff] %v250_v13  ;;  %v280_v28 = vld [vmem:[%s6770_s15 + $0x380] sm:$0xff]  ;;  %v282_v29 = vld [vmem:[%s6770_s15 + $0x388] sm:$0xff] }
  0x23   : > { %253 = vst [vmem:[%s6775_s16 + $0x70] sm:$0xff] %v252_v14  ;;  %v284_v30 = vld [vmem:[%s6770_s15 + $0x3c0] sm:$0xff]  ;;  %v286_v31 = vld [vmem:[%s6770_s15 + $0x3c8] sm:$0xff] }
  0x24   : > { %255 = vst [vmem:[%s6775_s16 + $0x78] sm:$0xff] %v254_v15  ;;  %v288_v32 = vld [vmem:[%s6770_s15 + $0x400] sm:$0xff]  ;;  %v290_v33 = vld [vmem:[%s6770_s15 + $0x408] sm:$0xff] }
  0x25   : > { %257 = vst [vmem:[%s6775_s16 + $0x80] sm:$0xff] %v256_v16  ;;  %v292_v34 = vld [vmem:[%s6770_s15 + $0x440] sm:$0xff]  ;;  %v294_v35 = vld [vmem:[%s6770_s15 + $0x448] sm:$0xff] }
  0x26   : > { %259 = vst [vmem:[%s6775_s16 + $0x88] sm:$0xff] %v258_v17  ;;  %v296_v36 = vld [vmem:[%s6770_s15 + $0x480] sm:$0xff]  ;;  %v298_v37 = vld [vmem:[%s6770_s15 + $0x488] sm:$0xff] }
  0x27   : > { %261 = vst [vmem:[%s6775_s16 + $0x90] sm:$0xff] %v260_v18  ;;  %v300_v38 = vld [vmem:[%s6770_s15 + $0x4c0] sm:$0xff]  ;;  %v302_v39 = vld [vmem:[%s6770_s15 + $0x4c8] sm:$0xff] }
  0x28   : > { %263 = vst [vmem:[%s6775_s16 + $0x98] sm:$0xff] %v262_v19  ;;  %v304_v40 = vld [vmem:[%s6770_s15 + $0x500] sm:$0xff]  ;;  %v306_v41 = vld [vmem:[%s6770_s15 + $0x508] sm:$0xff] }
  0x29   : > { %265 = vst [vmem:[%s6775_s16 + $0xa0] sm:$0xff] %v264_v20  ;;  %v308_v42 = vld [vmem:[%s6770_s15 + $0x540] sm:$0xff]  ;;  %v310_v43 = vld [vmem:[%s6770_s15 + $0x548] sm:$0xff] }
  0x2a   : > { %267 = vst [vmem:[%s6775_s16 + $0xa8] sm:$0xff] %v266_v21  ;;  %v312_v44 = vld [vmem:[%s6770_s15 + $0x580] sm:$0xff]  ;;  %v314_v45 = vld [vmem:[%s6770_s15 + $0x588] sm:$0xff] }
  0x2b   : > { %269 = vst [vmem:[%s6775_s16 + $0xb0] sm:$0xff] %v268_v22  ;;  %v316_v46 = vld [vmem:[%s6770_s15 + $0x5c0] sm:$0xff]  ;;  %v318_v47 = vld [vmem:[%s6770_s15 + $0x5c8] sm:$0xff] }
  0x2c   : > { %271 = vst [vmem:[%s6775_s16 + $0xb8] sm:$0xff] %v270_v23  ;;  %v320_v48 = vld [vmem:[%s6770_s15 + $0x600] sm:$0xff]  ;;  %v322_v49 = vld [vmem:[%s6770_s15 + $0x608] sm:$0xff] }
  0x2d   : > { %273 = vst [vmem:[%s6775_s16 + $0xc0] sm:$0xff] %v272_v24  ;;  %v324_v50 = vld [vmem:[%s6770_s15 + $0x640] sm:$0xff]  ;;  %v326_v51 = vld [vmem:[%s6770_s15 + $0x648] sm:$0xff] }
  0x2e   : > { %275 = vst [vmem:[%s6775_s16 + $0xc8] sm:$0xff] %v274_v25  ;;  %v328_v52 = vld [vmem:[%s6770_s15 + $0x680] sm:$0xff]  ;;  %v330_v53 = vld [vmem:[%s6770_s15 + $0x688] sm:$0xff] }
  0x2f   : > { %277 = vst [vmem:[%s6775_s16 + $0xd0] sm:$0xff] %v276_v26  ;;  %v332_v54 = vld [vmem:[%s6770_s15 + $0x6c0] sm:$0xff]  ;;  %v334_v55 = vld [vmem:[%s6770_s15 + $0x6c8] sm:$0xff] }
  0x30   : > { %279 = vst [vmem:[%s6775_s16 + $0xd8] sm:$0xff] %v278_v27  ;;  %v336_v56 = vld [vmem:[%s6770_s15 + $0x700] sm:$0xff]  ;;  %v338_v57 = vld [vmem:[%s6770_s15 + $0x708] sm:$0xff] }
  0x31   : > { %281 = vst [vmem:[%s6775_s16 + $0xe0] sm:$0xff] %v280_v28  ;;  %v340_v58 = vld [vmem:[%s6770_s15 + $0x740] sm:$0xff]  ;;  %v342_v59 = vld [vmem:[%s6770_s15 + $0x748] sm:$0xff] }
  0x32   : > { %283 = vst [vmem:[%s6775_s16 + $0xe8] sm:$0xff] %v282_v29  ;;  %v344_v60 = vld [vmem:[%s6770_s15 + $0x780] sm:$0xff]  ;;  %v346_v61 = vld [vmem:[%s6770_s15 + $0x788] sm:$0xff] }
  0x33   : > { %285 = vst [vmem:[%s6775_s16 + $0xf0] sm:$0xff] %v284_v30  ;;  %v348_v62 = vld [vmem:[%s6770_s15 + $0x7c0] sm:$0xff]  ;;  %v350_v63 = vld [vmem:[%s6770_s15 + $0x7c8] sm:$0xff] }
  0x34   : > { %287 = vst [vmem:[%s6775_s16 + $0xf8] sm:$0xff] %v286_v31  ;;  %v352_v0 = vld [vmem:[%s6770_s15 + $0x800] sm:$0xff]  ;;  %v354_v1 = vld [vmem:[%s6770_s15 + $0x808] sm:$0xff] }
  0x35   : > { %289 = vst [vmem:[%s6775_s16 + $0x100] sm:$0xff] %v288_v32  ;;  %v356_v2 = vld [vmem:[%s6770_s15 + $0x840] sm:$0xff]  ;;  %v358_v3 = vld [vmem:[%s6770_s15 + $0x848] sm:$0xff] }
  0x36   : > { %291 = vst [vmem:[%s6775_s16 + $0x108] sm:$0xff] %v290_v33  ;;  %v360_v4 = vld [vmem:[%s6770_s15 + $0x880] sm:$0xff]  ;;  %v362_v5 = vld [vmem:[%s6770_s15 + $0x888] sm:$0xff] }
  0x37   : > { %293 = vst [vmem:[%s6775_s16 + $0x110] sm:$0xff] %v292_v34  ;;  %v364_v6 = vld [vmem:[%s6770_s15 + $0x8c0] sm:$0xff]  ;;  %v366_v7 = vld [vmem:[%s6770_s15 + $0x8c8] sm:$0xff] }
  0x38   : > { %295 = vst [vmem:[%s6775_s16 + $0x118] sm:$0xff] %v294_v35  ;;  %v368_v8 = vld [vmem:[%s6770_s15 + $0x900] sm:$0xff]  ;;  %v370_v9 = vld [vmem:[%s6770_s15 + $0x908] sm:$0xff] }
  0x39   : > { %297 = vst [vmem:[%s6775_s16 + $0x120] sm:$0xff] %v296_v36  ;;  %v372_v10 = vld [vmem:[%s6770_s15 + $0x940] sm:$0xff]  ;;  %v374_v11 = vld [vmem:[%s6770_s15 + $0x948] sm:$0xff] }
  0x3a   : > { %299 = vst [vmem:[%s6775_s16 + $0x128] sm:$0xff] %v298_v37  ;;  %v376_v12 = vld [vmem:[%s6770_s15 + $0x980] sm:$0xff]  ;;  %v378_v13 = vld [vmem:[%s6770_s15 + $0x988] sm:$0xff] }
  0x3b   : > { %301 = vst [vmem:[%s6775_s16 + $0x130] sm:$0xff] %v300_v38  ;;  %v380_v14 = vld [vmem:[%s6770_s15 + $0x9c0] sm:$0xff]  ;;  %v382_v15 = vld [vmem:[%s6770_s15 + $0x9c8] sm:$0xff] }
  0x3c   : > { %303 = vst [vmem:[%s6775_s16 + $0x138] sm:$0xff] %v302_v39  ;;  %v384_v16 = vld [vmem:[%s6770_s15 + $0xa00] sm:$0xff]  ;;  %v386_v17 = vld [vmem:[%s6770_s15 + $0xa08] sm:$0xff] }
  0x3d   : > { %305 = vst [vmem:[%s6775_s16 + $0x140] sm:$0xff] %v304_v40  ;;  %v388_v18 = vld [vmem:[%s6770_s15 + $0xa40] sm:$0xff]  ;;  %v390_v19 = vld [vmem:[%s6770_s15 + $0xa48] sm:$0xff] }
  0x3e   : > { %307 = vst [vmem:[%s6775_s16 + $0x148] sm:$0xff] %v306_v41  ;;  %v392_v20 = vld [vmem:[%s6770_s15 + $0xa80] sm:$0xff]  ;;  %v394_v21 = vld [vmem:[%s6770_s15 + $0xa88] sm:$0xff] }
  0x3f   : > { %309 = vst [vmem:[%s6775_s16 + $0x150] sm:$0xff] %v308_v42  ;;  %v396_v22 = vld [vmem:[%s6770_s15 + $0xac0] sm:$0xff]  ;;  %v398_v23 = vld [vmem:[%s6770_s15 + $0xac8] sm:$0xff] }
  0x40   : > { %311 = vst [vmem:[%s6775_s16 + $0x158] sm:$0xff] %v310_v43  ;;  %v400_v24 = vld [vmem:[%s6770_s15 + $0xb00] sm:$0xff]  ;;  %v402_v25 = vld [vmem:[%s6770_s15 + $0xb08] sm:$0xff] }
  0x41   : > { %313 = vst [vmem:[%s6775_s16 + $0x160] sm:$0xff] %v312_v44  ;;  %v404_v26 = vld [vmem:[%s6770_s15 + $0xb40] sm:$0xff]  ;;  %v406_v27 = vld [vmem:[%s6770_s15 + $0xb48] sm:$0xff] }
  0x42   : > { %315 = vst [vmem:[%s6775_s16 + $0x168] sm:$0xff] %v314_v45  ;;  %v408_v28 = vld [vmem:[%s6770_s15 + $0xb80] sm:$0xff]  ;;  %v410_v29 = vld [vmem:[%s6770_s15 + $0xb88] sm:$0xff] }
  0x43   : > { %317 = vst [vmem:[%s6775_s16 + $0x170] sm:$0xff] %v316_v46  ;;  %v412_v30 = vld [vmem:[%s6770_s15 + $0xbc0] sm:$0xff]  ;;  %v414_v31 = vld [vmem:[%s6770_s15 + $0xbc8] sm:$0xff] }
  0x44   : > { %319 = vst [vmem:[%s6775_s16 + $0x178] sm:$0xff] %v318_v47  ;;  %v416_v32 = vld [vmem:[%s6770_s15 + $0xc00] sm:$0xff]  ;;  %v418_v33 = vld [vmem:[%s6770_s15 + $0xc08] sm:$0xff] }
  0x45   : > { %321 = vst [vmem:[%s6775_s16 + $0x180] sm:$0xff] %v320_v48  ;;  %v420_v34 = vld [vmem:[%s6770_s15 + $0xc40] sm:$0xff]  ;;  %v422_v35 = vld [vmem:[%s6770_s15 + $0xc48] sm:$0xff] }
  0x46   : > { %323 = vst [vmem:[%s6775_s16 + $0x188] sm:$0xff] %v322_v49 }
  0x47   : > { %325 = vst [vmem:[%s6775_s16 + $0x190] sm:$0xff] %v324_v50 }
  0x48   : > { %327 = vst [vmem:[%s6775_s16 + $0x198] sm:$0xff] %v326_v51 }
  0x49   : > { %329 = vst [vmem:[%s6775_s16 + $0x1a0] sm:$0xff] %v328_v52 }
  0x4a   : > { %331 = vst [vmem:[%s6775_s16 + $0x1a8] sm:$0xff] %v330_v53 }
  0x4b   : > { %333 = vst [vmem:[%s6775_s16 + $0x1b0] sm:$0xff] %v332_v54 }
  0x4c   : > { %335 = vst [vmem:[%s6775_s16 + $0x1b8] sm:$0xff] %v334_v55 }
  0x4d   : > { %337 = vst [vmem:[%s6775_s16 + $0x1c0] sm:$0xff] %v336_v56 }
  0x4e   : > { %339 = vst [vmem:[%s6775_s16 + $0x1c8] sm:$0xff] %v338_v57 }
  0x4f   : > { %341 = vst [vmem:[%s6775_s16 + $0x1d0] sm:$0xff] %v340_v58 }
  0x50   : > { %343 = vst [vmem:[%s6775_s16 + $0x1d8] sm:$0xff] %v342_v59 }
  0x51   : > { %345 = vst [vmem:[%s6775_s16 + $0x1e0] sm:$0xff] %v344_v60 }
  0x52   : > { %347 = vst [vmem:[%s6775_s16 + $0x1e8] sm:$0xff] %v346_v61 }
  0x53   : > { %349 = vst [vmem:[%s6775_s16 + $0x1f0] sm:$0xff] %v348_v62 }
  0x54   : > { %351 = vst [vmem:[%s6775_s16 + $0x1f8] sm:$0xff] %v350_v63 }
  0x55   : > { %353 = vst [vmem:[%s6775_s16 + $0x200] sm:$0xff] %v352_v0 }
  0x56   : > { %355 = vst [vmem:[%s6775_s16 + $0x208] sm:$0xff] %v354_v1 }
  0x57   : > { %357 = vst [vmem:[%s6775_s16 + $0x210] sm:$0xff] %v356_v2 }
  0x58   : > { %359 = vst [vmem:[%s6775_s16 + $0x218] sm:$0xff] %v358_v3 }
  0x59   : > { %361 = vst [vmem:[%s6775_s16 + $0x220] sm:$0xff] %v360_v4 }
  0x5a   : > { %363 = vst [vmem:[%s6775_s16 + $0x228] sm:$0xff] %v362_v5 }
  0x5b   : > { %365 = vst [vmem:[%s6775_s16 + $0x230] sm:$0xff] %v364_v6 }
  0x5c   : > { %367 = vst [vmem:[%s6775_s16 + $0x238] sm:$0xff] %v366_v7 }
  0x5d   : > { %369 = vst [vmem:[%s6775_s16 + $0x240] sm:$0xff] %v368_v8 }
  0x5e   : > { %371 = vst [vmem:[%s6775_s16 + $0x248] sm:$0xff] %v370_v9 }
  0x5f   : > { %373 = vst [vmem:[%s6775_s16 + $0x250] sm:$0xff] %v372_v10 }
  0x60   : > { %375 = vst [vmem:[%s6775_s16 + $0x258] sm:$0xff] %v374_v11 }
  0x61   : > { %377 = vst [vmem:[%s6775_s16 + $0x260] sm:$0xff] %v376_v12 }
  0x62   : > { %379 = vst [vmem:[%s6775_s16 + $0x268] sm:$0xff] %v378_v13 }
  0x63   : > { %381 = vst [vmem:[%s6775_s16 + $0x270] sm:$0xff] %v380_v14 }
  0x64   : > { %383 = vst [vmem:[%s6775_s16 + $0x278] sm:$0xff] %v382_v15 }
  0x65   : > { %385 = vst [vmem:[%s6775_s16 + $0x280] sm:$0xff] %v384_v16 }
  0x66   : > { %387 = vst [vmem:[%s6775_s16 + $0x288] sm:$0xff] %v386_v17 }
  0x67   : > { %389 = vst [vmem:[%s6775_s16 + $0x290] sm:$0xff] %v388_v18 }
  0x68   : > { %391 = vst [vmem:[%s6775_s16 + $0x298] sm:$0xff] %v390_v19 }
  0x69   : > { %393 = vst [vmem:[%s6775_s16 + $0x2a0] sm:$0xff] %v392_v20 }
  0x6a   : > { %395 = vst [vmem:[%s6775_s16 + $0x2a8] sm:$0xff] %v394_v21 }
  0x6b   : > { %397 = vst [vmem:[%s6775_s16 + $0x2b0] sm:$0xff] %v396_v22 }
  0x6c   : > { %399 = vst [vmem:[%s6775_s16 + $0x2b8] sm:$0xff] %v398_v23 }
  0x6d   : > { %401 = vst [vmem:[%s6775_s16 + $0x2c0] sm:$0xff] %v400_v24 }
  0x6e   : > { %403 = vst [vmem:[%s6775_s16 + $0x2c8] sm:$0xff] %v402_v25 }
  0x6f   : > { %405 = vst [vmem:[%s6775_s16 + $0x2d0] sm:$0xff] %v404_v26 }
  0x70   : > { %407 = vst [vmem:[%s6775_s16 + $0x2d8] sm:$0xff] %v406_v27 }
  0x71   : > { %409 = vst [vmem:[%s6775_s16 + $0x2e0] sm:$0xff] %v408_v28 }
  0x72   : > { %411 = vst [vmem:[%s6775_s16 + $0x2e8] sm:$0xff] %v410_v29 }
  0x73   : > { %413 = vst [vmem:[%s6775_s16 + $0x2f0] sm:$0xff] %v412_v30 }
  0x74   : > { %415 = vst [vmem:[%s6775_s16 + $0x2f8] sm:$0xff] %v414_v31 }
  0x75   : > { %417 = vst [vmem:[%s6775_s16 + $0x300] sm:$0xff] %v416_v32 }
  0x76   : > { %419 = vst [vmem:[%s6775_s16 + $0x308] sm:$0xff] %v418_v33 }
  0x77   : > { %421 = vst [vmem:[%s6775_s16 + $0x310] sm:$0xff] %v420_v34 }
  0x78   : > { %423 = vst [vmem:[%s6775_s16 + $0x318] sm:$0xff] %v422_v35 }
  0x79 PF: > { %429 = sbr.rel (!%p6746_p4) target bundleno = 381 (0x17d), region = 55  ;;  %s431_s17 = sand.u32 (%p6746_p4), 1, %s6649_s19  }
  0x7a   : > { %s6281_s27 = sshll.u32 (%p6746_p4), %s6753_s29, 4  ;;  %s5166_s30 = sshll.u32 (%p6746_p4), %s431_s17, 11 }
  0x7b   : > { %s6981_s8 = scalar_lea.vmem (%p6746_p4), %s9554_s4, %s6281_s27  ;;  %s6986_s28 = scalar_lea.vmem (%p6746_p4), [#allocation5], %s5166_s30 }
  0x7c   : > { %v451_v36 = vld [vmem:[%s6981_s8] sm:$0xff] (%p6746_p4)  ;;  %v453_v37 = vld [vmem:[%s6981_s8 + $0x8] sm:$0xff] (%p6746_p4) }
  0x7d   : > { %v455_v38 = vld [vmem:[%s6981_s8 + $0x40] sm:$0xff] (%p6746_p4)  ;;  %452 = vst [vmem:[%s6986_s28] sm:$0xff] (%p6746_p4), %v451_v36  ;;  %v457_v39 = vld [vmem:[%s6981_s8 + $0x48] sm:$0xff] (%p6746_p4) }
  0x7e   : > { %454 = vst [vmem:[%s6986_s28 + $0x8] sm:$0xff] %v453_v37  ;;  %v459_v40 = vld [vmem:[%s6981_s8 + $0x80] sm:$0xff]  ;;  %v461_v41 = vld [vmem:[%s6981_s8 + $0x88] sm:$0xff] }
  0x7f   : > { %456 = vst [vmem:[%s6986_s28 + $0x10] sm:$0xff] %v455_v38  ;;  %v463_v42 = vld [vmem:[%s6981_s8 + $0xc0] sm:$0xff]  ;;  %v465_v43 = vld [vmem:[%s6981_s8 + $0xc8] sm:$0xff] }
  0x80   : > { %458 = vst [vmem:[%s6986_s28 + $0x18] sm:$0xff] %v457_v39  ;;  %v467_v44 = vld [vmem:[%s6981_s8 + $0x100] sm:$0xff]  ;;  %v469_v45 = vld [vmem:[%s6981_s8 + $0x108] sm:$0xff] }
  0x81   : > { %460 = vst [vmem:[%s6986_s28 + $0x20] sm:$0xff] %v459_v40  ;;  %v471_v46 = vld [vmem:[%s6981_s8 + $0x140] sm:$0xff]  ;;  %v473_v47 = vld [vmem:[%s6981_s8 + $0x148] sm:$0xff] }
  0x82   : > { %462 = vst [vmem:[%s6986_s28 + $0x28] sm:$0xff] %v461_v41  ;;  %v475_v48 = vld [vmem:[%s6981_s8 + $0x180] sm:$0xff]  ;;  %v477_v49 = vld [vmem:[%s6981_s8 + $0x188] sm:$0xff] }
  0x83   : > { %464 = vst [vmem:[%s6986_s28 + $0x30] sm:$0xff] %v463_v42  ;;  %v479_v50 = vld [vmem:[%s6981_s8 + $0x1c0] sm:$0xff]  ;;  %v481_v51 = vld [vmem:[%s6981_s8 + $0x1c8] sm:$0xff] }
  0x84   : > { %466 = vst [vmem:[%s6986_s28 + $0x38] sm:$0xff] %v465_v43  ;;  %v483_v52 = vld [vmem:[%s6981_s8 + $0x200] sm:$0xff]  ;;  %v485_v53 = vld [vmem:[%s6981_s8 + $0x208] sm:$0xff] }
  0x85   : > { %468 = vst [vmem:[%s6986_s28 + $0x40] sm:$0xff] %v467_v44  ;;  %v487_v54 = vld [vmem:[%s6981_s8 + $0x240] sm:$0xff]  ;;  %v489_v55 = vld [vmem:[%s6981_s8 + $0x248] sm:$0xff] }
  0x86   : > { %470 = vst [vmem:[%s6986_s28 + $0x48] sm:$0xff] %v469_v45  ;;  %v491_v56 = vld [vmem:[%s6981_s8 + $0x280] sm:$0xff]  ;;  %v493_v57 = vld [vmem:[%s6981_s8 + $0x288] sm:$0xff] }
  0x87   : > { %472 = vst [vmem:[%s6986_s28 + $0x50] sm:$0xff] %v471_v46  ;;  %v495_v58 = vld [vmem:[%s6981_s8 + $0x2c0] sm:$0xff]  ;;  %v497_v59 = vld [vmem:[%s6981_s8 + $0x2c8] sm:$0xff] }
  0x88   : > { %474 = vst [vmem:[%s6986_s28 + $0x58] sm:$0xff] %v473_v47  ;;  %v499_v60 = vld [vmem:[%s6981_s8 + $0x300] sm:$0xff]  ;;  %v501_v61 = vld [vmem:[%s6981_s8 + $0x308] sm:$0xff] }
  0x89   : > { %476 = vst [vmem:[%s6986_s28 + $0x60] sm:$0xff] %v475_v48  ;;  %v503_v62 = vld [vmem:[%s6981_s8 + $0x340] sm:$0xff]  ;;  %v505_v63 = vld [vmem:[%s6981_s8 + $0x348] sm:$0xff] }
  0x8a   : > { %478 = vst [vmem:[%s6986_s28 + $0x68] sm:$0xff] %v477_v49  ;;  %v507_v0 = vld [vmem:[%s6981_s8 + $0x380] sm:$0xff]  ;;  %v509_v1 = vld [vmem:[%s6981_s8 + $0x388] sm:$0xff] }
  0x8b   : > { %480 = vst [vmem:[%s6986_s28 + $0x70] sm:$0xff] %v479_v50  ;;  %v511_v2 = vld [vmem:[%s6981_s8 + $0x3c0] sm:$0xff]  ;;  %v513_v3 = vld [vmem:[%s6981_s8 + $0x3c8] sm:$0xff] }
  0x8c   : > { %482 = vst [vmem:[%s6986_s28 + $0x78] sm:$0xff] %v481_v51  ;;  %v515_v4 = vld [vmem:[%s6981_s8 + $0x400] sm:$0xff]  ;;  %v517_v5 = vld [vmem:[%s6981_s8 + $0x408] sm:$0xff] }
  0x8d   : > { %484 = vst [vmem:[%s6986_s28 + $0x80] sm:$0xff] %v483_v52  ;;  %v519_v6 = vld [vmem:[%s6981_s8 + $0x440] sm:$0xff]  ;;  %v521_v7 = vld [vmem:[%s6981_s8 + $0x448] sm:$0xff] }
  0x8e   : > { %486 = vst [vmem:[%s6986_s28 + $0x88] sm:$0xff] %v485_v53  ;;  %v523_v8 = vld [vmem:[%s6981_s8 + $0x480] sm:$0xff]  ;;  %v525_v9 = vld [vmem:[%s6981_s8 + $0x488] sm:$0xff] }
  0x8f   : > { %488 = vst [vmem:[%s6986_s28 + $0x90] sm:$0xff] %v487_v54  ;;  %v527_v10 = vld [vmem:[%s6981_s8 + $0x4c0] sm:$0xff]  ;;  %v529_v11 = vld [vmem:[%s6981_s8 + $0x4c8] sm:$0xff] }
  0x90   : > { %490 = vst [vmem:[%s6986_s28 + $0x98] sm:$0xff] %v489_v55  ;;  %v531_v12 = vld [vmem:[%s6981_s8 + $0x500] sm:$0xff]  ;;  %v533_v13 = vld [vmem:[%s6981_s8 + $0x508] sm:$0xff] }
  0x91   : > { %492 = vst [vmem:[%s6986_s28 + $0xa0] sm:$0xff] %v491_v56  ;;  %v535_v14 = vld [vmem:[%s6981_s8 + $0x540] sm:$0xff]  ;;  %v537_v15 = vld [vmem:[%s6981_s8 + $0x548] sm:$0xff] }
  0x92   : > { %494 = vst [vmem:[%s6986_s28 + $0xa8] sm:$0xff] %v493_v57  ;;  %v539_v16 = vld [vmem:[%s6981_s8 + $0x580] sm:$0xff]  ;;  %v541_v17 = vld [vmem:[%s6981_s8 + $0x588] sm:$0xff] }
  0x93   : > { %496 = vst [vmem:[%s6986_s28 + $0xb0] sm:$0xff] %v495_v58  ;;  %v543_v18 = vld [vmem:[%s6981_s8 + $0x5c0] sm:$0xff]  ;;  %v545_v19 = vld [vmem:[%s6981_s8 + $0x5c8] sm:$0xff] }
  0x94   : > { %498 = vst [vmem:[%s6986_s28 + $0xb8] sm:$0xff] %v497_v59  ;;  %v547_v20 = vld [vmem:[%s6981_s8 + $0x600] sm:$0xff]  ;;  %v549_v21 = vld [vmem:[%s6981_s8 + $0x608] sm:$0xff] }
  0x95   : > { %500 = vst [vmem:[%s6986_s28 + $0xc0] sm:$0xff] %v499_v60  ;;  %v551_v22 = vld [vmem:[%s6981_s8 + $0x640] sm:$0xff]  ;;  %v553_v23 = vld [vmem:[%s6981_s8 + $0x648] sm:$0xff] }
  0x96   : > { %502 = vst [vmem:[%s6986_s28 + $0xc8] sm:$0xff] %v501_v61  ;;  %v555_v24 = vld [vmem:[%s6981_s8 + $0x680] sm:$0xff]  ;;  %v557_v25 = vld [vmem:[%s6981_s8 + $0x688] sm:$0xff] }
  0x97   : > { %504 = vst [vmem:[%s6986_s28 + $0xd0] sm:$0xff] %v503_v62  ;;  %v559_v26 = vld [vmem:[%s6981_s8 + $0x6c0] sm:$0xff]  ;;  %v561_v27 = vld [vmem:[%s6981_s8 + $0x6c8] sm:$0xff] }
  0x98   : > { %506 = vst [vmem:[%s6986_s28 + $0xd8] sm:$0xff] %v505_v63  ;;  %v563_v28 = vld [vmem:[%s6981_s8 + $0x700] sm:$0xff]  ;;  %v565_v29 = vld [vmem:[%s6981_s8 + $0x708] sm:$0xff] }
  0x99   : > { %508 = vst [vmem:[%s6986_s28 + $0xe0] sm:$0xff] %v507_v0  ;;  %v567_v30 = vld [vmem:[%s6981_s8 + $0x740] sm:$0xff]  ;;  %v569_v31 = vld [vmem:[%s6981_s8 + $0x748] sm:$0xff] }
  0x9a   : > { %510 = vst [vmem:[%s6986_s28 + $0xe8] sm:$0xff] %v509_v1  ;;  %v571_v32 = vld [vmem:[%s6981_s8 + $0x780] sm:$0xff]  ;;  %v573_v33 = vld [vmem:[%s6981_s8 + $0x788] sm:$0xff] }
  0x9b   : > { %512 = vst [vmem:[%s6986_s28 + $0xf0] sm:$0xff] %v511_v2  ;;  %v575_v34 = vld [vmem:[%s6981_s8 + $0x7c0] sm:$0xff]  ;;  %v577_v35 = vld [vmem:[%s6981_s8 + $0x7c8] sm:$0xff] }
  0x9c   : > { %514 = vst [vmem:[%s6986_s28 + $0xf8] sm:$0xff] %v513_v3  ;;  %v579_v36 = vld [vmem:[%s6981_s8 + $0x800] sm:$0xff]  ;;  %v581_v37 = vld [vmem:[%s6981_s8 + $0x808] sm:$0xff] }
  0x9d   : > { %516 = vst [vmem:[%s6986_s28 + $0x100] sm:$0xff] %v515_v4  ;;  %v583_v38 = vld [vmem:[%s6981_s8 + $0x840] sm:$0xff]  ;;  %v585_v39 = vld [vmem:[%s6981_s8 + $0x848] sm:$0xff] }
  0x9e   : > { %518 = vst [vmem:[%s6986_s28 + $0x108] sm:$0xff] %v517_v5  ;;  %v587_v40 = vld [vmem:[%s6981_s8 + $0x880] sm:$0xff]  ;;  %v589_v41 = vld [vmem:[%s6981_s8 + $0x888] sm:$0xff] }
  0x9f   : > { %520 = vst [vmem:[%s6986_s28 + $0x110] sm:$0xff] %v519_v6  ;;  %v591_v42 = vld [vmem:[%s6981_s8 + $0x8c0] sm:$0xff]  ;;  %v593_v43 = vld [vmem:[%s6981_s8 + $0x8c8] sm:$0xff] }
  0xa0   : > { %522 = vst [vmem:[%s6986_s28 + $0x118] sm:$0xff] %v521_v7  ;;  %v595_v44 = vld [vmem:[%s6981_s8 + $0x900] sm:$0xff]  ;;  %v597_v45 = vld [vmem:[%s6981_s8 + $0x908] sm:$0xff] }
  0xa1   : > { %524 = vst [vmem:[%s6986_s28 + $0x120] sm:$0xff] %v523_v8  ;;  %v599_v46 = vld [vmem:[%s6981_s8 + $0x940] sm:$0xff]  ;;  %v601_v47 = vld [vmem:[%s6981_s8 + $0x948] sm:$0xff] }
  0xa2   : > { %526 = vst [vmem:[%s6986_s28 + $0x128] sm:$0xff] %v525_v9  ;;  %v603_v48 = vld [vmem:[%s6981_s8 + $0x980] sm:$0xff]  ;;  %v605_v49 = vld [vmem:[%s6981_s8 + $0x988] sm:$0xff] }
  0xa3   : > { %528 = vst [vmem:[%s6986_s28 + $0x130] sm:$0xff] %v527_v10  ;;  %v607_v50 = vld [vmem:[%s6981_s8 + $0x9c0] sm:$0xff]  ;;  %v609_v51 = vld [vmem:[%s6981_s8 + $0x9c8] sm:$0xff] }
  0xa4   : > { %530 = vst [vmem:[%s6986_s28 + $0x138] sm:$0xff] %v529_v11  ;;  %v611_v52 = vld [vmem:[%s6981_s8 + $0xa00] sm:$0xff]  ;;  %v613_v53 = vld [vmem:[%s6981_s8 + $0xa08] sm:$0xff] }
  0xa5   : > { %532 = vst [vmem:[%s6986_s28 + $0x140] sm:$0xff] %v531_v12  ;;  %v615_v54 = vld [vmem:[%s6981_s8 + $0xa40] sm:$0xff]  ;;  %v617_v55 = vld [vmem:[%s6981_s8 + $0xa48] sm:$0xff] }
  0xa6   : > { %534 = vst [vmem:[%s6986_s28 + $0x148] sm:$0xff] %v533_v13  ;;  %v619_v56 = vld [vmem:[%s6981_s8 + $0xa80] sm:$0xff]  ;;  %v621_v57 = vld [vmem:[%s6981_s8 + $0xa88] sm:$0xff] }
  0xa7   : > { %536 = vst [vmem:[%s6986_s28 + $0x150] sm:$0xff] %v535_v14  ;;  %v623_v58 = vld [vmem:[%s6981_s8 + $0xac0] sm:$0xff]  ;;  %v625_v59 = vld [vmem:[%s6981_s8 + $0xac8] sm:$0xff] }
  0xa8   : > { %538 = vst [vmem:[%s6986_s28 + $0x158] sm:$0xff] %v537_v15  ;;  %v627_v60 = vld [vmem:[%s6981_s8 + $0xb00] sm:$0xff]  ;;  %v629_v61 = vld [vmem:[%s6981_s8 + $0xb08] sm:$0xff] }
  0xa9   : > { %540 = vst [vmem:[%s6986_s28 + $0x160] sm:$0xff] %v539_v16  ;;  %v631_v62 = vld [vmem:[%s6981_s8 + $0xb40] sm:$0xff]  ;;  %v633_v63 = vld [vmem:[%s6981_s8 + $0xb48] sm:$0xff] }
  0xaa   : > { %542 = vst [vmem:[%s6986_s28 + $0x168] sm:$0xff] %v541_v17  ;;  %v635_v0 = vld [vmem:[%s6981_s8 + $0xb80] sm:$0xff]  ;;  %v637_v1 = vld [vmem:[%s6981_s8 + $0xb88] sm:$0xff] }
  0xab   : > { %544 = vst [vmem:[%s6986_s28 + $0x170] sm:$0xff] %v543_v18  ;;  %v639_v2 = vld [vmem:[%s6981_s8 + $0xbc0] sm:$0xff]  ;;  %v641_v3 = vld [vmem:[%s6981_s8 + $0xbc8] sm:$0xff] }
  0xac   : > { %546 = vst [vmem:[%s6986_s28 + $0x178] sm:$0xff] %v545_v19  ;;  %v643_v4 = vld [vmem:[%s6981_s8 + $0xc00] sm:$0xff]  ;;  %v645_v5 = vld [vmem:[%s6981_s8 + $0xc08] sm:$0xff] }
  0xad   : > { %548 = vst [vmem:[%s6986_s28 + $0x180] sm:$0xff] %v547_v20  ;;  %v647_v6 = vld [vmem:[%s6981_s8 + $0xc40] sm:$0xff]  ;;  %v649_v7 = vld [vmem:[%s6981_s8 + $0xc48] sm:$0xff] }
  0xae   : > { %550 = vst [vmem:[%s6986_s28 + $0x188] sm:$0xff] %v549_v21  ;;  %v651_v8 = vld [vmem:[%s6981_s8 + $0xc80] sm:$0xff]  ;;  %v653_v9 = vld [vmem:[%s6981_s8 + $0xc88] sm:$0xff] }
  0xaf   : > { %552 = vst [vmem:[%s6986_s28 + $0x190] sm:$0xff] %v551_v22  ;;  %v655_v10 = vld [vmem:[%s6981_s8 + $0xcc0] sm:$0xff]  ;;  %v657_v11 = vld [vmem:[%s6981_s8 + $0xcc8] sm:$0xff] }
  0xb0   : > { %554 = vst [vmem:[%s6986_s28 + $0x198] sm:$0xff] %v553_v23  ;;  %v659_v12 = vld [vmem:[%s6981_s8 + $0xd00] sm:$0xff]  ;;  %v661_v13 = vld [vmem:[%s6981_s8 + $0xd08] sm:$0xff] }
  0xb1   : > { %556 = vst [vmem:[%s6986_s28 + $0x1a0] sm:$0xff] %v555_v24  ;;  %v663_v14 = vld [vmem:[%s6981_s8 + $0xd40] sm:$0xff]  ;;  %v665_v15 = vld [vmem:[%s6981_s8 + $0xd48] sm:$0xff] }
  0xb2   : > { %558 = vst [vmem:[%s6986_s28 + $0x1a8] sm:$0xff] %v557_v25  ;;  %v667_v16 = vld [vmem:[%s6981_s8 + $0xd80] sm:$0xff]  ;;  %v669_v17 = vld [vmem:[%s6981_s8 + $0xd88] sm:$0xff] }
  0xb3   : > { %560 = vst [vmem:[%s6986_s28 + $0x1b0] sm:$0xff] %v559_v26  ;;  %v671_v18 = vld [vmem:[%s6981_s8 + $0xdc0] sm:$0xff]  ;;  %v673_v19 = vld [vmem:[%s6981_s8 + $0xdc8] sm:$0xff] }
  0xb4   : > { %562 = vst [vmem:[%s6986_s28 + $0x1b8] sm:$0xff] %v561_v27  ;;  %v675_v20 = vld [vmem:[%s6981_s8 + $0xe00] sm:$0xff]  ;;  %v677_v21 = vld [vmem:[%s6981_s8 + $0xe08] sm:$0xff] }
  0xb5   : > { %564 = vst [vmem:[%s6986_s28 + $0x1c0] sm:$0xff] %v563_v28  ;;  %v679_v22 = vld [vmem:[%s6981_s8 + $0xe40] sm:$0xff]  ;;  %v681_v23 = vld [vmem:[%s6981_s8 + $0xe48] sm:$0xff] }
  0xb6   : > { %566 = vst [vmem:[%s6986_s28 + $0x1c8] sm:$0xff] %v565_v29  ;;  %v683_v24 = vld [vmem:[%s6981_s8 + $0xe80] sm:$0xff]  ;;  %v685_v25 = vld [vmem:[%s6981_s8 + $0xe88] sm:$0xff] }
  0xb7   : > { %568 = vst [vmem:[%s6986_s28 + $0x1d0] sm:$0xff] %v567_v30  ;;  %v687_v26 = vld [vmem:[%s6981_s8 + $0xec0] sm:$0xff]  ;;  %v689_v27 = vld [vmem:[%s6981_s8 + $0xec8] sm:$0xff] }
  0xb8   : > { %570 = vst [vmem:[%s6986_s28 + $0x1d8] sm:$0xff] %v569_v31  ;;  %v691_v28 = vld [vmem:[%s6981_s8 + $0xf00] sm:$0xff]  ;;  %v693_v29 = vld [vmem:[%s6981_s8 + $0xf08] sm:$0xff] }
  0xb9   : > { %572 = vst [vmem:[%s6986_s28 + $0x1e0] sm:$0xff] %v571_v32  ;;  %v695_v30 = vld [vmem:[%s6981_s8 + $0xf40] sm:$0xff]  ;;  %v697_v31 = vld [vmem:[%s6981_s8 + $0xf48] sm:$0xff] }
  0xba   : > { %574 = vst [vmem:[%s6986_s28 + $0x1e8] sm:$0xff] %v573_v33  ;;  %v699_v32 = vld [vmem:[%s6981_s8 + $0xf80] sm:$0xff]  ;;  %v701_v33 = vld [vmem:[%s6981_s8 + $0xf88] sm:$0xff] }
  0xbb   : > { %576 = vst [vmem:[%s6986_s28 + $0x1f0] sm:$0xff] %v575_v34  ;;  %v703_v34 = vld [vmem:[%s6981_s8 + $0xfc0] sm:$0xff] }
  0xbc   : > { %578 = vst [vmem:[%s6986_s28 + $0x1f8] sm:$0xff] %v577_v35  ;;  %v705_v35 = vld [vmem:[%s6981_s8 + $0xfc8] sm:$0xff] }
  0xbd   : > { %580 = vst [vmem:[%s6986_s28 + $0x200] sm:$0xff] %v579_v36  ;;  %v707_v36 = vld [vmem:[%s6981_s8 + $0x1000] sm:$0xff] }
  0xbe   : > { %582 = vst [vmem:[%s6986_s28 + $0x208] sm:$0xff] %v581_v37  ;;  %v709_v37 = vld [vmem:[%s6981_s8 + $0x1008] sm:$0xff] }
  0xbf   : > { %584 = vst [vmem:[%s6986_s28 + $0x210] sm:$0xff] %v583_v38  ;;  %v711_v38 = vld [vmem:[%s6981_s8 + $0x1040] sm:$0xff] }
  0xc0   : > { %586 = vst [vmem:[%s6986_s28 + $0x218] sm:$0xff] %v585_v39  ;;  %v713_v39 = vld [vmem:[%s6981_s8 + $0x1048] sm:$0xff] }
  0xc1   : > { %588 = vst [vmem:[%s6986_s28 + $0x220] sm:$0xff] %v587_v40  ;;  %v715_v40 = vld [vmem:[%s6981_s8 + $0x1080] sm:$0xff] }
  0xc2   : > { %590 = vst [vmem:[%s6986_s28 + $0x228] sm:$0xff] %v589_v41  ;;  %v717_v41 = vld [vmem:[%s6981_s8 + $0x1088] sm:$0xff] }
  0xc3   : > { %592 = vst [vmem:[%s6986_s28 + $0x230] sm:$0xff] %v591_v42  ;;  %v719_v42 = vld [vmem:[%s6981_s8 + $0x10c0] sm:$0xff] }
  0xc4   : > { %594 = vst [vmem:[%s6986_s28 + $0x238] sm:$0xff] %v593_v43  ;;  %v721_v43 = vld [vmem:[%s6981_s8 + $0x10c8] sm:$0xff] }
  0xc5   : > { %596 = vst [vmem:[%s6986_s28 + $0x240] sm:$0xff] %v595_v44  ;;  %v723_v44 = vld [vmem:[%s6981_s8 + $0x1100] sm:$0xff] }
  0xc6   : > { %598 = vst [vmem:[%s6986_s28 + $0x248] sm:$0xff] %v597_v45  ;;  %v725_v45 = vld [vmem:[%s6981_s8 + $0x1108] sm:$0xff] }
  0xc7   : > { %600 = vst [vmem:[%s6986_s28 + $0x250] sm:$0xff] %v599_v46  ;;  %v727_v46 = vld [vmem:[%s6981_s8 + $0x1140] sm:$0xff] }
  0xc8   : > { %602 = vst [vmem:[%s6986_s28 + $0x258] sm:$0xff] %v601_v47  ;;  %v729_v47 = vld [vmem:[%s6981_s8 + $0x1148] sm:$0xff] }
  0xc9   : > { %604 = vst [vmem:[%s6986_s28 + $0x260] sm:$0xff] %v603_v48  ;;  %v731_v48 = vld [vmem:[%s6981_s8 + $0x1180] sm:$0xff] }
  0xca   : > { %606 = vst [vmem:[%s6986_s28 + $0x268] sm:$0xff] %v605_v49  ;;  %v733_v49 = vld [vmem:[%s6981_s8 + $0x1188] sm:$0xff] }
  0xcb   : > { %608 = vst [vmem:[%s6986_s28 + $0x270] sm:$0xff] %v607_v50  ;;  %v735_v50 = vld [vmem:[%s6981_s8 + $0x11c0] sm:$0xff] }
  0xcc   : > { %610 = vst [vmem:[%s6986_s28 + $0x278] sm:$0xff] %v609_v51  ;;  %v737_v51 = vld [vmem:[%s6981_s8 + $0x11c8] sm:$0xff] }
  0xcd   : > { %612 = vst [vmem:[%s6986_s28 + $0x280] sm:$0xff] %v611_v52  ;;  %v739_v52 = vld [vmem:[%s6981_s8 + $0x1200] sm:$0xff] }
  0xce   : > { %614 = vst [vmem:[%s6986_s28 + $0x288] sm:$0xff] %v613_v53  ;;  %v741_v53 = vld [vmem:[%s6981_s8 + $0x1208] sm:$0xff] }
  0xcf   : > { %616 = vst [vmem:[%s6986_s28 + $0x290] sm:$0xff] %v615_v54  ;;  %v743_v54 = vld [vmem:[%s6981_s8 + $0x1240] sm:$0xff] }
  0xd0   : > { %618 = vst [vmem:[%s6986_s28 + $0x298] sm:$0xff] %v617_v55  ;;  %v745_v55 = vld [vmem:[%s6981_s8 + $0x1248] sm:$0xff] }
  0xd1   : > { %620 = vst [vmem:[%s6986_s28 + $0x2a0] sm:$0xff] %v619_v56  ;;  %v747_v56 = vld [vmem:[%s6981_s8 + $0x1280] sm:$0xff] }
  0xd2   : > { %622 = vst [vmem:[%s6986_s28 + $0x2a8] sm:$0xff] %v621_v57  ;;  %v749_v57 = vld [vmem:[%s6981_s8 + $0x1288] sm:$0xff] }
  0xd3   : > { %624 = vst [vmem:[%s6986_s28 + $0x2b0] sm:$0xff] %v623_v58  ;;  %v751_v58 = vld [vmem:[%s6981_s8 + $0x12c0] sm:$0xff] }
  0xd4   : > { %626 = vst [vmem:[%s6986_s28 + $0x2b8] sm:$0xff] %v625_v59  ;;  %v753_v59 = vld [vmem:[%s6981_s8 + $0x12c8] sm:$0xff] }
  0xd5   : > { %628 = vst [vmem:[%s6986_s28 + $0x2c0] sm:$0xff] %v627_v60  ;;  %v755_v60 = vld [vmem:[%s6981_s8 + $0x1300] sm:$0xff] }
  0xd6   : > { %630 = vst [vmem:[%s6986_s28 + $0x2c8] sm:$0xff] %v629_v61  ;;  %v757_v61 = vld [vmem:[%s6981_s8 + $0x1308] sm:$0xff] }
  0xd7   : > { %632 = vst [vmem:[%s6986_s28 + $0x2d0] sm:$0xff] %v631_v62  ;;  %v759_v62 = vld [vmem:[%s6981_s8 + $0x1340] sm:$0xff] }
  0xd8   : > { %634 = vst [vmem:[%s6986_s28 + $0x2d8] sm:$0xff] %v633_v63  ;;  %v761_v63 = vld [vmem:[%s6981_s8 + $0x1348] sm:$0xff] }
  0xd9   : > { %636 = vst [vmem:[%s6986_s28 + $0x2e0] sm:$0xff] %v635_v0  ;;  %v763_v0 = vld [vmem:[%s6981_s8 + $0x1380] sm:$0xff] }
  0xda   : > { %638 = vst [vmem:[%s6986_s28 + $0x2e8] sm:$0xff] %v637_v1  ;;  %v765_v1 = vld [vmem:[%s6981_s8 + $0x1388] sm:$0xff] }
  0xdb   : > { %640 = vst [vmem:[%s6986_s28 + $0x2f0] sm:$0xff] %v639_v2  ;;  %v767_v2 = vld [vmem:[%s6981_s8 + $0x13c0] sm:$0xff] }
  0xdc   : > { %642 = vst [vmem:[%s6986_s28 + $0x2f8] sm:$0xff] %v641_v3  ;;  %v769_v3 = vld [vmem:[%s6981_s8 + $0x13c8] sm:$0xff] }
  0xdd   : > { %644 = vst [vmem:[%s6986_s28 + $0x300] sm:$0xff] %v643_v4  ;;  %v771_v4 = vld [vmem:[%s6981_s8 + $0x1400] sm:$0xff] }
  0xde   : > { %646 = vst [vmem:[%s6986_s28 + $0x308] sm:$0xff] %v645_v5  ;;  %v773_v5 = vld [vmem:[%s6981_s8 + $0x1408] sm:$0xff] }
  0xdf   : > { %648 = vst [vmem:[%s6986_s28 + $0x310] sm:$0xff] %v647_v6  ;;  %v775_v6 = vld [vmem:[%s6981_s8 + $0x1440] sm:$0xff] }
  0xe0   : > { %650 = vst [vmem:[%s6986_s28 + $0x318] sm:$0xff] %v649_v7  ;;  %v777_v7 = vld [vmem:[%s6981_s8 + $0x1448] sm:$0xff] }
  0xe1   : > { %652 = vst [vmem:[%s6986_s28 + $0x320] sm:$0xff] %v651_v8  ;;  %v779_v8 = vld [vmem:[%s6981_s8 + $0x1480] sm:$0xff] }
  0xe2   : > { %654 = vst [vmem:[%s6986_s28 + $0x328] sm:$0xff] %v653_v9  ;;  %v781_v9 = vld [vmem:[%s6981_s8 + $0x1488] sm:$0xff] }
  0xe3   : > { %656 = vst [vmem:[%s6986_s28 + $0x330] sm:$0xff] %v655_v10  ;;  %v783_v10 = vld [vmem:[%s6981_s8 + $0x14c0] sm:$0xff] }
  0xe4   : > { %658 = vst [vmem:[%s6986_s28 + $0x338] sm:$0xff] %v657_v11  ;;  %v785_v11 = vld [vmem:[%s6981_s8 + $0x14c8] sm:$0xff] }
  0xe5   : > { %660 = vst [vmem:[%s6986_s28 + $0x340] sm:$0xff] %v659_v12  ;;  %v787_v12 = vld [vmem:[%s6981_s8 + $0x1500] sm:$0xff] }
  0xe6   : > { %662 = vst [vmem:[%s6986_s28 + $0x348] sm:$0xff] %v661_v13  ;;  %v789_v13 = vld [vmem:[%s6981_s8 + $0x1508] sm:$0xff] }
  0xe7   : > { %664 = vst [vmem:[%s6986_s28 + $0x350] sm:$0xff] %v663_v14  ;;  %v791_v14 = vld [vmem:[%s6981_s8 + $0x1540] sm:$0xff] }
  0xe8   : > { %666 = vst [vmem:[%s6986_s28 + $0x358] sm:$0xff] %v665_v15  ;;  %v793_v15 = vld [vmem:[%s6981_s8 + $0x1548] sm:$0xff] }
  0xe9   : > { %668 = vst [vmem:[%s6986_s28 + $0x360] sm:$0xff] %v667_v16  ;;  %v795_v16 = vld [vmem:[%s6981_s8 + $0x1580] sm:$0xff] }
  0xea   : > { %670 = vst [vmem:[%s6986_s28 + $0x368] sm:$0xff] %v669_v17  ;;  %v797_v17 = vld [vmem:[%s6981_s8 + $0x1588] sm:$0xff] }
  0xeb   : > { %672 = vst [vmem:[%s6986_s28 + $0x370] sm:$0xff] %v671_v18  ;;  %v799_v18 = vld [vmem:[%s6981_s8 + $0x15c0] sm:$0xff] }
  0xec   : > { %674 = vst [vmem:[%s6986_s28 + $0x378] sm:$0xff] %v673_v19  ;;  %v801_v19 = vld [vmem:[%s6981_s8 + $0x15c8] sm:$0xff] }
  0xed   : > { %676 = vst [vmem:[%s6986_s28 + $0x380] sm:$0xff] %v675_v20  ;;  %v803_v20 = vld [vmem:[%s6981_s8 + $0x1600] sm:$0xff] }
  0xee   : > { %678 = vst [vmem:[%s6986_s28 + $0x388] sm:$0xff] %v677_v21  ;;  %v805_v21 = vld [vmem:[%s6981_s8 + $0x1608] sm:$0xff] }
  0xef   : > { %680 = vst [vmem:[%s6986_s28 + $0x390] sm:$0xff] %v679_v22  ;;  %v807_v22 = vld [vmem:[%s6981_s8 + $0x1640] sm:$0xff] }
  0xf0   : > { %682 = vst [vmem:[%s6986_s28 + $0x398] sm:$0xff] %v681_v23  ;;  %v809_v23 = vld [vmem:[%s6981_s8 + $0x1648] sm:$0xff] }
  0xf1   : > { %684 = vst [vmem:[%s6986_s28 + $0x3a0] sm:$0xff] %v683_v24  ;;  %v811_v24 = vld [vmem:[%s6981_s8 + $0x1680] sm:$0xff] }
  0xf2   : > { %686 = vst [vmem:[%s6986_s28 + $0x3a8] sm:$0xff] %v685_v25  ;;  %v813_v25 = vld [vmem:[%s6981_s8 + $0x1688] sm:$0xff] }
  0xf3   : > { %688 = vst [vmem:[%s6986_s28 + $0x3b0] sm:$0xff] %v687_v26  ;;  %v815_v26 = vld [vmem:[%s6981_s8 + $0x16c0] sm:$0xff] }
  0xf4   : > { %690 = vst [vmem:[%s6986_s28 + $0x3b8] sm:$0xff] %v689_v27  ;;  %v817_v27 = vld [vmem:[%s6981_s8 + $0x16c8] sm:$0xff] }
  0xf5   : > { %692 = vst [vmem:[%s6986_s28 + $0x3c0] sm:$0xff] %v691_v28  ;;  %v819_v28 = vld [vmem:[%s6981_s8 + $0x1700] sm:$0xff] }
  0xf6   : > { %694 = vst [vmem:[%s6986_s28 + $0x3c8] sm:$0xff] %v693_v29  ;;  %v821_v29 = vld [vmem:[%s6981_s8 + $0x1708] sm:$0xff] }
  0xf7   : > { %696 = vst [vmem:[%s6986_s28 + $0x3d0] sm:$0xff] %v695_v30  ;;  %v823_v30 = vld [vmem:[%s6981_s8 + $0x1740] sm:$0xff] }
  0xf8   : > { %698 = vst [vmem:[%s6986_s28 + $0x3d8] sm:$0xff] %v697_v31  ;;  %v825_v31 = vld [vmem:[%s6981_s8 + $0x1748] sm:$0xff] }
  0xf9   : > { %700 = vst [vmem:[%s6986_s28 + $0x3e0] sm:$0xff] %v699_v32  ;;  %v827_v32 = vld [vmem:[%s6981_s8 + $0x1780] sm:$0xff] }
  0xfa   : > { %702 = vst [vmem:[%s6986_s28 + $0x3e8] sm:$0xff] %v701_v33  ;;  %v829_v33 = vld [vmem:[%s6981_s8 + $0x1788] sm:$0xff] }
  0xfb   : > { %704 = vst [vmem:[%s6986_s28 + $0x3f0] sm:$0xff] %v703_v34  ;;  %v831_v34 = vld [vmem:[%s6981_s8 + $0x17c0] sm:$0xff] }
  0xfc   : > { %706 = vst [vmem:[%s6986_s28 + $0x3f8] sm:$0xff] %v705_v35  ;;  %v833_v35 = vld [vmem:[%s6981_s8 + $0x17c8] sm:$0xff] }
  0xfd   : > { %708 = vst [vmem:[%s6986_s28 + $0x400] sm:$0xff] %v707_v36  ;;  %v835_v36 = vld [vmem:[%s6981_s8 + $0x1800] sm:$0xff] }
  0xfe   : > { %710 = vst [vmem:[%s6986_s28 + $0x408] sm:$0xff] %v709_v37  ;;  %v837_v37 = vld [vmem:[%s6981_s8 + $0x1808] sm:$0xff] }
  0xff   : > { %712 = vst [vmem:[%s6986_s28 + $0x410] sm:$0xff] %v711_v38  ;;  %v839_v38 = vld [vmem:[%s6981_s8 + $0x1840] sm:$0xff] }
 0x100   : > { %714 = vst [vmem:[%s6986_s28 + $0x418] sm:$0xff] %v713_v39  ;;  %v841_v39 = vld [vmem:[%s6981_s8 + $0x1848] sm:$0xff] }
 0x101   : > { %716 = vst [vmem:[%s6986_s28 + $0x420] sm:$0xff] %v715_v40  ;;  %v843_v40 = vld [vmem:[%s6981_s8 + $0x1880] sm:$0xff] }
 0x102   : > { %718 = vst [vmem:[%s6986_s28 + $0x428] sm:$0xff] %v717_v41  ;;  %v845_v41 = vld [vmem:[%s6981_s8 + $0x1888] sm:$0xff] }
 0x103   : > { %720 = vst [vmem:[%s6986_s28 + $0x430] sm:$0xff] %v719_v42  ;;  %v847_v42 = vld [vmem:[%s6981_s8 + $0x18c0] sm:$0xff] }
 0x104   : > { %722 = vst [vmem:[%s6986_s28 + $0x438] sm:$0xff] %v721_v43  ;;  %v849_v43 = vld [vmem:[%s6981_s8 + $0x18c8] sm:$0xff] }
 0x105   : > { %724 = vst [vmem:[%s6986_s28 + $0x440] sm:$0xff] %v723_v44  ;;  %v851_v44 = vld [vmem:[%s6981_s8 + $0x1900] sm:$0xff] }
 0x106   : > { %726 = vst [vmem:[%s6986_s28 + $0x448] sm:$0xff] %v725_v45  ;;  %v853_v45 = vld [vmem:[%s6981_s8 + $0x1908] sm:$0xff] }
 0x107   : > { %728 = vst [vmem:[%s6986_s28 + $0x450] sm:$0xff] %v727_v46  ;;  %v855_v46 = vld [vmem:[%s6981_s8 + $0x1940] sm:$0xff] }
 0x108   : > { %730 = vst [vmem:[%s6986_s28 + $0x458] sm:$0xff] %v729_v47  ;;  %v857_v47 = vld [vmem:[%s6981_s8 + $0x1948] sm:$0xff] }
 0x109   : > { %732 = vst [vmem:[%s6986_s28 + $0x460] sm:$0xff] %v731_v48  ;;  %v859_v48 = vld [vmem:[%s6981_s8 + $0x1980] sm:$0xff] }
 0x10a   : > { %734 = vst [vmem:[%s6986_s28 + $0x468] sm:$0xff] %v733_v49  ;;  %v861_v49 = vld [vmem:[%s6981_s8 + $0x1988] sm:$0xff] }
 0x10b   : > { %736 = vst [vmem:[%s6986_s28 + $0x470] sm:$0xff] %v735_v50  ;;  %v863_v50 = vld [vmem:[%s6981_s8 + $0x19c0] sm:$0xff] }
 0x10c   : > { %738 = vst [vmem:[%s6986_s28 + $0x478] sm:$0xff] %v737_v51  ;;  %v865_v51 = vld [vmem:[%s6981_s8 + $0x19c8] sm:$0xff] }
 0x10d   : > { %740 = vst [vmem:[%s6986_s28 + $0x480] sm:$0xff] %v739_v52  ;;  %v867_v52 = vld [vmem:[%s6981_s8 + $0x1a00] sm:$0xff] }
 0x10e   : > { %742 = vst [vmem:[%s6986_s28 + $0x488] sm:$0xff] %v741_v53  ;;  %v869_v53 = vld [vmem:[%s6981_s8 + $0x1a08] sm:$0xff] }
 0x10f   : > { %744 = vst [vmem:[%s6986_s28 + $0x490] sm:$0xff] %v743_v54  ;;  %v871_v54 = vld [vmem:[%s6981_s8 + $0x1a40] sm:$0xff] }
 0x110   : > { %746 = vst [vmem:[%s6986_s28 + $0x498] sm:$0xff] %v745_v55  ;;  %v873_v55 = vld [vmem:[%s6981_s8 + $0x1a48] sm:$0xff] }
 0x111   : > { %748 = vst [vmem:[%s6986_s28 + $0x4a0] sm:$0xff] %v747_v56  ;;  %v875_v56 = vld [vmem:[%s6981_s8 + $0x1a80] sm:$0xff] }
 0x112   : > { %750 = vst [vmem:[%s6986_s28 + $0x4a8] sm:$0xff] %v749_v57  ;;  %v877_v57 = vld [vmem:[%s6981_s8 + $0x1a88] sm:$0xff] }
 0x113   : > { %752 = vst [vmem:[%s6986_s28 + $0x4b0] sm:$0xff] %v751_v58  ;;  %v879_v58 = vld [vmem:[%s6981_s8 + $0x1ac0] sm:$0xff] }
 0x114   : > { %754 = vst [vmem:[%s6986_s28 + $0x4b8] sm:$0xff] %v753_v59  ;;  %v881_v59 = vld [vmem:[%s6981_s8 + $0x1ac8] sm:$0xff] }
 0x115   : > { %756 = vst [vmem:[%s6986_s28 + $0x4c0] sm:$0xff] %v755_v60  ;;  %v883_v60 = vld [vmem:[%s6981_s8 + $0x1b00] sm:$0xff] }
 0x116   : > { %758 = vst [vmem:[%s6986_s28 + $0x4c8] sm:$0xff] %v757_v61  ;;  %v885_v61 = vld [vmem:[%s6981_s8 + $0x1b08] sm:$0xff] }
 0x117   : > { %760 = vst [vmem:[%s6986_s28 + $0x4d0] sm:$0xff] %v759_v62  ;;  %v887_v62 = vld [vmem:[%s6981_s8 + $0x1b40] sm:$0xff] }
 0x118   : > { %762 = vst [vmem:[%s6986_s28 + $0x4d8] sm:$0xff] %v761_v63  ;;  %v889_v63 = vld [vmem:[%s6981_s8 + $0x1b48] sm:$0xff] }
 0x119   : > { %764 = vst [vmem:[%s6986_s28 + $0x4e0] sm:$0xff] %v763_v0  ;;  %v891_v0 = vld [vmem:[%s6981_s8 + $0x1b80] sm:$0xff] }
 0x11a   : > { %766 = vst [vmem:[%s6986_s28 + $0x4e8] sm:$0xff] %v765_v1  ;;  %v893_v1 = vld [vmem:[%s6981_s8 + $0x1b88] sm:$0xff] }
 0x11b   : > { %768 = vst [vmem:[%s6986_s28 + $0x4f0] sm:$0xff] %v767_v2  ;;  %v895_v2 = vld [vmem:[%s6981_s8 + $0x1bc0] sm:$0xff] }
 0x11c   : > { %770 = vst [vmem:[%s6986_s28 + $0x4f8] sm:$0xff] %v769_v3  ;;  %v897_v3 = vld [vmem:[%s6981_s8 + $0x1bc8] sm:$0xff] }
 0x11d   : > { %772 = vst [vmem:[%s6986_s28 + $0x500] sm:$0xff] %v771_v4  ;;  %v899_v4 = vld [vmem:[%s6981_s8 + $0x1c00] sm:$0xff] }
 0x11e   : > { %774 = vst [vmem:[%s6986_s28 + $0x508] sm:$0xff] %v773_v5  ;;  %v901_v5 = vld [vmem:[%s6981_s8 + $0x1c08] sm:$0xff] }
 0x11f   : > { %776 = vst [vmem:[%s6986_s28 + $0x510] sm:$0xff] %v775_v6  ;;  %v903_v6 = vld [vmem:[%s6981_s8 + $0x1c40] sm:$0xff] }
 0x120   : > { %778 = vst [vmem:[%s6986_s28 + $0x518] sm:$0xff] %v777_v7  ;;  %v905_v7 = vld [vmem:[%s6981_s8 + $0x1c48] sm:$0xff] }
 0x121   : > { %780 = vst [vmem:[%s6986_s28 + $0x520] sm:$0xff] %v779_v8  ;;  %v907_v8 = vld [vmem:[%s6981_s8 + $0x1c80] sm:$0xff] }
 0x122   : > { %782 = vst [vmem:[%s6986_s28 + $0x528] sm:$0xff] %v781_v9  ;;  %v909_v9 = vld [vmem:[%s6981_s8 + $0x1c88] sm:$0xff] }
 0x123   : > { %784 = vst [vmem:[%s6986_s28 + $0x530] sm:$0xff] %v783_v10  ;;  %v911_v10 = vld [vmem:[%s6981_s8 + $0x1cc0] sm:$0xff] }
 0x124   : > { %786 = vst [vmem:[%s6986_s28 + $0x538] sm:$0xff] %v785_v11  ;;  %v913_v11 = vld [vmem:[%s6981_s8 + $0x1cc8] sm:$0xff] }
 0x125   : > { %788 = vst [vmem:[%s6986_s28 + $0x540] sm:$0xff] %v787_v12  ;;  %v915_v12 = vld [vmem:[%s6981_s8 + $0x1d00] sm:$0xff] }
 0x126   : > { %790 = vst [vmem:[%s6986_s28 + $0x548] sm:$0xff] %v789_v13  ;;  %v917_v13 = vld [vmem:[%s6981_s8 + $0x1d08] sm:$0xff] }
 0x127   : > { %792 = vst [vmem:[%s6986_s28 + $0x550] sm:$0xff] %v791_v14  ;;  %v919_v14 = vld [vmem:[%s6981_s8 + $0x1d40] sm:$0xff] }
 0x128   : > { %794 = vst [vmem:[%s6986_s28 + $0x558] sm:$0xff] %v793_v15  ;;  %v921_v15 = vld [vmem:[%s6981_s8 + $0x1d48] sm:$0xff] }
 0x129   : > { %796 = vst [vmem:[%s6986_s28 + $0x560] sm:$0xff] %v795_v16  ;;  %v923_v16 = vld [vmem:[%s6981_s8 + $0x1d80] sm:$0xff] }
 0x12a   : > { %798 = vst [vmem:[%s6986_s28 + $0x568] sm:$0xff] %v797_v17  ;;  %v925_v17 = vld [vmem:[%s6981_s8 + $0x1d88] sm:$0xff] }
 0x12b   : > { %800 = vst [vmem:[%s6986_s28 + $0x570] sm:$0xff] %v799_v18  ;;  %v927_v18 = vld [vmem:[%s6981_s8 + $0x1dc0] sm:$0xff] }
 0x12c   : > { %802 = vst [vmem:[%s6986_s28 + $0x578] sm:$0xff] %v801_v19  ;;  %v929_v19 = vld [vmem:[%s6981_s8 + $0x1dc8] sm:$0xff] }
 0x12d   : > { %804 = vst [vmem:[%s6986_s28 + $0x580] sm:$0xff] %v803_v20  ;;  %v931_v20 = vld [vmem:[%s6981_s8 + $0x1e00] sm:$0xff] }
 0x12e   : > { %806 = vst [vmem:[%s6986_s28 + $0x588] sm:$0xff] %v805_v21  ;;  %v933_v21 = vld [vmem:[%s6981_s8 + $0x1e08] sm:$0xff] }
 0x12f   : > { %808 = vst [vmem:[%s6986_s28 + $0x590] sm:$0xff] %v807_v22  ;;  %v935_v22 = vld [vmem:[%s6981_s8 + $0x1e40] sm:$0xff] }
 0x130   : > { %810 = vst [vmem:[%s6986_s28 + $0x598] sm:$0xff] %v809_v23  ;;  %v937_v23 = vld [vmem:[%s6981_s8 + $0x1e48] sm:$0xff] }
 0x131   : > { %812 = vst [vmem:[%s6986_s28 + $0x5a0] sm:$0xff] %v811_v24  ;;  %v939_v24 = vld [vmem:[%s6981_s8 + $0x1e80] sm:$0xff] }
 0x132   : > { %814 = vst [vmem:[%s6986_s28 + $0x5a8] sm:$0xff] %v813_v25  ;;  %v941_v25 = vld [vmem:[%s6981_s8 + $0x1e88] sm:$0xff] }
 0x133   : > { %816 = vst [vmem:[%s6986_s28 + $0x5b0] sm:$0xff] %v815_v26  ;;  %v943_v26 = vld [vmem:[%s6981_s8 + $0x1ec0] sm:$0xff] }
 0x134   : > { %818 = vst [vmem:[%s6986_s28 + $0x5b8] sm:$0xff] %v817_v27  ;;  %v945_v27 = vld [vmem:[%s6981_s8 + $0x1ec8] sm:$0xff] }
 0x135   : > { %820 = vst [vmem:[%s6986_s28 + $0x5c0] sm:$0xff] %v819_v28  ;;  %v947_v28 = vld [vmem:[%s6981_s8 + $0x1f00] sm:$0xff] }
 0x136   : > { %822 = vst [vmem:[%s6986_s28 + $0x5c8] sm:$0xff] %v821_v29  ;;  %v949_v29 = vld [vmem:[%s6981_s8 + $0x1f08] sm:$0xff] }
 0x137   : > { %824 = vst [vmem:[%s6986_s28 + $0x5d0] sm:$0xff] %v823_v30  ;;  %v951_v30 = vld [vmem:[%s6981_s8 + $0x1f40] sm:$0xff] }
 0x138   : > { %826 = vst [vmem:[%s6986_s28 + $0x5d8] sm:$0xff] %v825_v31  ;;  %v953_v31 = vld [vmem:[%s6981_s8 + $0x1f48] sm:$0xff] }
 0x139   : > { %828 = vst [vmem:[%s6986_s28 + $0x5e0] sm:$0xff] %v827_v32  ;;  %v955_v32 = vld [vmem:[%s6981_s8 + $0x1f80] sm:$0xff] }
 0x13a   : > { %830 = vst [vmem:[%s6986_s28 + $0x5e8] sm:$0xff] %v829_v33  ;;  %v957_v33 = vld [vmem:[%s6981_s8 + $0x1f88] sm:$0xff] }
 0x13b   : > { %832 = vst [vmem:[%s6986_s28 + $0x5f0] sm:$0xff] %v831_v34  ;;  %v959_v34 = vld [vmem:[%s6981_s8 + $0x1fc0] sm:$0xff] }
 0x13c   : > { %834 = vst [vmem:[%s6986_s28 + $0x5f8] sm:$0xff] %v833_v35  ;;  %v961_v35 = vld [vmem:[%s6981_s8 + $0x1fc8] sm:$0xff] }
 0x13d   : > { %836 = vst [vmem:[%s6986_s28 + $0x600] sm:$0xff] %v835_v36 }
 0x13e   : > { %838 = vst [vmem:[%s6986_s28 + $0x608] sm:$0xff] %v837_v37 }
 0x13f   : > { %840 = vst [vmem:[%s6986_s28 + $0x610] sm:$0xff] %v839_v38 }
 0x140   : > { %842 = vst [vmem:[%s6986_s28 + $0x618] sm:$0xff] %v841_v39 }
 0x141   : > { %844 = vst [vmem:[%s6986_s28 + $0x620] sm:$0xff] %v843_v40 }
 0x142   : > { %846 = vst [vmem:[%s6986_s28 + $0x628] sm:$0xff] %v845_v41 }
 0x143   : > { %848 = vst [vmem:[%s6986_s28 + $0x630] sm:$0xff] %v847_v42 }
 0x144   : > { %850 = vst [vmem:[%s6986_s28 + $0x638] sm:$0xff] %v849_v43 }
 0x145   : > { %852 = vst [vmem:[%s6986_s28 + $0x640] sm:$0xff] %v851_v44 }
 0x146   : > { %854 = vst [vmem:[%s6986_s28 + $0x648] sm:$0xff] %v853_v45 }
 0x147   : > { %856 = vst [vmem:[%s6986_s28 + $0x650] sm:$0xff] %v855_v46 }
 0x148   : > { %858 = vst [vmem:[%s6986_s28 + $0x658] sm:$0xff] %v857_v47 }
 0x149   : > { %860 = vst [vmem:[%s6986_s28 + $0x660] sm:$0xff] %v859_v48 }
 0x14a   : > { %862 = vst [vmem:[%s6986_s28 + $0x668] sm:$0xff] %v861_v49 }
 0x14b   : > { %864 = vst [vmem:[%s6986_s28 + $0x670] sm:$0xff] %v863_v50 }
 0x14c   : > { %866 = vst [vmem:[%s6986_s28 + $0x678] sm:$0xff] %v865_v51 }
 0x14d   : > { %868 = vst [vmem:[%s6986_s28 + $0x680] sm:$0xff] %v867_v52 }
 0x14e   : > { %870 = vst [vmem:[%s6986_s28 + $0x688] sm:$0xff] %v869_v53 }
 0x14f   : > { %872 = vst [vmem:[%s6986_s28 + $0x690] sm:$0xff] %v871_v54 }
 0x150   : > { %874 = vst [vmem:[%s6986_s28 + $0x698] sm:$0xff] %v873_v55 }
 0x151   : > { %876 = vst [vmem:[%s6986_s28 + $0x6a0] sm:$0xff] %v875_v56 }
 0x152   : > { %878 = vst [vmem:[%s6986_s28 + $0x6a8] sm:$0xff] %v877_v57 }
 0x153   : > { %880 = vst [vmem:[%s6986_s28 + $0x6b0] sm:$0xff] %v879_v58 }
 0x154   : > { %882 = vst [vmem:[%s6986_s28 + $0x6b8] sm:$0xff] %v881_v59 }
 0x155   : > { %884 = vst [vmem:[%s6986_s28 + $0x6c0] sm:$0xff] %v883_v60 }
 0x156   : > { %886 = vst [vmem:[%s6986_s28 + $0x6c8] sm:$0xff] %v885_v61 }
 0x157   : > { %888 = vst [vmem:[%s6986_s28 + $0x6d0] sm:$0xff] %v887_v62 }
 0x158   : > { %890 = vst [vmem:[%s6986_s28 + $0x6d8] sm:$0xff] %v889_v63 }
 0x159   : > { %892 = vst [vmem:[%s6986_s28 + $0x6e0] sm:$0xff] %v891_v0 }
 0x15a   : > { %894 = vst [vmem:[%s6986_s28 + $0x6e8] sm:$0xff] %v893_v1 }
 0x15b   : > { %896 = vst [vmem:[%s6986_s28 + $0x6f0] sm:$0xff] %v895_v2 }
 0x15c   : > { %898 = vst [vmem:[%s6986_s28 + $0x6f8] sm:$0xff] %v897_v3 }
 0x15d   : > { %900 = vst [vmem:[%s6986_s28 + $0x700] sm:$0xff] %v899_v4 }
 0x15e   : > { %902 = vst [vmem:[%s6986_s28 + $0x708] sm:$0xff] %v901_v5 }
 0x15f   : > { %904 = vst [vmem:[%s6986_s28 + $0x710] sm:$0xff] %v903_v6 }
 0x160   : > { %906 = vst [vmem:[%s6986_s28 + $0x718] sm:$0xff] %v905_v7 }
 0x161   : > { %908 = vst [vmem:[%s6986_s28 + $0x720] sm:$0xff] %v907_v8 }
 0x162   : > { %910 = vst [vmem:[%s6986_s28 + $0x728] sm:$0xff] %v909_v9 }
 0x163   : > { %912 = vst [vmem:[%s6986_s28 + $0x730] sm:$0xff] %v911_v10 }
 0x164   : > { %914 = vst [vmem:[%s6986_s28 + $0x738] sm:$0xff] %v913_v11 }
 0x165   : > { %916 = vst [vmem:[%s6986_s28 + $0x740] sm:$0xff] %v915_v12 }
 0x166   : > { %918 = vst [vmem:[%s6986_s28 + $0x748] sm:$0xff] %v917_v13 }
 0x167   : > { %920 = vst [vmem:[%s6986_s28 + $0x750] sm:$0xff] %v919_v14 }
 0x168   : > { %922 = vst [vmem:[%s6986_s28 + $0x758] sm:$0xff] %v921_v15 }
 0x169   : > { %924 = vst [vmem:[%s6986_s28 + $0x760] sm:$0xff] %v923_v16 }
 0x16a   : > { %926 = vst [vmem:[%s6986_s28 + $0x768] sm:$0xff] %v925_v17 }
 0x16b   : > { %928 = vst [vmem:[%s6986_s28 + $0x770] sm:$0xff] %v927_v18 }
 0x16c   : > { %930 = vst [vmem:[%s6986_s28 + $0x778] sm:$0xff] %v929_v19 }
 0x16d   : > { %932 = vst [vmem:[%s6986_s28 + $0x780] sm:$0xff] %v931_v20 }
 0x16e   : > { %934 = vst [vmem:[%s6986_s28 + $0x788] sm:$0xff] %v933_v21 }
 0x16f   : > { %936 = vst [vmem:[%s6986_s28 + $0x790] sm:$0xff] %v935_v22 }
 0x170   : > { %938 = vst [vmem:[%s6986_s28 + $0x798] sm:$0xff] %v937_v23 }
 0x171   : > { %940 = vst [vmem:[%s6986_s28 + $0x7a0] sm:$0xff] %v939_v24 }
 0x172   : > { %942 = vst [vmem:[%s6986_s28 + $0x7a8] sm:$0xff] %v941_v25 }
 0x173   : > { %944 = vst [vmem:[%s6986_s28 + $0x7b0] sm:$0xff] %v943_v26 }
 0x174   : > { %946 = vst [vmem:[%s6986_s28 + $0x7b8] sm:$0xff] %v945_v27 }
 0x175   : > { %948 = vst [vmem:[%s6986_s28 + $0x7c0] sm:$0xff] %v947_v28 }
 0x176   : > { %950 = vst [vmem:[%s6986_s28 + $0x7c8] sm:$0xff] %v949_v29 }
 0x177   : > { %952 = vst [vmem:[%s6986_s28 + $0x7d0] sm:$0xff] %v951_v30 }
 0x178   : > { %954 = vst [vmem:[%s6986_s28 + $0x7d8] sm:$0xff] %v953_v31 }
 0x179   : > { %956 = vst [vmem:[%s6986_s28 + $0x7e0] sm:$0xff] %v955_v32 }
 0x17a   : > { %958 = vst [vmem:[%s6986_s28 + $0x7e8] sm:$0xff] %v957_v33 }
 0x17b   : > { %960 = vst [vmem:[%s6986_s28 + $0x7f0] sm:$0xff] %v959_v34 }
 0x17c   : > { %962 = vst [vmem:[%s6986_s28 + $0x7f8] sm:$0xff] %v961_v35 }
 0x17d PF: > { %p5170_p7 = scmp.ge.s32.totalorder %s6669_s24, 1  ;;  %p967_p8 = scmp.lt.s32.totalorder %s6669_s24, 5 }
 0x17f   : > { %p968_p9 = pnand %p5170_p7, %p967_p8 }
 0x180   : > { %s974_s29 = sand.u32 (!%p968_p9), 1, %s6645_s18   ;;  %p1017_p10 = scmp.lt.s32.totalorder (!%p968_p9), %s6657_s21, 1 }
 0x181   : > { %971 = sbr.rel (%p968_p9) target bundleno = 1611 (0x64b), region = 78  ;;  %s5171_s11 = sshll.u32 (!%p968_p9), %s974_s29, 11 }
 0x182   : > { %s6547_s10 = smul.u32 (!%p968_p9), 800, %s974_s29  ;;  %s7509_s17 = scalar_lea.vmem (!%p968_p9), [#allocation5], %s5171_s11 }
 0x183   : > { %p5173_p11 = scmp.ne.s32.totalorder (!%p968_p9), %s6653_s20, 0 }
 0x184   : > { %s7507_s16 = scalar_lea.vmem (!%p968_p9), [#allocation4], %s6547_s10 }
 0x186   : > { %s9570_s21 = smov (!%p1017_p10, %s6657_s21), 1  ;;  %1024 = sbr.rel (%p5173_p11) target bundleno = 873 (0x369), region = 90 }
 0x187   : > { %s5172_s12 = sshll.u32 %s9570_s21, 1 }
 0x188   : > { %s7505_s15 = scalar_lea.vmem %s9555_s5, %s5172_s12 }
 0x18b   : > { %v1240_v36 = vld [vmem:[%s9553_s3 + $0x3c0] sm:$0xff]  ;;  %vm1431_vm0 = vcmask 1043456   ;;  %v1241_v39 = vld [vmem:[%s9553_s3 + $0x3c8] sm:$0xff]  ;;  %v7684_v28 = vld [vmem:[%s9551_s1 + $0x10] sm:$0xff]  ;;  %vm1424_vm1 = vcmask 359424   ;;  %vm1027_vm2 = vcmask 130048  }
 0x18c   : > { %v1368_v37 = vld [vmem:[%s9553_s3 + $0x7c0] sm:$0xff]  ;;  %1456 = vmatpush.msra.mxu0 %v1240_v36  ;;  %1525 = vmatpush.msra.mxu3 %v1241_v39  ;;  %v1233_v43 = vld [vmem:[%s9553_s3 + $0x388] sm:$0xff]  ;;  %vm1095_vm9 = vcmask 130112  }
 0x18d   : > { %v1416_v38 = vld [vmem:[%s9553_s3 + $0x940] sm:$0xf]  ;;  %1479 = vmatpush.msra.mxu1 %v1368_v37  ;;  %v1225_v47 = vld [vmem:[%s9553_s3 + $0x348] sm:$0xff] }
 0x18e   : > { %v1232_v40 = vld [vmem:[%s9553_s3 + $0x380] sm:$0xff]  ;;  %5174 = vmatpush.msk.msra.mxu2 %vm1431_vm0, %v1416_v38  ;;  %1526 = vmatpush.msra.mxu3 %v1233_v43  ;;  %v1217_v51 = vld [vmem:[%s9553_s3 + $0x308] sm:$0xff]  ;;  %v1242_v43 = vld [vmem:[%s9553_s3 + $0x3d0] sm:$0xff] }
 0x18f   : > { %v1360_v41 = vld [vmem:[%s9553_s3 + $0x780] sm:$0xff]  ;;  %1457 = vmatpush.msra.mxu0 %v1232_v40  ;;  %v1209_v55 = vld [vmem:[%s9553_s3 + $0x2c8] sm:$0xff]  ;;  %v1370_v40 = vld [vmem:[%s9553_s3 + $0x7d0] sm:$0xff] }
 0x190   : > { %v1408_v42 = vld [vmem:[%s9553_s3 + $0x900] sm:$0xff]  ;;  %1480 = vmatpush.msra.mxu1 %v1360_v41  ;;  %1527 = vmatpush.msra.mxu3 %v1225_v47  ;;  %v1201_v59 = vld [vmem:[%s9553_s3 + $0x288] sm:$0xff] }
 0x191   : > { %v1224_v44 = vld [vmem:[%s9553_s3 + $0x340] sm:$0xff]  ;;  %1513 = vmatpush.msra.mxu2 %v1408_v42  ;;  %v1369_v60 = vld [vmem:[%s9553_s3 + $0x7c8] sm:$0xff] }
 0x192   : > { %v1352_v45 = vld [vmem:[%s9553_s3 + $0x740] sm:$0xff]  ;;  %1458 = vmatpush.msra.mxu0 %v1224_v44  ;;  %1528 = vmatpush.msra.mxu3 %v1217_v51  ;;  %v1193_v63 = vld [vmem:[%s9553_s3 + $0x248] sm:$0xff]  ;;  %v1362_v44 = vld [vmem:[%s9553_s3 + $0x790] sm:$0xff] }
 0x193   : > { %v1400_v46 = vld [vmem:[%s9553_s3 + $0x8c0] sm:$0xff]  ;;  %1481 = vmatpush.msra.mxu1 %v1352_v45  ;;  %v1361_v0 = vld [vmem:[%s9553_s3 + $0x788] sm:$0xff] }
 0x194   : > { %v1216_v48 = vld [vmem:[%s9553_s3 + $0x300] sm:$0xff]  ;;  %1514 = vmatpush.msra.mxu2 %v1400_v46  ;;  %1529 = vmatpush.msra.mxu3 %v1209_v55  ;;  %v1185_v3 = vld [vmem:[%s9553_s3 + $0x208] sm:$0xff] }
 0x195   : > { %v1344_v49 = vld [vmem:[%s9553_s3 + $0x700] sm:$0xff]  ;;  %1459 = vmatpush.msra.mxu0 %v1216_v48  ;;  %v1353_v4 = vld [vmem:[%s9553_s3 + $0x748] sm:$0xff]  ;;  %v1354_v48 = vld [vmem:[%s9553_s3 + $0x750] sm:$0xff] }
 0x196   : > { %v1392_v50 = vld [vmem:[%s9553_s3 + $0x880] sm:$0xff]  ;;  %1482 = vmatpush.msra.mxu1 %v1344_v49  ;;  %1530 = vmatpush.msra.mxu3 %v1201_v59  ;;  %v1177_v7 = vld [vmem:[%s9553_s3 + $0x1c8] sm:$0xff]  ;;  %v1234_v49 = vld [vmem:[%s9553_s3 + $0x390] sm:$0xff] }
 0x197   : > { %v1208_v52 = vld [vmem:[%s9553_s3 + $0x2c0] sm:$0xff]  ;;  %1515 = vmatpush.msra.mxu2 %v1392_v50  ;;  %v1345_v8 = vld [vmem:[%s9553_s3 + $0x708] sm:$0xff]  ;;  %v1330_v59 = vld [vmem:[%s9553_s3 + $0x690] sm:$0xff] }
 0x198   : > { %v1336_v53 = vld [vmem:[%s9553_s3 + $0x6c0] sm:$0xff]  ;;  %1460 = vmatpush.msra.mxu0 %v1208_v52  ;;  %1531 = vmatpush.msra.mxu3 %v1193_v63  ;;  %v1169_v11 = vld [vmem:[%s9553_s3 + $0x188] sm:$0xff]  ;;  %v1346_v52 = vld [vmem:[%s9553_s3 + $0x710] sm:$0xff] }
 0x199   : > { %v1384_v54 = vld [vmem:[%s9553_s3 + $0x840] sm:$0xff]  ;;  %1483 = vmatpush.msra.mxu1 %v1336_v53  ;;  %v1337_v12 = vld [vmem:[%s9553_s3 + $0x6c8] sm:$0xff]  ;;  %v7774_v53 = vld [vmem:[%s9551_s1 + $0x18] sm:$0xff] }
 0x19a   : > { %v1200_v56 = vld [vmem:[%s9553_s3 + $0x280] sm:$0xff]  ;;  %1516 = vmatpush.msra.mxu2 %v1384_v54  ;;  %1532 = vmatpush.msra.mxu3 %v1185_v3  ;;  %v1161_v15 = vld [vmem:[%s9553_s3 + $0x148] sm:$0xff]  ;;  %v1322_v63 = vld [vmem:[%s9553_s3 + $0x650] sm:$0xff] }
 0x19b   : > { %v1328_v57 = vld [vmem:[%s9553_s3 + $0x680] sm:$0xff]  ;;  %1461 = vmatpush.msra.mxu0 %v1200_v56  ;;  %v1329_v16 = vld [vmem:[%s9553_s3 + $0x688] sm:$0xff]  ;;  %v1338_v56 = vld [vmem:[%s9553_s3 + $0x6d0] sm:$0xff] }
 0x19c   : > { %v1376_v58 = vld [vmem:[%s9553_s3 + $0x800] sm:$0xff]  ;;  %1484 = vmatpush.msra.mxu1 %v1328_v57  ;;  %1533 = vmatpush.msra.mxu3 %v1177_v7  ;;  %v1153_v19 = vld [vmem:[%s9553_s3 + $0x108] sm:$0xff]  ;;  %v1226_v57 = vld [vmem:[%s9553_s3 + $0x350] sm:$0xff] }
 0x19d   : > { %v1192_v61 = vld [vmem:[%s9553_s3 + $0x240] sm:$0xff]  ;;  %1517 = vmatpush.msra.mxu2 %v1376_v58  ;;  %v1321_v20 = vld [vmem:[%s9553_s3 + $0x648] sm:$0xff]  ;;  %v1314_v3 = vld [vmem:[%s9553_s3 + $0x610] sm:$0xff] }
 0x19e   : > { %v1320_v62 = vld [vmem:[%s9553_s3 + $0x640] sm:$0xff]  ;;  %1462 = vmatpush.msra.mxu0 %v1192_v61  ;;  %1534 = vmatpush.msra.mxu3 %v1169_v11  ;;  %v1145_v23 = vld [vmem:[%s9553_s3 + $0xc8] sm:$0xff]  ;;  %v1306_v7 = vld [vmem:[%s9553_s3 + $0x5d0] sm:$0xff] }
 0x19f   : > { %v1184_v1 = vld [vmem:[%s9553_s3 + $0x200] sm:$0xff]  ;;  %1548 = vmatpush.msrb.mxu2 %v1369_v60  ;;  %1485 = vmatpush.msra.mxu1 %v1320_v62  ;;  %v1313_v24 = vld [vmem:[%s9553_s3 + $0x608] sm:$0xff]  ;;  %v1418_v60 = vld [vmem:[%s9553_s3 + $0x950] sm:$0xf] }
 0x1a0   : > { %v1312_v2 = vld [vmem:[%s9553_s3 + $0x600] sm:$0xff]  ;;  %1463 = vmatpush.msra.mxu0 %v1184_v1  ;;  %1535 = vmatpush.msra.mxu3 %v1161_v15  ;;  %v1137_v27 = vld [vmem:[%s9553_s3 + $0x88] sm:$0xff]  ;;  %v1218_v62 = vld [vmem:[%s9553_s3 + $0x310] sm:$0xff] }
 0x1a1   : > { %v1176_v5 = vld [vmem:[%s9553_s3 + $0x1c0] sm:$0xff]  ;;  %1549 = vmatpush.msrb.mxu2 %v1361_v0  ;;  %1486 = vmatpush.msra.mxu1 %v1312_v2  ;;  %v1305_v30 = vld [vmem:[%s9553_s3 + $0x5c8] sm:$0xff]  ;;  %v1410_v0 = vld [vmem:[%s9553_s3 + $0x910] sm:$0xff] }
 0x1a2   : > { %v1304_v6 = vld [vmem:[%s9553_s3 + $0x5c0] sm:$0xff]  ;;  %1464 = vmatpush.msra.mxu0 %v1176_v5  ;;  %1536 = vmatpush.msra.mxu3 %v1153_v19  ;;  %v1129_v32 = vld [vmem:[%s9553_s3 + $0x48] sm:$0xff]  ;;  %v1210_v2 = vld [vmem:[%s9553_s3 + $0x2d0] sm:$0xff] }
 0x1a3   : > { %v1168_v9 = vld [vmem:[%s9553_s3 + $0x180] sm:$0xff]  ;;  %1550 = vmatpush.msrb.mxu2 %v1353_v4  ;;  %1487 = vmatpush.msra.mxu1 %v1304_v6  ;;  %v1297_v34 = vld [vmem:[%s9553_s3 + $0x588] sm:$0xff]  ;;  %v1402_v4 = vld [vmem:[%s9553_s3 + $0x8d0] sm:$0xff] }
 0x1a4   : > { %v1296_v10 = vld [vmem:[%s9553_s3 + $0x580] sm:$0xff]  ;;  %1465 = vmatpush.msra.mxu0 %v1168_v9  ;;  %1537 = vmatpush.msra.mxu3 %v1145_v23  ;;  %v1121_v36 = vld [vmem:[%s9553_s3 + $0x8] sm:$0xff]  ;;  %v1202_v6 = vld [vmem:[%s9553_s3 + $0x290] sm:$0xff] }
 0x1a5   : > { %v1160_v13 = vld [vmem:[%s9553_s3 + $0x140] sm:$0xff]  ;;  %1551 = vmatpush.msrb.mxu2 %v1345_v8  ;;  %1488 = vmatpush.msra.mxu1 %v1296_v10  ;;  %v7720_v38 = vld [vmem:[%s9551_s1 + $0x8] sm:$0xff]  ;;  %v1394_v8 = vld [vmem:[%s9553_s3 + $0x890] sm:$0xff] }
 0x1a6   : > { %v1288_v14 = vld [vmem:[%s9553_s3 + $0x540] sm:$0xff]  ;;  %1466 = vmatpush.msra.mxu0 %v1160_v13  ;;  %1538 = vmatpush.msra.mxu3 %v1137_v27  ;;  %v1289_v39 = vld [vmem:[%s9553_s3 + $0x548] sm:$0xff]  ;;  %v1243_v9 = vld [vmem:[%s9553_s3 + $0x3d8] sm:$0xff] }
 0x1a7   : > { %v1152_v17 = vld [vmem:[%s9553_s3 + $0x100] sm:$0xff]  ;;  %1552 = vmatpush.msrb.mxu2 %v1337_v12  ;;  %1489 = vmatpush.msra.mxu1 %v1288_v14  ;;  %v1417_v41 = vld [vmem:[%s9553_s3 + $0x948] sm:$0xf]  ;;  %v1194_v10 = vld [vmem:[%s9553_s3 + $0x250] sm:$0xff] }
 0x1a8   : > { %v1280_v18 = vld [vmem:[%s9553_s3 + $0x500] sm:$0xff]  ;;  %1467 = vmatpush.msra.mxu0 %v1152_v17  ;;  %5175 = vmatmul.msk.f32.vlgmr.msra.gmra.mxu2 %vm1424_vm1, %v7684_v28  ;;  %v1281_v42 = vld [vmem:[%s9553_s3 + $0x508] sm:$0xff]  ;;  %v1298_v11 = vld [vmem:[%s9553_s3 + $0x590] sm:$0xff] }
 0x1a9   : > { %v1144_v21 = vld [vmem:[%s9553_s3 + $0xc0] sm:$0xff]  ;;  %1553 = vmatpush.msrb.mxu2 %v1329_v16  ;;  %1490 = vmatpush.msra.mxu1 %v1280_v18  ;;  %v7745_v45 = vld [vmem:[%s9551_s1 + $0x28] sm:$0xff]  ;;  %v1386_v12 = vld [vmem:[%s9553_s3 + $0x850] sm:$0xff] }
 0x1aa   : > { %v1272_v22 = vld [vmem:[%s9553_s3 + $0x4c0] sm:$0xff]  ;;  %1468 = vmatpush.msra.mxu0 %v1144_v21  ;;  %1539 = vmatpush.msra.mxu3 %v1129_v32  ;;  %v1273_v46 = vld [vmem:[%s9553_s3 + $0x4c8] sm:$0xff]  ;;  %v1235_v13 = vld [vmem:[%s9553_s3 + $0x398] sm:$0xff] }
 0x1ab   : > { %v1136_v25 = vld [vmem:[%s9553_s3 + $0x80] sm:$0xff]  ;;  %1554 = vmatpush.msrb.mxu2 %v1321_v20  ;;  %1491 = vmatpush.msra.mxu1 %v1272_v22  ;;  %v1409_v47 = vld [vmem:[%s9553_s3 + $0x908] sm:$0xff]  ;;  %v1186_v14 = vld [vmem:[%s9553_s3 + $0x210] sm:$0xff] }
 0x1ac   : > { %v1264_v26 = vld [vmem:[%s9553_s3 + $0x480] sm:$0xff]  ;;  %1469 = vmatpush.msra.mxu0 %v1136_v25  ;;  %1540 = vmatpush.msra.mxu3 %v1121_v36  ;;  %v1265_v50 = vld [vmem:[%s9553_s3 + $0x488] sm:$0xff]  ;;  %v1290_v15 = vld [vmem:[%s9553_s3 + $0x550] sm:$0xff] }
 0x1ad   : > { %v1128_v29 = vld [vmem:[%s9553_s3 + $0x40] sm:$0xff]  ;;  %1555 = vmatpush.msrb.mxu2 %v1313_v24  ;;  %1492 = vmatpush.msra.mxu1 %v1264_v26  ;;  %v1401_v51 = vld [vmem:[%s9553_s3 + $0x8c8] sm:$0xff]  ;;  %v1378_v16 = vld [vmem:[%s9553_s3 + $0x810] sm:$0xff] }
 0x1ae   : > { %v1256_v31 = vld [vmem:[%s9553_s3 + $0x440] sm:$0xff]  ;;  %1470 = vmatpush.msra.mxu0 %v1128_v29  ;;  %1617 = vmatpush.msrb.mxu3 %v1370_v40  ;;  %v1257_v55 = vld [vmem:[%s9553_s3 + $0x448] sm:$0xff]  ;;  %v1227_v17 = vld [vmem:[%s9553_s3 + $0x358] sm:$0xff] }
 0x1af   : > { %v1120_v33 = vld [vmem:[%s9553_s3] sm:$0xff]  ;;  %1556 = vmatpush.msrb.mxu2 %v1305_v30  ;;  %1493 = vmatpush.msra.mxu1 %v1256_v31  ;;  %v1249_v58 = vld [vmem:[%s9553_s3 + $0x408] sm:$0xff]  ;;  %v1178_v18 = vld [vmem:[%s9553_s3 + $0x1d0] sm:$0xff] }
 0x1b0   : > { %v1248_v35 = vld [vmem:[%s9553_s3 + $0x400] sm:$0xff]  ;;  %1471 = vmatpush.msra.mxu0 %v1120_v33  ;;  %1618 = vmatpush.msrb.mxu3 %v1362_v44  ;;  %v1393_v61 = vld [vmem:[%s9553_s3 + $0x888] sm:$0xff]  ;;  %v1282_v19 = vld [vmem:[%s9553_s3 + $0x510] sm:$0xff] }
 0x1b1   : > { %v7715_v37 = vld [vmem:[%s9551_s1] sm:$0xff]  ;;  %1557 = vmatpush.msrb.mxu2 %v1297_v34  ;;  %1494 = vmatpush.msra.mxu1 %v1248_v35  ;;  %v1385_v1 = vld [vmem:[%s9553_s3 + $0x848] sm:$0xff]  ;;  %v1371_v20 = vld [vmem:[%s9553_s3 + $0x7d8] sm:$0xff] }
 0x1b2   : > { %1472 = vmatmul.f32.vlgmr.msra.gmra.mxu0 %v7715_v37  ;;  %1495 = vmatmul.f32.vlgmr.msra.gmra.mxu1 %v7720_v38  ;;  %v7779_v54 = vld [vmem:[%s9551_s1 + $0x20] sm:$0xff]  ;;  %v1377_v5 = vld [vmem:[%s9553_s3 + $0x808] sm:$0xff]  ;;  %v1219_v21 = vld [vmem:[%s9553_s3 + $0x318] sm:$0xff] }
 0x1b3   : > { %1558 = vmatpush.msrb.mxu2 %v1289_v39  ;;  %5177 = vmatpush.msk.msrb.mxu0 %vm1431_vm0, %v1417_v41  ;;  %v1170_v22 = vld [vmem:[%s9553_s3 + $0x190] sm:$0xff]  ;;  %v1363_v24 = vld [vmem:[%s9553_s3 + $0x798] sm:$0xff]  ;;  %v7933_v40 = vld [vmem:[%s9552_s2] sm:$0xff] }
 0x1b4   : > { %1594 = vmatpush.msrb.mxu1 %v1242_v43  ;;  %5176 = vmatmul.msk.f32.gmra.mxu2 %vm1424_vm1, %v7745_v45  ;;  %v1274_v23 = vld [vmem:[%s9553_s3 + $0x4d0] sm:$0xff]  ;;  %v1211_v25 = vld [vmem:[%s9553_s3 + $0x2d8] sm:$0xff] }
 0x1b5   : > { %1559 = vmatpush.msrb.mxu2 %v1281_v42  ;;  %1582 = vmatpush.msrb.mxu0 %v1409_v47  ;;  %v1162_v26 = vld [vmem:[%s9553_s3 + $0x150] sm:$0xff]  ;;  %v1355_v29 = vld [vmem:[%s9553_s3 + $0x758] sm:$0xff]  ;;  %v1244_v42 = vld [vmem:[%s9553_s3 + $0x3e0] sm:$0xff] }
 0x1b6   : > { %1619 = vmatpush.msrb.mxu3 %v1354_v48  ;;  %1595 = vmatpush.msrb.mxu1 %v1234_v49  ;;  %v1266_v27 = vld [vmem:[%s9553_s3 + $0x490] sm:$0xff]  ;;  %v1203_v30 = vld [vmem:[%s9553_s3 + $0x298] sm:$0xff]  ;;  %v1236_v47 = vld [vmem:[%s9553_s3 + $0x3a0] sm:$0xff] }
 0x1b7   : > { %1560 = vmatpush.msrb.mxu2 %v1273_v46  ;;  %1583 = vmatpush.msrb.mxu0 %v1401_v51  ;;  %v1154_v31 = vld [vmem:[%s9553_s3 + $0x110] sm:$0xff]  ;;  %v1347_v33 = vld [vmem:[%s9553_s3 + $0x718] sm:$0xff]  ;;  %v1228_v51 = vld [vmem:[%s9553_s3 + $0x360] sm:$0xff] }
 0x1b8   : > { %1620 = vmatpush.msrb.mxu3 %v1346_v52  ;;  %1596 = vmatpush.msrb.mxu1 %v1226_v57  ;;  %v1258_v32 = vld [vmem:[%s9553_s3 + $0x450] sm:$0xff]  ;;  %v1195_v34 = vld [vmem:[%s9553_s3 + $0x258] sm:$0xff] }
 0x1b9   : > { %1561 = vmatpush.msrb.mxu2 %v1265_v50  ;;  %1541 = vmatmul.f32.vlgmr.msra.gmra.mxu3 %v7715_v37  ;;  %v1146_v35 = vld [vmem:[%s9553_s3 + $0xd0] sm:$0xff]  ;;  %v1339_v39 = vld [vmem:[%s9553_s3 + $0x6d8] sm:$0xff] }
 0x1ba   : > { %1475 = vmatmul.f32.gmra.mxu0 %v7774_v53  ;;  %1498 = vmatmul.f32.gmra.mxu1 %v7779_v54  ;;  %v1250_v36 = vld [vmem:[%s9553_s3 + $0x410] sm:$0xff]  ;;  %v1187_v41 = vld [vmem:[%s9553_s3 + $0x218] sm:$0xff] }
 0x1bb   : > { %1562 = vmatpush.msrb.mxu2 %v1257_v55  ;;  %1621 = vmatpush.msrb.mxu3 %v1338_v56  ;;  %v1138_v43 = vld [vmem:[%s9553_s3 + $0x90] sm:$0xff]  ;;  %v1331_v44 = vld [vmem:[%s9553_s3 + $0x698] sm:$0xff] }
 0x1bc   : > { %1584 = vmatpush.msrb.mxu0 %v1393_v61  ;;  %1597 = vmatpush.msrb.mxu1 %v1218_v62  ;;  %v1179_v46 = vld [vmem:[%s9553_s3 + $0x1d8] sm:$0xff]  ;;  %v1130_v48 = vld [vmem:[%s9553_s3 + $0x50] sm:$0xff] }
 0x1bd   : > { %1563 = vmatpush.msrb.mxu2 %v1249_v58  ;;  %1622 = vmatpush.msrb.mxu3 %v1330_v59  ;;  %v1323_v49 = vld [vmem:[%s9553_s3 + $0x658] sm:$0xff]  ;;  %v1122_v52 = vld [vmem:[%s9553_s3 + $0x10] sm:$0xff]  ;;  %v1220_v58 = vld [vmem:[%s9553_s3 + $0x320] sm:$0xff] }
 0x1be   : > { %1564 = vmatmul.f32.vlgmr.msrb.gmra.mxu2 %v7720_v38  ;;  %1585 = vmatpush.msrb.mxu0 %v1385_v1  ;;  %v1171_v50 = vld [vmem:[%s9553_s3 + $0x198] sm:$0xff] }
 0x1bf   : > { %5180 = vmatpush.msk.msra.mxu2 %vm1431_vm0, %v1418_v60  ;;  %1623 = vmatpush.msrb.mxu3 %v1322_v63  ;;  %v1315_v55 = vld [vmem:[%s9553_s3 + $0x618] sm:$0xff]  ;;  %v7989_v60 = vld [vmem:[%s9552_s2 + $0x8] sm:$0xff]  ;;  %v1212_v63 = vld [vmem:[%s9553_s3 + $0x2e0] sm:$0xff] }
 0x1c0   : > { %1598 = vmatpush.msrb.mxu1 %v1210_v2  ;;  %1586 = vmatpush.msrb.mxu0 %v1377_v5  ;;  %v1163_v56 = vld [vmem:[%s9553_s3 + $0x158] sm:$0xff] }
 0x1c1   : > { %1651 = vmatpush.msra.mxu2 %v1410_v0  ;;  %1624 = vmatpush.msrb.mxu3 %v1314_v3  ;;  %v1419_v57 = vld [vmem:[%s9553_s3 + $0x958] sm:$0xf]  ;;  %v1204_v3 = vld [vmem:[%s9553_s3 + $0x2a0] sm:$0xff] }
 0x1c2   : > { %1599 = vmatpush.msrb.mxu1 %v1202_v6  ;;  %1663 = vmatpush.msra.mxu0 %v1243_v9  ;;  %v1307_v59 = vld [vmem:[%s9553_s3 + $0x5d8] sm:$0xff] }
 0x1c3   : > { %1652 = vmatpush.msra.mxu2 %v1402_v4  ;;  %1625 = vmatpush.msrb.mxu3 %v1306_v7  ;;  %v1155_v61 = vld [vmem:[%s9553_s3 + $0x118] sm:$0xff]  ;;  %v1196_v7 = vld [vmem:[%s9553_s3 + $0x260] sm:$0xff] }
 0x1c4   : > { %1600 = vmatpush.msrb.mxu1 %v1194_v10  ;;  %1664 = vmatpush.msra.mxu0 %v1235_v13  ;;  %v1411_v62 = vld [vmem:[%s9553_s3 + $0x918] sm:$0xff] }
 0x1c5   : > { %1653 = vmatpush.msra.mxu2 %v1394_v8  ;;  %1626 = vmatpush.msrb.mxu3 %v1298_v11  ;;  %v1299_v0 = vld [vmem:[%s9553_s3 + $0x598] sm:$0xff]  ;;  %v1188_v11 = vld [vmem:[%s9553_s3 + $0x220] sm:$0xff] }
 0x1c6   : > { %1544 = vmatmul.f32.gmra.mxu3 %v7774_v53  ;;  %1567 = vmatmul.f32.gmra.mxu2 %v7779_v54  ;;  %v1147_v1 = vld [vmem:[%s9553_s3 + $0xd8] sm:$0xff] }
 0x1c7   : > { %1654 = vmatpush.msra.mxu2 %v1386_v12  ;;  %5178 = vmatmul.msk.f32.vlgmr.msrb.gmra.mxu0 %vm1424_vm1, %v7684_v28  ;;  %v1403_v2 = vld [vmem:[%s9553_s3 + $0x8d8] sm:$0xff] }
 0x1c8   : > { %1601 = vmatpush.msrb.mxu1 %v1186_v14  ;;  %1627 = vmatpush.msrb.mxu3 %v1290_v15  ;;  %v1291_v4 = vld [vmem:[%s9553_s3 + $0x558] sm:$0xff]  ;;  %v1180_v15 = vld [vmem:[%s9553_s3 + $0x1e0] sm:$0xff] }
 0x1c9   : > { %1655 = vmatpush.msra.mxu2 %v1378_v16  ;;  %1665 = vmatpush.msra.mxu0 %v1227_v17  ;;  %v1139_v5 = vld [vmem:[%s9553_s3 + $0x98] sm:$0xff]  ;;  %v1372_v17 = vld [vmem:[%s9553_s3 + $0x7e0] sm:$0xff] }
 0x1ca   : > { %1602 = vmatpush.msrb.mxu1 %v1178_v18  ;;  %1628 = vmatpush.msrb.mxu3 %v1282_v19  ;;  %v1395_v6 = vld [vmem:[%s9553_s3 + $0x898] sm:$0xff]  ;;  %v1420_v18 = vld [vmem:[%s9553_s3 + $0x960] sm:$0xf] }
 0x1cb   : > { %1686 = vmatpush.msrb.mxu2 %v1371_v20  ;;  %1666 = vmatpush.msra.mxu0 %v1219_v21  ;;  %v1283_v8 = vld [vmem:[%s9553_s3 + $0x518] sm:$0xff]  ;;  %v1172_v19 = vld [vmem:[%s9553_s3 + $0x1a0] sm:$0xff] }
 0x1cc   : > { %1603 = vmatpush.msrb.mxu1 %v1170_v22  ;;  %1629 = vmatpush.msrb.mxu3 %v1274_v23  ;;  %v1131_v9 = vld [vmem:[%s9553_s3 + $0x58] sm:$0xff]  ;;  %v1364_v21 = vld [vmem:[%s9553_s3 + $0x7a0] sm:$0xff] }
 0x1cd   : > { %1687 = vmatpush.msrb.mxu2 %v1363_v24  ;;  %1667 = vmatpush.msra.mxu0 %v1211_v25  ;;  %v1387_v10 = vld [vmem:[%s9553_s3 + $0x858] sm:$0xff]  ;;  %v1412_v22 = vld [vmem:[%s9553_s3 + $0x920] sm:$0xff] }
 0x1ce   : > { %1604 = vmatpush.msrb.mxu1 %v1162_v26  ;;  %1630 = vmatpush.msrb.mxu3 %v1266_v27  ;;  %v1275_v12 = vld [vmem:[%s9553_s3 + $0x4d8] sm:$0xff]  ;;  %v1164_v23 = vld [vmem:[%s9553_s3 + $0x160] sm:$0xff]  ;;  %v1028_v27 = vsel %vm1027_vm2, %v7933_v40, 0.0 }
 0x1cf   : > { %1688 = vmatpush.msrb.mxu2 %v1355_v29  ;;  %1668 = vmatpush.msra.mxu0 %v1203_v30  ;;  %v1123_v13 = vld [vmem:[%s9553_s3 + $0x18] sm:$0xff]  ;;  %v1356_v25 = vld [vmem:[%s9553_s3 + $0x760] sm:$0xff]  ;;  %v1245_v30 = vld [vmem:[%s9553_s3 + $0x3e8] sm:$0xff] }
 0x1d0   : > { %1605 = vmatpush.msrb.mxu1 %v1154_v31  ;;  %5179 = vmatmul.msk.f32.gmra.mxu0 %vm1424_vm1, %v7745_v45  ;;  %v1379_v14 = vld [vmem:[%s9553_s3 + $0x818] sm:$0xff]  ;;  %v1404_v26 = vld [vmem:[%s9553_s3 + $0x8e0] sm:$0xff] }
 0x1d1   : > { %1631 = vmatpush.msrb.mxu3 %v1258_v32  ;;  %1689 = vmatpush.msrb.mxu2 %v1347_v33  ;;  %v1267_v16 = vld [vmem:[%s9553_s3 + $0x498] sm:$0xff]  ;;  %v1156_v29 = vld [vmem:[%s9553_s3 + $0x120] sm:$0xff] }
 0x1d2   : > { %1669 = vmatpush.msra.mxu0 %v1195_v34  ;;  %1606 = vmatpush.msrb.mxu1 %v1146_v35  ;;  %v1259_v20 = vld [vmem:[%s9553_s3 + $0x458] sm:$0xff]  ;;  %v1348_v31 = vld [vmem:[%s9553_s3 + $0x720] sm:$0xff]  ;;  %v1237_v34 = vld [vmem:[%s9553_s3 + $0x3a8] sm:$0xff] }
 0x1d3   : > { %1632 = vmatpush.msrb.mxu3 %v1250_v36  ;;  %1690 = vmatpush.msrb.mxu2 %v1339_v39  ;;  %v1251_v24 = vld [vmem:[%s9553_s3 + $0x418] sm:$0xff]  ;;  %v1396_v32 = vld [vmem:[%s9553_s3 + $0x8a0] sm:$0xff] }
 0x1d4   : > { %1054 = vxpose.xlu1.b32.start [1/2] (short) (narrow) %v7933_v40, 16  ;;  %1670 = vmatpush.msra.mxu0 %v1187_v41  ;;  %v1148_v33 = vld [vmem:[%s9553_s3 + $0xe0] sm:$0xff]  ;;  %v1229_v40 = vld [vmem:[%s9553_s3 + $0x368] sm:$0xff] }
 0x1d5   : > { %1732 = vmatpush.msra.mxu3 %v1244_v42  ;;  %1607 = vmatpush.msrb.mxu1 %v1138_v43  ;;  %v1340_v35 = vld [vmem:[%s9553_s3 + $0x6e0] sm:$0xff] }
 0x1d6   : > { %1691 = vmatpush.msrb.mxu2 %v1331_v44  ;;  %1671 = vmatpush.msra.mxu0 %v1179_v46  ;;  %v1388_v36 = vld [vmem:[%s9553_s3 + $0x860] sm:$0xff]  ;;  %v1221_v44 = vld [vmem:[%s9553_s3 + $0x328] sm:$0xff] }
 0x1d7   : > { %1733 = vmatpush.msra.mxu3 %v1236_v47  ;;  %1608 = vmatpush.msrb.mxu1 %v1130_v48  ;;  %v1140_v39 = vld [vmem:[%s9553_s3 + $0xa0] sm:$0xff]  ;;  %v1373_v46 = vld [vmem:[%s9553_s3 + $0x7e8] sm:$0xff]  ;;  %v1031_v48 = vsel %vm1027_vm2, %v7989_v60, 0.0 }
 0x1d8   : > { %1692 = vmatpush.msrb.mxu2 %v1323_v49  ;;  %1672 = vmatpush.msra.mxu0 %v1171_v50  ;;  %v1332_v41 = vld [vmem:[%s9553_s3 + $0x6a0] sm:$0xff]  ;;  %v1213_v50 = vld [vmem:[%s9553_s3 + $0x2e8] sm:$0xff] }
 0x1d9   : > { %1734 = vmatpush.msra.mxu3 %v1228_v51  ;;  %1609 = vmatpush.msrb.mxu1 %v1122_v52  ;;  %v1380_v42 = vld [vmem:[%s9553_s3 + $0x820] sm:$0xff]  ;;  %v1365_v51 = vld [vmem:[%s9553_s3 + $0x7a8] sm:$0xff] }
 0x1da   : > { %1693 = vmatpush.msrb.mxu2 %v1315_v55  ;;  %1673 = vmatpush.msra.mxu0 %v1163_v56  ;;  %v1132_v43 = vld [vmem:[%s9553_s3 + $0x60] sm:$0xff]  ;;  %v1421_v55 = vld [vmem:[%s9553_s3 + $0x968] sm:$0xf] }
 0x1db   : > { %5181 = vmatmul.msk.f32.vlgmr.msra.gmra.mxu2 %vm1424_vm1, %v7684_v28  ;;  %5183 = vmatpush.msk.msra.mxu1 %vm1431_vm0, %v1419_v57  ;;  %v1324_v47 = vld [vmem:[%s9553_s3 + $0x660] sm:$0xff]  ;;  %v1205_v56 = vld [vmem:[%s9553_s3 + $0x2a8] sm:$0xff] }
 0x1dc   : > { %1735 = vmatpush.msra.mxu3 %v1220_v58  ;;  %1694 = vmatpush.msrb.mxu2 %v1307_v59  ;;  %v1124_v49 = vld [vmem:[%s9553_s3 + $0x20] sm:$0xff]  ;;  %v1357_v57 = vld [vmem:[%s9553_s3 + $0x768] sm:$0xff] }
 0x1dd   : > { %1633 = vmatmul.f32.vlgmr.msrb.gmra.mxu3 %v7720_v38  ;;  %1055 = vxpose.xlu1.b32.end [2/2] (short) (narrow) %v7989_v60, 16  ;;  %v1316_v52 = vld [vmem:[%s9553_s3 + $0x620] sm:$0xff]  ;;  %v1413_v59 = vld [vmem:[%s9553_s3 + $0x928] sm:$0xff] }
 0x1de   : > { %1674 = vmatpush.msra.mxu0 %v1155_v61  ;;  %1720 = vmatpush.msra.mxu1 %v1411_v62  ;;  %v1308_v58 = vld [vmem:[%s9553_s3 + $0x5e0] sm:$0xff]  ;;  %v1197_v60 = vld [vmem:[%s9553_s3 + $0x268] sm:$0xff] }
 0x1df   : > { %1736 = vmatpush.msra.mxu3 %v1212_v63  ;;  %1695 = vmatpush.msrb.mxu2 %v1299_v0  ;;  %v1349_v61 = vld [vmem:[%s9553_s3 + $0x728] sm:$0xff]  ;;  %v1300_v62 = vld [vmem:[%s9553_s3 + $0x5a0] sm:$0xff] }
 0x1e0   : > { %1675 = vmatpush.msra.mxu0 %v1147_v1  ;;  %1721 = vmatpush.msra.mxu1 %v1403_v2  ;;  %v1405_v63 = vld [vmem:[%s9553_s3 + $0x8e8] sm:$0xff]  ;;  %v1292_v2 = vld [vmem:[%s9553_s3 + $0x560] sm:$0xff] }
 0x1e1   : > { %1737 = vmatpush.msra.mxu3 %v1204_v3  ;;  %1610 = vmatmul.f32.vlgmr.msrb.gmra.mxu1 %v7715_v37  ;;  %v1189_v0 = vld [vmem:[%s9553_s3 + $0x228] sm:$0xff] }
 0x1e2   : > { %1696 = vmatpush.msrb.mxu2 %v1291_v4  ;;  %1676 = vmatpush.msra.mxu0 %v1139_v5  ;;  %v1341_v1 = vld [vmem:[%s9553_s3 + $0x6e8] sm:$0xff] }
 0x1e3   : > { %1722 = vmatpush.msra.mxu1 %v1395_v6  ;;  %1738 = vmatpush.msra.mxu3 %v1196_v7  ;;  %v1397_v3 = vld [vmem:[%s9553_s3 + $0x8a8] sm:$0xff]  ;;  %v1284_v6 = vld [vmem:[%s9553_s3 + $0x520] sm:$0xff] }
 0x1e4   : > { %1697 = vmatpush.msrb.mxu2 %v1283_v8  ;;  %1677 = vmatpush.msra.mxu0 %v1131_v9  ;;  %v1181_v4 = vld [vmem:[%s9553_s3 + $0x1e8] sm:$0xff] }
 0x1e5   : > { %5182 = vmatmul.msk.f32.gmra.mxu2 %vm1424_vm1, %v7745_v45  ;;  %1723 = vmatpush.msra.mxu1 %v1387_v10  ;;  %v1333_v5 = vld [vmem:[%s9553_s3 + $0x6a8] sm:$0xff]  ;;  %v1276_v10 = vld [vmem:[%s9553_s3 + $0x4e0] sm:$0xff] }
 0x1e6   : > { %1739 = vmatpush.msra.mxu3 %v1188_v11  ;;  %1698 = vmatpush.msrb.mxu2 %v1275_v12  ;;  %v1389_v7 = vld [vmem:[%s9553_s3 + $0x868] sm:$0xff] }
 0x1e7   : > { %1636 = vmatmul.f32.gmra.mxu3 %v7779_v54  ;;  %1678 = vmatpush.msra.mxu0 %v1123_v13  ;;  %v1173_v8 = vld [vmem:[%s9553_s3 + $0x1a8] sm:$0xff] }
 0x1e8   : > { %1724 = vmatpush.msra.mxu1 %v1379_v14  ;;  %1740 = vmatpush.msra.mxu3 %v1180_v15  ;;  %v1325_v9 = vld [vmem:[%s9553_s3 + $0x668] sm:$0xff]  ;;  %v1374_v14 = vld [vmem:[%s9553_s3 + $0x7f0] sm:$0xff]  ;;  %v1268_v15 = vld [vmem:[%s9553_s3 + $0x4a0] sm:$0xff] }
 0x1e9   : > { %1699 = vmatpush.msrb.mxu2 %v1267_v16  ;;  %1755 = vmatpush.msrb.mxu0 %v1372_v17  ;;  %v1381_v11 = vld [vmem:[%s9553_s3 + $0x828] sm:$0xff] }
 0x1ea   : > { %5186 = vmatpush.msk.msrb.mxu1 %vm1431_vm0, %v1420_v18  ;;  %1741 = vmatpush.msra.mxu3 %v1172_v19  ;;  %v1165_v12 = vld [vmem:[%s9553_s3 + $0x168] sm:$0xff]  ;;  %v1366_v18 = vld [vmem:[%s9553_s3 + $0x7b0] sm:$0xff]  ;;  %v1260_v19 = vld [vmem:[%s9553_s3 + $0x460] sm:$0xff] }
 0x1eb   : > { %1613 = vmatmul.f32.gmra.mxu1 %v7774_v53  ;;  %1700 = vmatpush.msrb.mxu2 %v1259_v20  ;;  %v1317_v13 = vld [vmem:[%s9553_s3 + $0x628] sm:$0xff] }
 0x1ec   : > { %1756 = vmatpush.msrb.mxu0 %v1364_v21  ;;  %1789 = vmatpush.msrb.mxu1 %v1412_v22  ;;  %v1157_v16 = vld [vmem:[%s9553_s3 + $0x128] sm:$0xff]  ;;  %v1358_v22 = vld [vmem:[%s9553_s3 + $0x770] sm:$0xff] }
 0x1ed   : > { %1742 = vmatpush.msra.mxu3 %v1164_v23  ;;  %1701 = vmatpush.msrb.mxu2 %v1251_v24  ;;  %v1309_v17 = vld [vmem:[%s9553_s3 + $0x5e8] sm:$0xff]  ;;  %v1252_v23 = vld [vmem:[%s9553_s3 + $0x420] sm:$0xff] }
 0x1ee   : > { %1757 = vmatpush.msrb.mxu0 %v1356_v25  ;;  %1790 = vmatpush.msrb.mxu1 %v1404_v26  ;;  %v1149_v20 = vld [vmem:[%s9553_s3 + $0xe8] sm:$0xff]  ;;  %v1246_v26 = vld [vmem:[%s9553_s3 + $0x3f0] sm:$0xff] }
 0x1ef   : > { %1029 = vadd.xlane.f32.xlu0 %v1028_v27  ;;  %1702 = vmatmul.f32.vlgmr.msrb.gmra.mxu2 %v7720_v38  ;;  %v1301_v21 = vld [vmem:[%s9553_s3 + $0x5a8] sm:$0xff]  ;;  %v1350_v27 = vld [vmem:[%s9553_s3 + $0x730] sm:$0xff] }
 0x1f0   : > { %1743 = vmatpush.msra.mxu3 %v1156_v29  ;;  %1801 = vmatpush.msra.mxu2 %v1245_v30  ;;  %v1141_v24 = vld [vmem:[%s9553_s3 + $0xa8] sm:$0xff] }
 0x1f1   : > { %1758 = vmatpush.msrb.mxu0 %v1348_v31  ;;  %1791 = vmatpush.msrb.mxu1 %v1396_v32  ;;  %v1293_v25 = vld [vmem:[%s9553_s3 + $0x568] sm:$0xff]  ;;  %v1238_v31 = vld [vmem:[%s9553_s3 + $0x3b0] sm:$0xff] }
 0x1f2   : > { %1744 = vmatpush.msra.mxu3 %v1148_v33  ;;  %1802 = vmatpush.msra.mxu2 %v1237_v34  ;;  %v1133_v29 = vld [vmem:[%s9553_s3 + $0x68] sm:$0xff]  ;;  %v1342_v32 = vld [vmem:[%s9553_s3 + $0x6f0] sm:$0xff] }
 0x1f3   : > { %1759 = vmatpush.msrb.mxu0 %v1340_v35  ;;  %1792 = vmatpush.msrb.mxu1 %v1388_v36  ;;  %v1285_v30 = vld [vmem:[%s9553_s3 + $0x528] sm:$0xff]  ;;  %v1230_v35 = vld [vmem:[%s9553_s3 + $0x370] sm:$0xff] }
 0x1f4   : > { %1745 = vmatpush.msra.mxu3 %v1140_v39  ;;  %1803 = vmatpush.msra.mxu2 %v1229_v40  ;;  %v1125_v33 = vld [vmem:[%s9553_s3 + $0x28] sm:$0xff]  ;;  %v1334_v36 = vld [vmem:[%s9553_s3 + $0x6b0] sm:$0xff] }
 0x1f5   : > { %5184 = vmatmul.msk.f32.vlgmr.msra.gmra.mxu1 %vm1424_vm1, %v7684_v28  ;;  %1760 = vmatpush.msrb.mxu0 %v1332_v41  ;;  %v1277_v34 = vld [vmem:[%s9553_s3 + $0x4e8] sm:$0xff]  ;;  %v1422_v39 = vld [vmem:[%s9553_s3 + $0x970] sm:$0xf] }
 0x1f6   : > { %1793 = vmatpush.msrb.mxu1 %v1380_v42  ;;  %1679 = vmatmul.f32.vlgmr.msra.gmra.mxu0 %v7715_v37  ;;  %v1269_v40 = vld [vmem:[%s9553_s3 + $0x4a8] sm:$0xff]  ;;  %v1222_v41 = vld [vmem:[%s9553_s3 + $0x330] sm:$0xff] }
 0x1f7   : > { %1746 = vmatpush.msra.mxu3 %v1132_v43  ;;  %1804 = vmatpush.msra.mxu2 %v1221_v44  ;;  %v1326_v42 = vld [vmem:[%s9553_s3 + $0x670] sm:$0xff]  ;;  %v1261_v44 = vld [vmem:[%s9553_s3 + $0x468] sm:$0xff] }
 0x1f8   : > { %1824 = vmatpush.msra.mxu1 %v1373_v46  ;;  %1761 = vmatpush.msrb.mxu0 %v1324_v47  ;;  %v1414_v43 = vld [vmem:[%s9553_s3 + $0x930] sm:$0xff] }
 0x1f9   : > { %1032 = vadd.xlane.f32.xlu0 %v1031_v48  ;;  %1705 = vmatmul.f32.gmra.mxu2 %v7779_v54  ;;  %v1214_v46 = vld [vmem:[%s9553_s3 + $0x2f0] sm:$0xff] }
 0x1fa   : > { %1747 = vmatpush.msra.mxu3 %v1124_v49  ;;  %1805 = vmatpush.msra.mxu2 %v1213_v50  ;;  %v1318_v47 = vld [vmem:[%s9553_s3 + $0x630] sm:$0xff]  ;;  %v1253_v49 = vld [vmem:[%s9553_s3 + $0x428] sm:$0xff] }
 0x1fb   : > { %1825 = vmatpush.msra.mxu1 %v1365_v51  ;;  %1762 = vmatpush.msrb.mxu0 %v1316_v52  ;;  %v1406_v48 = vld [vmem:[%s9553_s3 + $0x8f0] sm:$0xff] }
 0x1fc   : > { %5189 = vmatpush.msk.msrb.mxu3 %vm1431_vm0, %v1421_v55  ;;  %1806 = vmatpush.msra.mxu2 %v1205_v56  ;;  %v1206_v50 = vld [vmem:[%s9553_s3 + $0x2b0] sm:$0xff] }
 0x1fd   : > { %1826 = vmatpush.msra.mxu1 %v1357_v57  ;;  %1763 = vmatpush.msrb.mxu0 %v1308_v58  ;;  %v1310_v51 = vld [vmem:[%s9553_s3 + $0x5f0] sm:$0xff]  ;;  %v1247_v57 = vld [vmem:[%s9553_s3 + $0x3f8] sm:$0xff] }
 0x1fe   : > { %1858 = vmatpush.msrb.mxu3 %v1413_v59  ;;  %1807 = vmatpush.msra.mxu2 %v1197_v60  ;;  %v1398_v52 = vld [vmem:[%s9553_s3 + $0x8b0] sm:$0xff] }
 0x1ff   : > { %1827 = vmatpush.msra.mxu1 %v1349_v61  ;;  %1764 = vmatpush.msrb.mxu0 %v1300_v62  ;;  %v1198_v55 = vld [vmem:[%s9553_s3 + $0x270] sm:$0xff]  ;;  %v1239_v61 = vld [vmem:[%s9553_s3 + $0x3b8] sm:$0xff] }
 0x200   : > { %5185 = vmatmul.msk.f32.gmra.mxu1 %vm1424_vm1, %v7745_v45  ;;  %1859 = vmatpush.msrb.mxu3 %v1405_v63  ;;  %v1302_v56 = vld [vmem:[%s9553_s3 + $0x5b0] sm:$0xff] }
 0x201   : > { %1682 = vmatmul.f32.gmra.mxu0 %v7774_v53  ;;  %1808 = vmatpush.msra.mxu2 %v1189_v0  ;;  %v1390_v58 = vld [vmem:[%s9553_s3 + $0x870] sm:$0xff] }
 0x202   : > { %1828 = vmatpush.msra.mxu1 %v1341_v1  ;;  %1765 = vmatpush.msrb.mxu0 %v1292_v2  ;;  %v1190_v59 = vld [vmem:[%s9553_s3 + $0x230] sm:$0xff]  ;;  %v1375_v1 = vld [vmem:[%s9553_s3 + $0x7f8] sm:$0xff] }
 0x203   : > { %1860 = vmatpush.msrb.mxu3 %v1397_v3  ;;  %1809 = vmatpush.msra.mxu2 %v1181_v4  ;;  %v1294_v60 = vld [vmem:[%s9553_s3 + $0x570] sm:$0xff]  ;;  %v1231_v2 = vld [vmem:[%s9553_s3 + $0x378] sm:$0xff] }
 0x204   : > { %1829 = vmatpush.msra.mxu1 %v1333_v5  ;;  %1748 = vmatmul.f32.vlgmr.msra.gmra.mxu3 %v7715_v37  ;;  %v1382_v62 = vld [vmem:[%s9553_s3 + $0x830] sm:$0xff]  ;;  %v1367_v5 = vld [vmem:[%s9553_s3 + $0x7b8] sm:$0xff] }
 0x205   : > { %1766 = vmatpush.msrb.mxu0 %v1284_v6  ;;  %1861 = vmatpush.msrb.mxu3 %v1389_v7  ;;  %v1182_v63 = vld [vmem:[%s9553_s3 + $0x1f0] sm:$0xff] }
 0x206   : > { %1810 = vmatpush.msra.mxu2 %v1173_v8  ;;  %1830 = vmatpush.msra.mxu1 %v1325_v9  ;;  %v1286_v0 = vld [vmem:[%s9553_s3 + $0x530] sm:$0xff]  ;;  %v1359_v8 = vld [vmem:[%s9553_s3 + $0x778] sm:$0xff] }
 0x207   : > { %1767 = vmatpush.msrb.mxu0 %v1276_v10  ;;  %1862 = vmatpush.msrb.mxu3 %v1381_v11  ;;  %v1174_v3 = vld [vmem:[%s9553_s3 + $0x1b0] sm:$0xff]  ;;  %v1223_v9 = vld [vmem:[%s9553_s3 + $0x338] sm:$0xff] }
 0x208   : > { %1811 = vmatpush.msra.mxu2 %v1165_v12  ;;  %1831 = vmatpush.msra.mxu1 %v1317_v13  ;;  %v1278_v4 = vld [vmem:[%s9553_s3 + $0x4f0] sm:$0xff]  ;;  %v1351_v12 = vld [vmem:[%s9553_s3 + $0x738] sm:$0xff] }
 0x209   : > { %1893 = vmatpush.msra.mxu3 %v1374_v14  ;;  %1768 = vmatpush.msrb.mxu0 %v1268_v15  ;;  %v1166_v6 = vld [vmem:[%s9553_s3 + $0x170] sm:$0xff]  ;;  %v1215_v13 = vld [vmem:[%s9553_s3 + $0x2f8] sm:$0xff] }
 0x20a   : > { %5187 = vmatmul.msk.f32.vlgmr.msrb.gmra.mxu1 %vm1424_vm1, %v7684_v28  ;;  %1812 = vmatpush.msra.mxu2 %v1157_v16  ;;  %v1270_v7 = vld [vmem:[%s9553_s3 + $0x4b0] sm:$0xff]  ;;  %v1343_v16 = vld [vmem:[%s9553_s3 + $0x6f8] sm:$0xff] }
 0x20b   : > { %1832 = vmatpush.msra.mxu1 %v1309_v17  ;;  %1894 = vmatpush.msra.mxu3 %v1366_v18  ;;  %v1158_v10 = vld [vmem:[%s9553_s3 + $0x130] sm:$0xff]  ;;  %v1335_v18 = vld [vmem:[%s9553_s3 + $0x6b8] sm:$0xff] }
 0x20c   : > { %1769 = vmatpush.msrb.mxu0 %v1260_v19  ;;  %1813 = vmatpush.msra.mxu2 %v1149_v20  ;;  %v1262_v11 = vld [vmem:[%s9553_s3 + $0x470] sm:$0xff]  ;;  %v1207_v19 = vld [vmem:[%s9553_s3 + $0x2b8] sm:$0xff] }
 0x20d   : > { %1833 = vmatpush.msra.mxu1 %v1301_v21  ;;  %1895 = vmatpush.msra.mxu3 %v1358_v22  ;;  %v1150_v14 = vld [vmem:[%s9553_s3 + $0xf0] sm:$0xff]  ;;  %v1327_v21 = vld [vmem:[%s9553_s3 + $0x678] sm:$0xff] }
 0x20e   : > { %1770 = vmatpush.msrb.mxu0 %v1252_v23  ;;  %1751 = vmatmul.f32.gmra.mxu3 %v7774_v53  ;;  %v1254_v15 = vld [vmem:[%s9553_s3 + $0x430] sm:$0xff]  ;;  %v1199_v22 = vld [vmem:[%s9553_s3 + $0x278] sm:$0xff] }
 0x20f   : > { %1814 = vmatpush.msra.mxu2 %v1141_v24  ;;  %1834 = vmatpush.msra.mxu1 %v1293_v25  ;;  %v1142_v17 = vld [vmem:[%s9553_s3 + $0xb0] sm:$0xff] }
 0x210   : > { %1870 = vmatpush.msra.mxu0 %v1246_v26  ;;  %1896 = vmatpush.msra.mxu3 %v1350_v27  ;;  %v1134_v20 = vld [vmem:[%s9553_s3 + $0x70] sm:$0xff]  ;;  %v1191_v26 = vld [vmem:[%s9553_s3 + $0x238] sm:$0xff] }
 0x211   : > { %1771 = vmatmul.f32.vlgmr.msrb.gmra.mxu0 %v7720_v38  ;;  %1815 = vmatpush.msra.mxu2 %v1133_v29  ;;  %v1423_v27 = vld [vmem:[%s9553_s3 + $0x978] sm:$0xf] }
 0x212   : > { %1835 = vmatpush.msra.mxu1 %v1285_v30  ;;  %1871 = vmatpush.msra.mxu0 %v1238_v31  ;;  %v1311_v29 = vld [vmem:[%s9553_s3 + $0x5f8] sm:$0xff] }
 0x213   : > { %1897 = vmatpush.msra.mxu3 %v1342_v32  ;;  %5188 = vmatmul.msk.f32.gmra.mxu1 %vm1424_vm1, %v7745_v45  ;;  %v1183_v30 = vld [vmem:[%s9553_s3 + $0x1f8] sm:$0xff] }
 0x214   : > { %1816 = vmatpush.msra.mxu2 %v1125_v33  ;;  %1836 = vmatpush.msra.mxu1 %v1277_v34  ;;  %v1303_v31 = vld [vmem:[%s9553_s3 + $0x5b8] sm:$0xff] }
 0x215   : > { %1872 = vmatpush.msra.mxu0 %v1230_v35  ;;  %1898 = vmatpush.msra.mxu3 %v1334_v36  ;;  %v1415_v32 = vld [vmem:[%s9553_s3 + $0x938] sm:$0xff] }
 0x216   : > { %1817 = vmatmul.f32.vlgmr.msra.gmra.mxu2 %v7715_v37  ;;  %1837 = vmatpush.msra.mxu1 %v1269_v40  ;;  %v1295_v33 = vld [vmem:[%s9553_s3 + $0x578] sm:$0xff] }
 0x217   : > { %5192 = vmatpush.msk.msrb.mxu2 %vm1431_vm0, %v1422_v39  ;;  %1873 = vmatpush.msra.mxu0 %v1222_v41  ;;  %v1407_v34 = vld [vmem:[%s9553_s3 + $0x8f8] sm:$0xff] }
 0x218   : > { %1899 = vmatpush.msra.mxu3 %v1326_v42  ;;  %1838 = vmatpush.msra.mxu1 %v1261_v44  ;;  %v1159_v42 = vld [vmem:[%s9553_s3 + $0x138] sm:$0xff] }
 0x219   : > { %5190 = vmatmul.msk.f32.vlgmr.msrb.gmra.mxu3 %vm1424_vm1, %v7684_v28  ;;  %1927 = vmatpush.msrb.mxu2 %v1414_v43  ;;  %v1399_v43 = vld [vmem:[%s9553_s3 + $0x8b8] sm:$0xff] }
 0x21a   : > { %1874 = vmatpush.msra.mxu0 %v1214_v46  ;;  %1900 = vmatpush.msra.mxu3 %v1318_v47  ;;  %v1279_v44 = vld [vmem:[%s9553_s3 + $0x4f8] sm:$0xff] }
 0x21b   : > { %1774 = vmatmul.f32.gmra.mxu0 %v7779_v54  ;;  %1928 = vmatpush.msrb.mxu2 %v1406_v48  ;;  %v1151_v47 = vld [vmem:[%s9553_s3 + $0xf8] sm:$0xff] }
 0x21c   : > { %1839 = vmatpush.msra.mxu1 %v1253_v49  ;;  %1875 = vmatpush.msra.mxu0 %v1206_v50  ;;  %v1391_v49 = vld [vmem:[%s9553_s3 + $0x878] sm:$0xff] }
 0x21d   : > { %1901 = vmatpush.msra.mxu3 %v1310_v51  ;;  %1840 = vmatmul.f32.vlgmr.msra.gmra.mxu1 %v7720_v38  ;;  %v1271_v50 = vld [vmem:[%s9553_s3 + $0x4b8] sm:$0xff] }
 0x21e   : > { %1929 = vmatpush.msrb.mxu2 %v1398_v52  ;;  %1876 = vmatpush.msra.mxu0 %v1198_v55  ;;  %v1383_v51 = vld [vmem:[%s9553_s3 + $0x838] sm:$0xff] }
 0x21f   : > { %1902 = vmatpush.msra.mxu3 %v1302_v56  ;;  %1820 = vmatmul.f32.gmra.mxu2 %v7774_v53  ;;  %v1263_v52 = vld [vmem:[%s9553_s3 + $0x478] sm:$0xff] }
 0x220   : > { %1939 = vmatpush.msrb.mxu1 %v1247_v57  ;;  %1930 = vmatpush.msrb.mxu2 %v1390_v58  ;;  %v1135_v55 = vld [vmem:[%s9553_s3 + $0x78] sm:$0xff] }
 0x221   : > { %1877 = vmatpush.msra.mxu0 %v1190_v59  ;;  %1903 = vmatpush.msra.mxu3 %v1294_v60  ;;  %v1255_v56 = vld [vmem:[%s9553_s3 + $0x438] sm:$0xff]  ;;  %v6609_v60 = vld [vmem:[%s9551_s1 + $0x10] sm:$0xff] }
 0x222   : > { %1940 = vmatpush.msrb.mxu1 %v1239_v61  ;;  %5191 = vmatmul.msk.f32.gmra.mxu3 %vm1424_vm1, %v7745_v45  ;;  %v1127_v58 = vld [vmem:[%s9553_s3 + $0x38] sm:$0xff]  ;;  %v6610_v61 = vld [vmem:[%s9551_s1 + $0x8] sm:$0xff] }
 0x223   : > { %1931 = vmatpush.msrb.mxu2 %v1382_v62  ;;  %1878 = vmatpush.msra.mxu0 %v1182_v63  ;;  %v6611_v62 = vld [vmem:[%s9551_s1] sm:$0xff] }
 0x224   : > { %1904 = vmatpush.msra.mxu3 %v1286_v0  ;;  %1941 = vmatpush.msrb.mxu1 %v1231_v2  ;;  %v6612_v2 = vld [vmem:[%s9551_s1 + $0x28] sm:$0xff] }
 0x225   : > { %1962 = vmatpush.msra.mxu2 %v1375_v1  ;;  %1879 = vmatpush.msra.mxu0 %v1174_v3 }
 0x226   : > { %1905 = vmatpush.msra.mxu3 %v1278_v4  ;;  %1843 = vmatmul.f32.gmra.mxu1 %v7779_v54 }
 0x227   : > { %1963 = vmatpush.msra.mxu2 %v1367_v5  ;;  %1880 = vmatpush.msra.mxu0 %v1166_v6  ;;  %v6613_v5 = vld [vmem:[%s9551_s1 + $0x20] sm:$0xff]  ;;  %v6614_v6 = vld [vmem:[%s9551_s1 + $0x18] sm:$0xff] }
 0x228   : > { %1906 = vmatpush.msra.mxu3 %v1270_v7  ;;  %1942 = vmatpush.msrb.mxu1 %v1223_v9 }
 0x229   : > { %1964 = vmatpush.msra.mxu2 %v1359_v8  ;;  %1881 = vmatpush.msra.mxu0 %v1158_v10 }
 0x22a   : > { %1907 = vmatpush.msra.mxu3 %v1262_v11  ;;  %1943 = vmatpush.msrb.mxu1 %v1215_v13 }
 0x22b   : > { %1965 = vmatpush.msra.mxu2 %v1351_v12  ;;  %1882 = vmatpush.msra.mxu0 %v1150_v14  ;;  %v1519_v25 = vpop.f32.mrf.mxu2 }
 0x22c   : > { %1908 = vmatpush.msra.mxu3 %v1254_v15  ;;  %5193 = vmatmul.msk.f32.vlgmr.msrb.gmra.mxu2 %vm1424_vm1, %v7684_v28  ;;  %v1319_v28 = vld [vmem:[%s9553_s3 + $0x638] sm:$0xff] }
 0x22d   : > { %1966 = vmatpush.msra.mxu2 %v1343_v16  ;;  %1909 = vmatmul.f32.vlgmr.msra.gmra.mxu3 %v7720_v38  ;;  %v1126_v38 = vld [vmem:[%s9553_s3 + $0x30] sm:$0xff] }
 0x22e   : > { %1883 = vmatpush.msra.mxu0 %v1142_v17  ;;  %1944 = vmatpush.msrb.mxu1 %v1207_v19 }
 0x22f   : > { %v1473_v23 = vpop.f32.mrf.mxu0  ;;  %1967 = vmatpush.msra.mxu2 %v1335_v18  ;;  %v1496_v24 = vpop.f32.mrf.mxu1 }
 0x230   : > { %1884 = vmatpush.msra.mxu0 %v1134_v20  ;;  %1945 = vmatpush.msrb.mxu1 %v1199_v22  ;;  %v1497_v36 = vadd.f32 %v1496_v24, %v1473_v23 }
 0x231   : > { %1968 = vmatpush.msra.mxu2 %v1327_v21 }
 0x232   : > { %1885 = vmatpush.msra.mxu0 %v1126_v38  ;;  %1946 = vmatpush.msrb.mxu1 %v1191_v26  ;;  %v1520_v48 = vadd.f32 %v1519_v25, %v1497_v36 }
 0x233   : > { %1969 = vmatpush.msra.mxu2 %v1319_v28  ;;  %1886 = vmatmul.f32.vlgmr.msra.gmra.mxu0 %v7715_v37  ;;  %v1175_v37 = vld [vmem:[%s9553_s3 + $0x1b8] sm:$0xff] }
 0x234   : > { %5195 = vmatpush.msk.msrb.mxu0 %vm1431_vm0, %v1423_v27  ;;  %5194 = vmatmul.msk.f32.gmra.mxu2 %vm1424_vm1, %v7745_v45  ;;  %v1287_v45 = vld [vmem:[%s9553_s3 + $0x538] sm:$0xff] }
 0x235   : > { %1970 = vmatpush.msra.mxu2 %v1311_v29  ;;  %1912 = vmatmul.f32.gmra.mxu3 %v7779_v54  ;;  %v1167_v54 = vld [vmem:[%s9553_s3 + $0x178] sm:$0xff]  ;;  %v1090_v29 = vlaneseq }
 0x236   : > { %1947 = vmatpush.msrb.mxu1 %v1183_v30  ;;  %1996 = vmatpush.msrb.mxu0 %v1415_v32 }
 0x237   : > { %v1476_v35 = vpop.f32.mrf.mxu0  ;;  %1971 = vmatpush.msra.mxu2 %v1303_v31  ;;  %v1499_v39 = vpop.f32.mrf.mxu1 }
 0x238   : > { %1948 = vmatpush.msrb.mxu1 %v1175_v37  ;;  %v1500_v40 = vadd.f32 %v1499_v39, %v1476_v35  ;;  %v1522_v41 = vpop.f32.mrf.mxu2  ;;  %1997 = vmatpush.msrb.mxu0 %v1407_v34 }
 0x239   : > { %1972 = vmatpush.msra.mxu2 %v1295_v33  ;;  %v1091_v33 = vand.u32 127, %v1090_v29 }
 0x23a   : > { %1949 = vmatpush.msrb.mxu1 %v1167_v54  ;;  %v1523_v46 = vadd.f32 %v1522_v41, %v1500_v40  ;;  %1998 = vmatpush.msrb.mxu0 %v1399_v43 }
 0x23b   : > { %1973 = vmatpush.msra.mxu2 %v1287_v45  ;;  %1889 = vmatmul.f32.gmra.mxu0 %v7774_v53  ;;  %v1143_v53 = vld [vmem:[%s9553_s3 + $0xb8] sm:$0xff]  ;;  %v1093_v39 = vadd.s32 4294967288, %v1091_v33 }
 0x23c   : > { %1950 = vmatpush.msrb.mxu1 %v1159_v42  ;;  %2028 = vmatpush.msrb.mxu3 %v1523_v46  ;;  %v1542_v57 = vpop.f32.mrf.mxu3 }
 0x23d   : > { %1974 = vmatpush.msra.mxu2 %v1279_v44  ;;  %1999 = vmatpush.msrb.mxu0 %v1391_v49 }
 0x23e   : > { %1951 = vmatpush.msrb.mxu1 %v1151_v47  ;;  %2029 = vmatpush.msrb.mxu3 %v1520_v48 }
 0x23f   : > { %1975 = vmatpush.msra.mxu2 %v1271_v50  ;;  %2000 = vmatpush.msrb.mxu0 %v1383_v51 }
 0x240   : > { %1952 = vmatpush.msrb.mxu1 %v1143_v53 }
 0x241   : > { %1976 = vmatpush.msra.mxu2 %v1263_v52  ;;  %v1565_v59 = vpop.f32.mrf.mxu2 }
 0x242   : > { %1953 = vmatpush.msrb.mxu1 %v1135_v55  ;;  %v1566_v3 = vadd.f32 %v1565_v59, %v1542_v57 }
 0x243   : > { %1977 = vmatpush.msra.mxu2 %v1255_v56  ;;  %5196 = vmatmul.msk.f32.vlgmr.msrb.gmra.mxu0 %vm1424_vm1, %v6609_v60 }
 0x244   : > { %1978 = vmatmul.f32.vlgmr.msra.gmra.mxu2 %v6610_v61  ;;  %1954 = vmatpush.msrb.mxu1 %v1127_v58  ;;  %v1588_v63 = vpop.f32.mrf.mxu0 }
 0x245   : > { %1955 = vmatmul.f32.vlgmr.msrb.gmra.mxu1 %v6611_v62  ;;  %v1589_v8 = vadd.f32 %v1588_v63, %v1566_v3 }
 0x249   : > { %v1545_v0 = vpop.f32.mrf.mxu3  ;;  %v1568_v1 = vpop.f32.mrf.mxu2 }
 0x24a   : > { %v1569_v4 = vadd.f32 %v1568_v1, %v1545_v0 }
 0x24b   : > { %5197 = vmatmul.msk.f32.gmra.mxu0 %vm1424_vm1, %v6612_v2 }
 0x24c   : > { %1981 = vmatmul.f32.gmra.mxu2 %v6613_v5 }
 0x24d   : > { %1958 = vmatmul.f32.gmra.mxu1 %v6614_v6  ;;  %v1591_v7 = vpop.f32.mrf.mxu0 }
 0x24e   : > { %v1592_v9 = vadd.f32 %v1591_v7, %v1569_v4 }
 0x250   : > { %2051 = vmatpush.msra.mxu0 %v1592_v9 }
 0x252   : > { %2052 = vmatpush.msra.mxu0 %v1589_v8 }
 0x25e   : > { %v1611_v10 = vpop.f32.mrf.mxu1  ;;  %v1657_v11 = vpop.f32.mrf.mxu2 }
 0x260   : > { %v1634_v12 = vpop.f32.mrf.mxu3 }
 0x261   : > { %v1635_v15 = vadd.f32 %v1634_v12, %v1611_v10 }
 0x262   : > { %v1030_v13 = vpop.xlane.xlu0 %1029 }
 0x263   : > { %6605 = vrsqrt.f32 %v1030_v13  ;;  %v1658_v23 = vadd.f32 %v1657_v11, %v1635_v15  ;;  %vm1040_vm3 = vweird.f32 %v1030_v13 }
 0x268   : > { %v1614_v16 = vpop.f32.mrf.mxu1  ;;  %v1660_v17 = vpop.f32.mrf.mxu2 }
 0x269   : > { %v6606_v14 = vpop.eup %6605 }
 0x26a   : > { %v1035_v18 = vmul.f32 %v6606_v14, %v1030_v13  ;;  %v1637_v19 = vpop.f32.mrf.mxu3  ;;  %vm1041_vm4 = vweird.f32 %v6606_v14 }
 0x26b   : > { %v1638_v20 = vadd.f32 %v1637_v19, %v1614_v16  ;;  %vm1042_vm5 = vmor %vm1040_vm3, %vm1041_vm4 }
 0x26c   : > { %v1036_v21 = vmul.f32 %v6606_v14, %v1035_v18  ;;  %v1033_v22 = vpop.xlane.xlu0 %1032 }
 0x26d   : > { %6607 = vrsqrt.f32 %v1033_v22  ;;  %v1661_v38 = vadd.f32 %v1660_v17, %v1638_v20  ;;  %vm1050_vm6 = vweird.f32 %v1033_v22 }
 0x26e   : > { %v1037_v24 = vmul.f32 0.5, %v1036_v21 }
 0x26f   : > { %2074 = vmatpush.msra.mxu1 %v1661_v38 }
 0x270   : > { %v1038_v28 = vsub.f32 1.5, %v1037_v24 }
 0x271   : > { %2075 = vmatpush.msra.mxu1 %v1658_v23 }
 0x272   : > { %v1726_v26 = vpop.f32.mrf.mxu1  ;;  %v1703_v27 = vpop.f32.mrf.mxu2  ;;  %v1039_v37 = vmul.f32 %v6606_v14, %v1038_v28 }
 0x273   : > { %v6608_v25 = vpop.eup %6607  ;;  %v1680_v31 = vpop.f32.mrf.mxu0 }
 0x274   : > { %v1045_v30 = vmul.f32 %v6608_v25, %v1033_v22  ;;  %vm1051_vm7 = vweird.f32 %v6608_v25  ;;  %v1043_v36 = vsel %vm1042_vm5, %v6606_v14, %v1039_v37  ;;  %v1704_v40 = vadd.f32 %v1703_v27, %v1680_v31 }
 0x275   : > { %vm1052_vm8 = vmor %vm1050_vm6, %vm1051_vm7  ;;  %v1092_v43 = vperm.slane %v1043_v36, %v1091_v33  ;;  %vm2262_vm6 = vcmask 123904  }
 0x276   : > { %v1046_v32 = vmul.f32 %v6608_v25, %v1045_v30  ;;  %v1727_v50 = vadd.f32 %v1726_v26, %v1704_v40 }
 0x278   : > { %v1047_v34 = vmul.f32 0.5, %v1046_v32 }
 0x279   : > { %v1070_v54 = vpop.trf.xlu1 }
 0x27a   : > { %v1048_v35 = vsub.f32 1.5, %v1047_v34  ;;  %v1086_v47 = vmul.f32 %v1070_v54, %v1043_v36 }
 0x27c   : > { %v1049_v45 = vmul.f32 %v6608_v25, %v1048_v35  ;;  %v1706_v42 = vpop.f32.mrf.mxu2 }
 0x27d   : > { %v1729_v41 = vpop.f32.mrf.mxu1 }
 0x27e   : > { %v1053_v44 = vsel %vm1052_vm8, %v6608_v25, %v1049_v45  ;;  %v1683_v46 = vpop.f32.mrf.mxu0 }
 0x27f   : > { %v1707_v48 = vadd.f32 %v1706_v42, %v1683_v46  ;;  %v1094_v49 = vperm.slane %v1053_v44, %v1093_v39 }
 0x281   : > { %v1730_v53 = vadd.f32 %v1729_v41, %v1707_v48  ;;  %v1096_v51 = vsel %vm1095_vm9, %v1094_v49, %v1092_v43  ;;  %v1071_v55 = vpop.trf.xlu1 }
 0x282   : > { %v8554_v52 = vmul.f32 %v1096_v51, %v1086_v47  ;;  %v1087_v56 = vmul.f32 %v1071_v55, %v1053_v44 }
 0x283   : > { %2097 = vmatpush.msra.mxu3 %v1730_v53 }
 0x284   : > { %1112 = vst.msk [vmem:[#allocation2] sm:$0xff] %vm1027_vm2, %v8554_v52  ;;  %5198 = vmatmul.msk.f32.vlgmr.msrb.gmra.mxu3 %vm1027_vm2, %v8554_v52  ;;  %5200 = vmatmul.msk.f32.vlgmr.msra.gmra.mxu0 %vm1027_vm2, %v8554_v52  ;;  %v8562_v57 = vmul.f32 %v1096_v51, %v1087_v56 }
 0x285   : > { %2098 = vmatpush.msra.mxu3 %v1727_v50  ;;  %5202 = vmatmul.msk.f32.vlgmr.msra.gmra.mxu1 %vm1027_vm2, %v8554_v52 }
 0x286   : > { %1113 = vst.msk [vmem:[#allocation2 + $0x8] sm:$0xff] %vm1027_vm2, %v8562_v57 }
 0x287   : > { %v1795_v58 = vpop.f32.mrf.mxu1  ;;  %v1749_v59 = vpop.f32.mrf.mxu3 }
 0x28c   : > { %5199 = vmatmul.msk.f32.gmra.mxu3 %vm1027_vm2, %v8562_v57  ;;  %5201 = vmatmul.msk.f32.gmra.mxu0 %vm1027_vm2, %v8562_v57 }
 0x28d   : > { %5203 = vmatmul.msk.f32.gmra.mxu1 %vm1027_vm2, %v8562_v57 }
 0x28e   : > { %v1772_v60 = vpop.f32.mrf.mxu0 }
 0x28f   : > { %v1773_v63 = vadd.f32 %v1772_v60, %v1749_v59 }
 0x290   : > { %v1798_v61 = vpop.f32.mrf.mxu1 }
 0x291   : > { %v1752_v62 = vpop.f32.mrf.mxu3  ;;  %v1796_v3 = vadd.f32 %v1795_v58, %v1773_v63 }
 0x294   : > { %5204 = vmatmul.msk.f32.vlgmr.msra.gmra.mxu3 %vm1027_vm2, %v8554_v52 }
 0x298   : > { %v1775_v0 = vpop.f32.mrf.mxu0 }
 0x299   : > { %v1776_v1 = vadd.f32 %v1775_v0, %v1752_v62  ;;  %v1818_v2 = vpop.f32.mrf.mxu2 }
 0x29a   : > { %v1841_v5 = vpop.f32.mrf.mxu1 }
 0x29b   : > { %v1799_v4 = vadd.f32 %v1798_v61, %v1776_v1  ;;  %v1842_v7 = vadd.f32 %v1841_v5, %v1818_v2 }
 0x29c   : > { %v1864_v6 = vpop.f32.mrf.mxu3  ;;  %5205 = vmatmul.msk.f32.gmra.mxu3 %vm1027_vm2, %v8562_v57 }
 0x29d   : > { %2120 = vmatpush.msrb.mxu2 %v1799_v4  ;;  %v1865_v12 = vadd.f32 %v1864_v6, %v1842_v7 }
 0x29f   : > { %2121 = vmatpush.msrb.mxu2 %v1796_v3 }
 0x2a0   : > { %5206 = vmatmul.msk.f32.vlgmr.msrb.gmra.mxu2 %vm1027_vm2, %v8554_v52 }
 0x2a2   : > { %v1821_v8 = vpop.f32.mrf.mxu2 }
 0x2a3   : > { %v1844_v9 = vpop.f32.mrf.mxu1 }
 0x2a4   : > { %v1845_v10 = vadd.f32 %v1844_v9, %v1821_v8 }
 0x2a5   : > { %v1867_v11 = vpop.f32.mrf.mxu3 }
 0x2a6   : > { %v1868_v13 = vadd.f32 %v1867_v11, %v1845_v10 }
 0x2a8   : > { %5207 = vmatmul.msk.f32.gmra.mxu2 %vm1027_vm2, %v8562_v57  ;;  %2143 = vmatpush.msrb.mxu0 %v1868_v13 }
 0x2aa   : > { %2144 = vmatpush.msrb.mxu0 %v1865_v12  ;;  %v6671_v12 = vmov 0.0  }
 0x2ab   : > { %5208 = vmatmul.msk.f32.vlgmr.msrb.gmra.mxu0 %vm1027_vm2, %v8554_v52  ;;  %2263 = vst.msk [vmem:[%s7505_s15] sm:$0x3] %vm2262_vm6, %v6671_v12 }
 0x2af   : > { %v1933_v16 = vpop.f32.mrf.mxu2 }
 0x2b0   : > { %v1887_v14 = vpop.f32.mrf.mxu0  ;;  %v1910_v15 = vpop.f32.mrf.mxu3 }
 0x2b1   : > { %v1911_v19 = vadd.f32 %v1910_v15, %v1887_v14 }
 0x2b3   : > { %5209 = vmatmul.msk.f32.gmra.mxu0 %vm1027_vm2, %v8562_v57  ;;  %v1934_v23 = vadd.f32 %v1933_v16, %v1911_v19 }
 0x2b7   : > { %v1936_v21 = vpop.f32.mrf.mxu2 }
 0x2b8   : > { %v1890_v17 = vpop.f32.mrf.mxu0  ;;  %v1913_v18 = vpop.f32.mrf.mxu3 }
 0x2b9   : > { %v1914_v20 = vadd.f32 %v1913_v18, %v1890_v17 }
 0x2bb   : > { %v1937_v22 = vadd.f32 %v1936_v21, %v1914_v20 }
 0x2bd   : > { %2166 = vmatpush.msrb.mxu1 %v1937_v22 }
 0x2bf   : > { %2167 = vmatpush.msrb.mxu1 %v1934_v23 }
 0x2c0   : > { %5210 = vmatmul.msk.f32.vlgmr.msrb.gmra.mxu1 %vm1027_vm2, %v8554_v52  ;;  %v2002_v24 = vpop.f32.mrf.mxu0 }
 0x2c2   : > { %v1956_v38 = vpop.f32.mrf.mxu1 }
 0x2c7   : > { %v1979_v28 = vpop.f32.mrf.mxu2 }
 0x2c8   : > { %5211 = vmatmul.msk.f32.gmra.mxu1 %vm1027_vm2, %v8562_v57  ;;  %v2005_v27 = vpop.f32.mrf.mxu0  ;;  %v1980_v29 = vadd.f32 %v1979_v28, %v1956_v38 }
 0x2ca   : > { %v1959_v25 = vpop.f32.mrf.mxu1  ;;  %v2003_v32 = vadd.f32 %v2002_v24, %v1980_v29 }
 0x2cf   : > { %v1982_v26 = vpop.f32.mrf.mxu2 }
 0x2d0   : > { %v1983_v30 = vadd.f32 %v1982_v26, %v1959_v25 }
 0x2d2   : > { %v2006_v31 = vadd.f32 %v2005_v27, %v1983_v30 }
 0x2d4   : > { %2189 = vmatpush.msrb.mxu3 %v2006_v31 }
 0x2d6   : > { %2190 = vmatpush.msrb.mxu3 %v2003_v32 }
 0x2d7   : > { %5212 = vmatmul.msk.f32.vlgmr.msrb.gmra.mxu3 %vm1027_vm2, %v8554_v52 }
 0x2df   : > { %5213 = vmatmul.msk.f32.gmra.mxu3 %vm1027_vm2, %v8562_v57 }
 0x301   : > { %v2054_v37 = vpop.f32.mrf.mxu0 }
 0x302   : > { %v2215_v33 = vmul.f32 0.2, %v2054_v37  ;;  %vm2199_vm10 = vcmp.ge.f32.partialorder %v2054_v37, 0.0  ;;  %v2077_v42 = vpop.f32.mrf.mxu1 }
 0x303   : > { %v2216_v48 = vmul.f32 0.2, %v2077_v42  ;;  %vm2200_vm14 = vcmp.ge.f32.partialorder %v2077_v42, 0.0 }
 0x304   : > { %v2231_v54 = vsel %vm2199_vm10, %v2054_v37, %v2215_v33 }
 0x305   : > { %v2232_v50 = vsel %vm2200_vm14, %v2077_v42, %v2216_v48 }
 0x307   : > { %v2031_v34 = vpop.f32.mrf.mxu3 }
 0x308   : > { %vm2198_vm11 = vcmp.ge.f32.partialorder %v2031_v34, 0.0  ;;  %v2214_v35 = vmul.f32 0.2, %v2031_v34 }
 0x309   : > { %v2057_v36 = vpop.f32.mrf.mxu0 }
 0x30a   : > { %v2230_v39 = vsel %vm2198_vm11, %v2031_v34, %v2214_v35  ;;  %v2223_v40 = vmul.f32 0.2, %v2057_v36  ;;  %vm2207_vm12 = vcmp.ge.f32.partialorder %v2057_v36, 0.0  ;;  %v2080_v51 = vpop.f32.mrf.mxu1 }
 0x30b   : > { %v2246_v45 = vpack.c.bf16 %v2231_v54, %v2230_v39  ;;  %v2224_v56 = vmul.f32 0.2, %v2080_v51  ;;  %vm2208_vm0 = vcmp.ge.f32.partialorder %v2080_v51, 0.0 }
 0x30c   : > { %v2239_v44 = vsel %vm2207_vm12, %v2057_v36, %v2223_v40 }
 0x30d   : > { %2254 = vst [vmem:[#allocation3] sm:$0xff] %v2246_v45  ;;  %v2240_v58 = vsel %vm2208_vm0, %v2080_v51, %v2224_v56 }
 0x30f   : > { %v2034_v41 = vpop.f32.mrf.mxu3 }
 0x310   : > { %vm2206_vm13 = vcmp.ge.f32.partialorder %v2034_v41, 0.0  ;;  %v2222_v43 = vmul.f32 0.2, %v2034_v41 }
 0x312   : > { %v2238_v46 = vsel %vm2206_vm13, %v2034_v41, %v2222_v43 }
 0x313   : > { %v2250_v47 = vpack.c.bf16 %v2239_v44, %v2238_v46 }
 0x315   : > { %2258 = vst [vmem:[#allocation3 + $0x20] sm:$0xff] %v2250_v47 }
 0x317   : > { %v2100_v49 = vpop.f32.mrf.mxu3 }
 0x318   : > { %vm2201_vm15 = vcmp.ge.f32.partialorder %v2100_v49, 0.0  ;;  %v2217_v53 = vmul.f32 0.2, %v2100_v49 }
 0x31a   : > { %v2233_v52 = vsel %vm2201_vm15, %v2100_v49, %v2217_v53 }
 0x31b   : > { %v2247_v55 = vpack.c.bf16 %v2233_v52, %v2232_v50 }
 0x31d   : > { %2255 = vst [vmem:[#allocation3 + $0x8] sm:$0xff] %v2247_v55 }
 0x31f   : > { %v2103_v57 = vpop.f32.mrf.mxu3 }
 0x320   : > { %vm2209_vm1 = vcmp.ge.f32.partialorder %v2103_v57, 0.0  ;;  %v2225_v59 = vmul.f32 0.2, %v2103_v57 }
 0x322   : > { %v2241_v60 = vsel %vm2209_vm1, %v2103_v57, %v2225_v59 }
 0x323   : > { %v2123_v61 = vpop.f32.mrf.mxu2  ;;  %v2251_v62 = vpack.c.bf16 %v2241_v60, %v2240_v58 }
 0x324   : > { %v2218_v63 = vmul.f32 0.2, %v2123_v61  ;;  %vm2202_vm2 = vcmp.ge.f32.partialorder %v2123_v61, 0.0 }
 0x325   : > { %2259 = vst [vmem:[#allocation3 + $0x28] sm:$0xff] %v2251_v62 }
 0x326   : > { %v2234_v2 = vsel %vm2202_vm2, %v2123_v61, %v2218_v63 }
 0x328   : > { %v2146_v0 = vpop.f32.mrf.mxu0 }
 0x329   : > { %vm2203_vm3 = vcmp.ge.f32.partialorder %v2146_v0, 0.0  ;;  %v2219_v1 = vmul.f32 0.2, %v2146_v0 }
 0x32b   : > { %v2235_v3 = vsel %vm2203_vm3, %v2146_v0, %v2219_v1  ;;  %v2126_v5 = vpop.f32.mrf.mxu2 }
 0x32c   : > { %v2248_v4 = vpack.c.bf16 %v2235_v3, %v2234_v2  ;;  %v2226_v6 = vmul.f32 0.2, %v2126_v5  ;;  %vm2210_vm4 = vcmp.ge.f32.partialorder %v2126_v5, 0.0 }
 0x32e   : > { %2256 = vst [vmem:[#allocation3 + $0x10] sm:$0xff] %v2248_v4  ;;  %v2242_v9 = vsel %vm2210_vm4, %v2126_v5, %v2226_v6 }
 0x330   : > { %v2149_v7 = vpop.f32.mrf.mxu0 }
 0x331   : > { %vm2211_vm5 = vcmp.ge.f32.partialorder %v2149_v7, 0.0  ;;  %v2227_v8 = vmul.f32 0.2, %v2149_v7 }
 0x333   : > { %v2243_v10 = vsel %vm2211_vm5, %v2149_v7, %v2227_v8 }
 0x334   : > { %v2252_v11 = vpack.c.bf16 %v2243_v10, %v2242_v9 }
 0x336   : > { %2260 = vst [vmem:[#allocation3 + $0x30] sm:$0xff] %v2252_v11 }
 0x33d   : > { %v2169_v13 = vpop.f32.mrf.mxu1 }
 0x33e   : > { %v2220_v14 = vmul.f32 0.2, %v2169_v13  ;;  %vm2204_vm7 = vcmp.ge.f32.partialorder %v2169_v13, 0.0 }
 0x340   : > { %v2236_v17 = vsel %vm2204_vm7, %v2169_v13, %v2220_v14 }
 0x345   : > { %v2172_v19 = vpop.f32.mrf.mxu1 }
 0x346   : > { %v2228_v21 = vmul.f32 0.2, %v2172_v19  ;;  %vm2212_vm9 = vcmp.ge.f32.partialorder %v2172_v19, 0.0 }
 0x348   : > { %v2244_v38 = vsel %vm2212_vm9, %v2172_v19, %v2228_v21 }
 0x35a   : > { %v2192_v15 = vpop.f32.mrf.mxu3 }
 0x35b   : > { %vm2205_vm8 = vcmp.ge.f32.partialorder %v2192_v15, 0.0  ;;  %v2221_v16 = vmul.f32 0.2, %v2192_v15 }
 0x35d   : > { %v2237_v18 = vsel %vm2205_vm8, %v2192_v15, %v2221_v16 }
 0x35e   : > { %v2249_v20 = vpack.c.bf16 %v2237_v18, %v2236_v17 }
 0x360   : > { %2257 = vst [vmem:[#allocation3 + $0x18] sm:$0xff] %v2249_v20 }
 0x362   : > { %v2195_v22 = vpop.f32.mrf.mxu3 }
 0x363   : > { %vm2213_vm10 = vcmp.ge.f32.partialorder %v2195_v22, 0.0  ;;  %v2229_v23 = vmul.f32 0.2, %v2195_v22 }
 0x365   : > { %v2245_v24 = vsel %vm2213_vm10, %v2195_v22, %v2229_v23 }
 0x366   : > { %v2253_v28 = vpack.c.bf16 %v2245_v24, %v2244_v38 }
 0x368   : > { %2261 = vst [vmem:[#allocation3 + $0x38] sm:$0xff] %v2253_v28 }
 0x369 PF: > { %v5360_v25 = vld [vmem:[%s7509_s17 + $0xe0] sm:$0xf]  ;;  %v6320_v26 = vld [vmem:[%s7509_s17 + $0xec] sm:$0xf0]  ;;  %vm4863_vm11 = vcmask 130048   ;;  %vm2587_vm12 = vcmask 1043456  }
 0x36a   : > { %v5488_v27 = vld [vmem:[%s7509_s17 + $0x1e0] sm:$0xf]  ;;  %v5361_v29 = vor.u32 %v6320_v26, %v5360_v25  ;;  %v6352_v30 = vld [vmem:[%s7509_s17 + $0x1ec] sm:$0xf0]  ;;  %vm4971_vm13 = vcmask 1041409   ;;  %vm5061_vm14 = vcmask 123904  }
 0x36b   : > { %v5616_v31 = vld [vmem:[%s7509_s17 + $0x2e0] sm:$0xf]  ;;  %v6384_v32 = vld [vmem:[%s7509_s17 + $0x2ec] sm:$0xf0]  ;;  %v5489_v37 = vor.u32 %v6352_v30, %v5488_v27 }
 0x36c   : > { %v5617_v33 = vor.u32 %v6384_v32, %v5616_v31  ;;  %v5744_v34 = vld [vmem:[%s7509_s17 + $0x3e0] sm:$0xf]  ;;  %v6416_v35 = vld [vmem:[%s7509_s17 + $0x3ec] sm:$0xf0]  ;;  %4413 = vmatpush.bf16.msra.mxu0 %v5361_v29 }
 0x36d   : > { %v5344_v54 = vld [vmem:[%s7509_s17 + $0xc0] sm:$0xf]  ;;  %v5745_v36 = vor.u32 %v6416_v35, %v5744_v34  ;;  %v6316_v39 = vld [vmem:[%s7509_s17 + $0xcc] sm:$0xf0]  ;;  %4427 = vmatpush.bf16.msra.mxu1 %v5489_v37 }
 0x36e   : > { %v5472_v45 = vld [vmem:[%s7509_s17 + $0x1c0] sm:$0xf]  ;;  %v6348_v40 = vld [vmem:[%s7509_s17 + $0x1cc] sm:$0xf0]  ;;  %4441 = vmatpush.bf16.msra.mxu2 %v5617_v33  ;;  %v5345_v41 = vor.u32 %v6316_v39, %v5344_v54 }
 0x36f   : > { %v5473_v42 = vor.u32 %v6348_v40, %v5472_v45  ;;  %v5600_v43 = vld [vmem:[%s7509_s17 + $0x2c0] sm:$0xf]  ;;  %v6380_v44 = vld [vmem:[%s7509_s17 + $0x2cc] sm:$0xf0]  ;;  %4455 = vmatpush.bf16.msra.mxu3 %v5745_v36 }
 0x370   : > { %v5728_v46 = vld [vmem:[%s7509_s17 + $0x3c0] sm:$0xf]  ;;  %v5601_v47 = vor.u32 %v6380_v44, %v5600_v43  ;;  %v6412_v48 = vld [vmem:[%s7509_s17 + $0x3cc] sm:$0xf0]  ;;  %4414 = vmatpush.bf16.msra.mxu0 %v5345_v41 }
 0x371   : > { %v5328_v49 = vld [vmem:[%s7509_s17 + $0xa0] sm:$0xf]  ;;  %v6312_v50 = vld [vmem:[%s7509_s17 + $0xac] sm:$0xf0]  ;;  %v5729_v53 = vor.u32 %v6412_v48, %v5728_v46  ;;  %4428 = vmatpush.bf16.msra.mxu1 %v5473_v42 }
 0x372   : > { %v5456_v51 = vld [vmem:[%s7509_s17 + $0x1a0] sm:$0xf]  ;;  %v6344_v52 = vld [vmem:[%s7509_s17 + $0x1ac] sm:$0xf0]  ;;  %v5329_v56 = vor.u32 %v6312_v50, %v5328_v49  ;;  %4442 = vmatpush.bf16.msra.mxu2 %v5601_v47 }
 0x373   : > { %v5584_v55 = vld [vmem:[%s7509_s17 + $0x2a0] sm:$0xf]  ;;  %v6376_v57 = vld [vmem:[%s7509_s17 + $0x2ac] sm:$0xf0]  ;;  %v5457_v60 = vor.u32 %v6344_v52, %v5456_v51  ;;  %4456 = vmatpush.bf16.msra.mxu3 %v5729_v53 }
 0x374   : > { %v5712_v58 = vld [vmem:[%s7509_s17 + $0x3a0] sm:$0xf]  ;;  %v6408_v59 = vld [vmem:[%s7509_s17 + $0x3ac] sm:$0xf0]  ;;  %v5585_v61 = vor.u32 %v6376_v57, %v5584_v55  ;;  %4415 = vmatpush.bf16.msra.mxu0 %v5329_v56 }
 0x375   : > { %v5312_v62 = vld [vmem:[%s7509_s17 + $0x80] sm:$0xf]  ;;  %v6308_v63 = vld [vmem:[%s7509_s17 + $0x8c] sm:$0xf0]  ;;  %v5713_v1 = vor.u32 %v6408_v59, %v5712_v58  ;;  %4429 = vmatpush.bf16.msra.mxu1 %v5457_v60 }
 0x376   : > { %v5440_v0 = vld [vmem:[%s7509_s17 + $0x180] sm:$0xf]  ;;  %v6340_v2 = vld [vmem:[%s7509_s17 + $0x18c] sm:$0xf0]  ;;  %v5313_v7 = vor.u32 %v6308_v63, %v5312_v62  ;;  %4443 = vmatpush.bf16.msra.mxu2 %v5585_v61 }
 0x377   : > { %v5568_v3 = vld [vmem:[%s7509_s17 + $0x280] sm:$0xf]  ;;  %v6372_v4 = vld [vmem:[%s7509_s17 + $0x28c] sm:$0xf0]  ;;  %v5441_v8 = vor.u32 %v6340_v2, %v5440_v0  ;;  %4457 = vmatpush.bf16.msra.mxu3 %v5713_v1 }
 0x378   : > { %v5696_v5 = vld [vmem:[%s7509_s17 + $0x380] sm:$0xf]  ;;  %v6404_v6 = vld [vmem:[%s7509_s17 + $0x38c] sm:$0xf0]  ;;  %v5569_v9 = vor.u32 %v6372_v4, %v5568_v3  ;;  %4416 = vmatpush.bf16.msra.mxu0 %v5313_v7 }
 0x379   : > { %v5296_v10 = vld [vmem:[%s7509_s17 + $0x60] sm:$0xf]  ;;  %v6304_v11 = vld [vmem:[%s7509_s17 + $0x6c] sm:$0xf0]  ;;  %v5697_v13 = vor.u32 %v6404_v6, %v5696_v5  ;;  %4430 = vmatpush.bf16.msra.mxu1 %v5441_v8 }
 0x37a   : > { %v5424_v12 = vld [vmem:[%s7509_s17 + $0x160] sm:$0xf]  ;;  %v6336_v14 = vld [vmem:[%s7509_s17 + $0x16c] sm:$0xf0]  ;;  %v5297_v19 = vor.u32 %v6304_v11, %v5296_v10  ;;  %4444 = vmatpush.bf16.msra.mxu2 %v5569_v9 }
 0x37b   : > { %v5552_v15 = vld [vmem:[%s7509_s17 + $0x260] sm:$0xf]  ;;  %v6368_v16 = vld [vmem:[%s7509_s17 + $0x26c] sm:$0xf0]  ;;  %v5425_v20 = vor.u32 %v6336_v14, %v5424_v12  ;;  %4458 = vmatpush.bf16.msra.mxu3 %v5697_v13 }
 0x37c   : > { %v5680_v17 = vld [vmem:[%s7509_s17 + $0x360] sm:$0xf]  ;;  %v6400_v18 = vld [vmem:[%s7509_s17 + $0x36c] sm:$0xf0]  ;;  %v5553_v21 = vor.u32 %v6368_v16, %v5552_v15  ;;  %4417 = vmatpush.bf16.msra.mxu0 %v5297_v19 }
 0x37d   : > { %v5280_v22 = vld [vmem:[%s7509_s17 + $0x40] sm:$0xf]  ;;  %v6300_v23 = vld [vmem:[%s7509_s17 + $0x4c] sm:$0xf0]  ;;  %v5681_v24 = vor.u32 %v6400_v18, %v5680_v17  ;;  %4431 = vmatpush.bf16.msra.mxu1 %v5425_v20  ;;  %v5224_v17 = vld [vmem:[#allocation3 + $0x8] sm:$0xf] }
 0x37e   : > { %v5408_v38 = vld [vmem:[%s7509_s17 + $0x140] sm:$0xf]  ;;  %v6332_v28 = vld [vmem:[%s7509_s17 + $0x14c] sm:$0xf0]  ;;  %v5281_v30 = vor.u32 %v6300_v23, %v5280_v22  ;;  %4445 = vmatpush.bf16.msra.mxu2 %v5553_v21  ;;  %v6287_v22 = vld [vmem:[#allocation3 + $0x24] sm:$0xf0] }
 0x37f   : > { %v5536_v25 = vld [vmem:[%s7509_s17 + $0x240] sm:$0xf]  ;;  %v6364_v26 = vld [vmem:[%s7509_s17 + $0x24c] sm:$0xf0]  ;;  %v5409_v31 = vor.u32 %v6332_v28, %v5408_v38  ;;  %4459 = vmatpush.bf16.msra.mxu3 %v5681_v24 }
 0x380   : > { %v5664_v27 = vld [vmem:[%s7509_s17 + $0x340] sm:$0xf]  ;;  %v6396_v29 = vld [vmem:[%s7509_s17 + $0x34c] sm:$0xf0]  ;;  %v5537_v32 = vor.u32 %v6364_v26, %v5536_v25  ;;  %4418 = vmatpush.bf16.msra.mxu0 %v5281_v30  ;;  %v8682_v26 = vor.u32 %v6287_v22, %v5224_v17 }
 0x381   : > { %v5264_v37 = vld [vmem:[%s7509_s17 + $0x20] sm:$0xf]  ;;  %v6296_v33 = vld [vmem:[%s7509_s17 + $0x2c] sm:$0xf0]  ;;  %v5665_v35 = vor.u32 %v6396_v29, %v5664_v27  ;;  %4432 = vmatpush.bf16.msra.mxu1 %v5409_v31 }
 0x382   : > { %v5392_v34 = vld [vmem:[%s7509_s17 + $0x120] sm:$0xf]  ;;  %v6328_v54 = vld [vmem:[%s7509_s17 + $0x12c] sm:$0xf0]  ;;  %v5265_v41 = vor.u32 %v6296_v33, %v5264_v37  ;;  %4446 = vmatpush.bf16.msra.mxu2 %v5537_v32  ;;  %v6282_v32 = vld [vmem:[#allocation3 + $0x4] sm:$0xf] }
 0x383   : > { %v5520_v36 = vld [vmem:[%s7509_s17 + $0x220] sm:$0xf]  ;;  %v6360_v39 = vld [vmem:[%s7509_s17 + $0x22c] sm:$0xf0]  ;;  %v5393_v44 = vor.u32 %v6328_v54, %v5392_v34  ;;  %4460 = vmatpush.bf16.msra.mxu3 %v5665_v35  ;;  %v5218_v37 = vld [vmem:[#allocation3 + $0x20] sm:$0xf0] }
 0x384   : > { %v5648_v45 = vld [vmem:[%s7509_s17 + $0x320] sm:$0xf]  ;;  %v6392_v40 = vld [vmem:[%s7509_s17 + $0x32c] sm:$0xf0]  ;;  %v5521_v46 = vor.u32 %v6360_v39, %v5520_v36  ;;  %4419 = vmatpush.bf16.msra.mxu0 %v5265_v41  ;;  %v6283_v33 = vld [vmem:[#allocation3 + $0xc] sm:$0xf]  ;;  %v8689_v35 = vor.u32 %v6282_v32, %v5218_v37 }
 0x385   : > { %v5248_v42 = vld [vmem:[%s7509_s17] sm:$0xf]  ;;  %v6292_v43 = vld [vmem:[%s7509_s17 + $0xc] sm:$0xf0]  ;;  %v5649_v50 = vor.u32 %v6392_v40, %v5648_v45  ;;  %4433 = vmatpush.bf16.msra.mxu1 %v5393_v44  ;;  %v5226_v54 = vld [vmem:[#allocation3 + $0x28] sm:$0xf0] }
 0x386   : > { %v5376_v47 = vld [vmem:[%s7509_s17 + $0x100] sm:$0xf]  ;;  %v6324_v48 = vld [vmem:[%s7509_s17 + $0x10c] sm:$0xf0]  ;;  %v5249_v58 = vor.u32 %v6292_v43, %v5248_v42  ;;  %4447 = vmatpush.bf16.msra.mxu2 %v5521_v46  ;;  %v8694_v42 = vor.u32 %v6283_v33, %v5226_v54 }
 0x387   : > { %v5504_v49 = vld [vmem:[%s7509_s17 + $0x200] sm:$0xf]  ;;  %v6356_v53 = vld [vmem:[%s7509_s17 + $0x20c] sm:$0xf0]  ;;  %v5377_v62 = vor.u32 %v6324_v48, %v5376_v47  ;;  %4461 = vmatpush.bf16.msra.mxu3 %v5649_v50 }
 0x388   : > { %v5632_v51 = vld [vmem:[%s7509_s17 + $0x300] sm:$0xf]  ;;  %v6388_v52 = vld [vmem:[%s7509_s17 + $0x30c] sm:$0xf0]  ;;  %v5505_v63 = vor.u32 %v6356_v53, %v5504_v49  ;;  %4420 = vmatpush.bf16.msra.mxu0 %v5249_v58 }
 0x389   : > { %v5872_v55 = vld [vmem:[%s7509_s17 + $0x4e0] sm:$0xf]  ;;  %v6448_v56 = vld [vmem:[%s7509_s17 + $0x4ec] sm:$0xf0]  ;;  %v5633_v2 = vor.u32 %v6388_v52, %v5632_v51  ;;  %4434 = vmatpush.bf16.msra.mxu1 %v5377_v62 }
 0x38a   : > { %v6000_v57 = vld [vmem:[%s7509_s17 + $0x5e0] sm:$0xf]  ;;  %v6480_v59 = vld [vmem:[%s7509_s17 + $0x5ec] sm:$0xf0]  ;;  %v5873_v3 = vor.u32 %v6448_v56, %v5872_v55  ;;  %4448 = vmatpush.bf16.msra.mxu2 %v5505_v63 }
 0x38b   : > { %v6128_v60 = vld [vmem:[%s7509_s17 + $0x6e0] sm:$0xf]  ;;  %v6512_v61 = vld [vmem:[%s7509_s17 + $0x6ec] sm:$0xf0]  ;;  %v6001_v6 = vor.u32 %v6480_v59, %v6000_v57  ;;  %4462 = vmatpush.bf16.msra.mxu3 %v5633_v2 }
 0x38c   : > { %v6256_v0 = vld [vmem:[%s7509_s17 + $0x7e0] sm:$0xf]  ;;  %v6544_v1 = vld [vmem:[%s7509_s17 + $0x7ec] sm:$0xf0]  ;;  %v6129_v7 = vor.u32 %v6512_v61, %v6128_v60  ;;  %4469 = vmatpush.bf16.msrb.mxu0 %v5873_v3  ;;  %4435 = vmatmul.bf16.vlgmr.msra.gmra.mxu1 %v8689_v35 }
 0x38d   : > { %v5856_v4 = vld [vmem:[%s7509_s17 + $0x4c0] sm:$0xf]  ;;  %v6444_v5 = vld [vmem:[%s7509_s17 + $0x4cc] sm:$0xf0]  ;;  %v6257_v11 = vor.u32 %v6544_v1, %v6256_v0  ;;  %4483 = vmatpush.bf16.msrb.mxu1 %v6001_v6  ;;  %4449 = vmatmul.bf16.vlgmr.msra.gmra.mxu2 %v8682_v26 }
 0x38e   : > { %v5984_v8 = vld [vmem:[%s7509_s17 + $0x5c0] sm:$0xf]  ;;  %v6476_v9 = vld [vmem:[%s7509_s17 + $0x5cc] sm:$0xf0]  ;;  %v5857_v18 = vor.u32 %v6444_v5, %v5856_v4  ;;  %4497 = vmatpush.bf16.msrb.mxu2 %v6129_v7  ;;  %4463 = vmatmul.bf16.vlgmr.msra.gmra.mxu3 %v8694_v42 }
 0x38f   : > { %v6112_v10 = vld [vmem:[%s7509_s17 + $0x6c0] sm:$0xf]  ;;  %v6508_v12 = vld [vmem:[%s7509_s17 + $0x6cc] sm:$0xf0]  ;;  %v5985_v23 = vor.u32 %v6476_v9, %v5984_v8  ;;  %4511 = vmatpush.bf16.msrb.mxu3 %v6257_v11 }
 0x390   : > { %v6240_v13 = vld [vmem:[%s7509_s17 + $0x7c0] sm:$0xf]  ;;  %v6540_v14 = vld [vmem:[%s7509_s17 + $0x7cc] sm:$0xf0]  ;;  %v6113_v38 = vor.u32 %v6508_v12, %v6112_v10  ;;  %4470 = vmatpush.bf16.msrb.mxu0 %v5857_v18 }
 0x391   : > { %v5216_v15 = vld [vmem:[#allocation3] sm:$0xf]  ;;  %v6440_v20 = vld [vmem:[%s7509_s17 + $0x4ac] sm:$0xf0]  ;;  %v6241_v27 = vor.u32 %v6540_v14, %v6240_v13  ;;  %4484 = vmatpush.bf16.msrb.mxu1 %v5985_v23 }
 0x392   : > { %v6286_v16 = vld [vmem:[#allocation3 + $0x1c] sm:$0xf0]  ;;  %v6472_v28 = vld [vmem:[%s7509_s17 + $0x5ac] sm:$0xf0]  ;;  %4498 = vmatpush.bf16.msrb.mxu2 %v6113_v38 }
 0x393   : > { %v5840_v19 = vld [vmem:[%s7509_s17 + $0x4a0] sm:$0xf]  ;;  %v8677_v21 = vor.u32 %v6286_v16, %v5216_v15  ;;  %v6504_v29 = vld [vmem:[%s7509_s17 + $0x6ac] sm:$0xf0]  ;;  %4512 = vmatpush.bf16.msrb.mxu3 %v6241_v27 }
 0x394   : > { %v5968_v24 = vld [vmem:[%s7509_s17 + $0x5a0] sm:$0xf]  ;;  %v6536_v31 = vld [vmem:[%s7509_s17 + $0x7ac] sm:$0xf0]  ;;  %v5841_v34 = vor.u32 %v6440_v20, %v5840_v19 }
 0x395   : > { %v6096_v25 = vld [vmem:[%s7509_s17 + $0x6a0] sm:$0xf]  ;;  %4421 = vmatmul.bf16.vlgmr.msra.gmra.mxu0 %v8677_v21  ;;  %v5969_v36 = vor.u32 %v6472_v28, %v5968_v24  ;;  %v6436_v40 = vld [vmem:[%s7509_s17 + $0x48c] sm:$0xf0] }
 0x396   : > { %v6224_v30 = vld [vmem:[%s7509_s17 + $0x7a0] sm:$0xf]  ;;  %v6097_v39 = vor.u32 %v6504_v29, %v6096_v25  ;;  %v6468_v44 = vld [vmem:[%s7509_s17 + $0x58c] sm:$0xf0]  ;;  %4471 = vmatpush.bf16.msrb.mxu0 %v5841_v34  ;;  %v6318_v34 = vld [vmem:[%s7509_s17 + $0xe4] sm:$0xf] }
 0x397   : > { %v5824_v45 = vld [vmem:[%s7509_s17 + $0x480] sm:$0xf]  ;;  %v6225_v43 = vor.u32 %v6536_v31, %v6224_v30  ;;  %v6500_v47 = vld [vmem:[%s7509_s17 + $0x68c] sm:$0xf0]  ;;  %4485 = vmatpush.bf16.msrb.mxu1 %v5969_v36  ;;  %v5362_v36 = vld [vmem:[%s7509_s17 + $0xf0] sm:$0xf0] }
 0x398   : > { %v5952_v41 = vld [vmem:[%s7509_s17 + $0x580] sm:$0xf]  ;;  %v6532_v49 = vld [vmem:[%s7509_s17 + $0x78c] sm:$0xf0]  ;;  %v5825_v50 = vor.u32 %v6436_v40, %v5824_v45  ;;  %4499 = vmatpush.bf16.msrb.mxu2 %v6097_v39  ;;  %v6350_v39 = vld [vmem:[%s7509_s17 + $0x1e4] sm:$0xf] }
 0x399   : > { %v6080_v46 = vld [vmem:[%s7509_s17 + $0x680] sm:$0xf]  ;;  %v5953_v53 = vor.u32 %v6468_v44, %v5952_v41  ;;  %v6432_v55 = vld [vmem:[%s7509_s17 + $0x46c] sm:$0xf0]  ;;  %4513 = vmatpush.bf16.msrb.mxu3 %v6225_v43  ;;  %v5490_v45 = vld [vmem:[%s7509_s17 + $0x1f0] sm:$0xf0] }
 0x39a   : > { %v6208_v48 = vld [vmem:[%s7509_s17 + $0x780] sm:$0xf]  ;;  %v6081_v51 = vor.u32 %v6500_v47, %v6080_v46  ;;  %v6464_v58 = vld [vmem:[%s7509_s17 + $0x56c] sm:$0xf0]  ;;  %4472 = vmatpush.bf16.msrb.mxu0 %v5825_v50  ;;  %v6382_v40 = vld [vmem:[%s7509_s17 + $0x2e4] sm:$0xf] }
 0x39b   : > { %v5808_v52 = vld [vmem:[%s7509_s17 + $0x460] sm:$0xf]  ;;  %v6209_v57 = vor.u32 %v6532_v49, %v6208_v48  ;;  %v6496_v60 = vld [vmem:[%s7509_s17 + $0x66c] sm:$0xf0]  ;;  %4486 = vmatpush.bf16.msrb.mxu1 %v5953_v53  ;;  %v5618_v41 = vld [vmem:[%s7509_s17 + $0x2f0] sm:$0xf0] }
 0x39c   : > { %v5936_v56 = vld [vmem:[%s7509_s17 + $0x560] sm:$0xf]  ;;  %v6528_v62 = vld [vmem:[%s7509_s17 + $0x76c] sm:$0xf0]  ;;  %v5809_v63 = vor.u32 %v6432_v55, %v5808_v52  ;;  %4500 = vmatpush.bf16.msrb.mxu2 %v6081_v51  ;;  %v6414_v43 = vld [vmem:[%s7509_s17 + $0x3e4] sm:$0xf] }
 0x39d   : > { %v6064_v59 = vld [vmem:[%s7509_s17 + $0x660] sm:$0xf]  ;;  %v5937_v0 = vor.u32 %v6464_v58, %v5936_v56  ;;  %v6428_v3 = vld [vmem:[%s7509_s17 + $0x44c] sm:$0xf0]  ;;  %4514 = vmatpush.bf16.msrb.mxu3 %v6209_v57  ;;  %v5746_v46 = vld [vmem:[%s7509_s17 + $0x3f0] sm:$0xf0]  ;;  %v5365_v56 = vor.u32 %v6318_v34, %v5362_v36 }
 0x39e   : > { %v6192_v61 = vld [vmem:[%s7509_s17 + $0x760] sm:$0xf]  ;;  %v6065_v1 = vor.u32 %v6496_v60, %v6064_v59  ;;  %v6460_v6 = vld [vmem:[%s7509_s17 + $0x54c] sm:$0xf0]  ;;  %4473 = vmatpush.bf16.msrb.mxu0 %v5809_v63  ;;  %v5240_v53 = vld [vmem:[#allocation3 + $0x18] sm:$0xf]  ;;  %v5493_v60 = vor.u32 %v6350_v39, %v5490_v45 }
 0x39f   : > { %v5792_v2 = vld [vmem:[%s7509_s17 + $0x440] sm:$0xf]  ;;  %v6193_v5 = vor.u32 %v6528_v62, %v6192_v61  ;;  %v6492_v8 = vld [vmem:[%s7509_s17 + $0x64c] sm:$0xf0]  ;;  %4487 = vmatpush.bf16.msrb.mxu1 %v5937_v0  ;;  %v6289_v51 = vld [vmem:[#allocation3 + $0x34] sm:$0xf0]  ;;  %v5621_v61 = vor.u32 %v6382_v40, %v5618_v41 }
 0x3a0   : > { %v5920_v4 = vld [vmem:[%s7509_s17 + $0x540] sm:$0xf]  ;;  %v6524_v10 = vld [vmem:[%s7509_s17 + $0x74c] sm:$0xf0]  ;;  %v5793_v11 = vor.u32 %v6428_v3, %v5792_v2  ;;  %4501 = vmatpush.bf16.msrb.mxu2 %v6065_v1  ;;  %v6284_v52 = vld [vmem:[#allocation3 + $0x14] sm:$0xf]  ;;  %v5749_v1 = vor.u32 %v6414_v43, %v5746_v46 }
 0x3a1   : > { %v6048_v7 = vld [vmem:[%s7509_s17 + $0x640] sm:$0xf]  ;;  %v5921_v13 = vor.u32 %v6460_v6, %v5920_v4  ;;  %v6424_v15 = vld [vmem:[%s7509_s17 + $0x42c] sm:$0xf0]  ;;  %4515 = vmatpush.bf16.msrb.mxu3 %v6193_v5  ;;  %v5234_v57 = vld [vmem:[#allocation3 + $0x30] sm:$0xf0]  ;;  %v8751_v6 = vor.u32 %v6289_v51, %v5240_v53 }
 0x3a2   : > { %v6176_v9 = vld [vmem:[%s7509_s17 + $0x740] sm:$0xf]  ;;  %v6049_v14 = vor.u32 %v6492_v8, %v6048_v7  ;;  %v6456_v17 = vld [vmem:[%s7509_s17 + $0x52c] sm:$0xf0]  ;;  %4474 = vmatpush.bf16.msrb.mxu0 %v5793_v11  ;;  %v6285_v58 = vld [vmem:[#allocation3 + $0x1c] sm:$0xf]  ;;  %v8753_v7 = vor.u32 %v6284_v52, %v5234_v57 }
 0x3a3   : > { %v5776_v12 = vld [vmem:[%s7509_s17 + $0x420] sm:$0xf]  ;;  %v6177_v18 = vor.u32 %v6524_v10, %v6176_v9  ;;  %v6488_v20 = vld [vmem:[%s7509_s17 + $0x62c] sm:$0xf0]  ;;  %4488 = vmatpush.bf16.msrb.mxu1 %v5921_v13  ;;  %v5242_v59 = vld [vmem:[#allocation3 + $0x38] sm:$0xf0] }
 0x3a4   : > { %v5904_v16 = vld [vmem:[%s7509_s17 + $0x520] sm:$0xf]  ;;  %v6520_v23 = vld [vmem:[%s7509_s17 + $0x72c] sm:$0xf0]  ;;  %v5777_v28 = vor.u32 %v6424_v15, %v5776_v12  ;;  %4502 = vmatpush.bf16.msrb.mxu2 %v6049_v14  ;;  %v6314_v62 = vld [vmem:[%s7509_s17 + $0xc4] sm:$0xf]  ;;  %v8757_v10 = vor.u32 %v6285_v58, %v5242_v59 }
 0x3a5   : > { %v6032_v19 = vld [vmem:[%s7509_s17 + $0x620] sm:$0xf]  ;;  %v6420_v24 = vld [vmem:[%s7509_s17 + $0x40c] sm:$0xf0]  ;;  %v5905_v31 = vor.u32 %v6456_v17, %v5904_v16  ;;  %4516 = vmatpush.bf16.msrb.mxu3 %v6177_v18  ;;  %v5346_v63 = vld [vmem:[%s7509_s17 + $0xd0] sm:$0xf0] }
 0x3a6   : > { %v6160_v22 = vld [vmem:[%s7509_s17 + $0x720] sm:$0xf]  ;;  %v6452_v27 = vld [vmem:[%s7509_s17 + $0x50c] sm:$0xf0]  ;;  %v6033_v32 = vor.u32 %v6488_v20, %v6032_v19  ;;  %4475 = vmatpush.bf16.msrb.mxu0 %v5777_v28  ;;  %v6346_v0 = vld [vmem:[%s7509_s17 + $0x1c4] sm:$0xf]  ;;  %v5349_v11 = vor.u32 %v6314_v62, %v5346_v63 }
 0x3a7   : > { %v5760_v38 = vld [vmem:[%s7509_s17 + $0x400] sm:$0xf]  ;;  %v6484_v30 = vld [vmem:[%s7509_s17 + $0x60c] sm:$0xf0]  ;;  %v6161_v54 = vor.u32 %v6520_v23, %v6160_v22  ;;  %4489 = vmatpush.bf16.msrb.mxu1 %v5905_v31  ;;  %v5474_v3 = vld [vmem:[%s7509_s17 + $0x1d0] sm:$0xf0] }
 0x3a8   : > { %v5888_v25 = vld [vmem:[%s7509_s17 + $0x500] sm:$0xf]  ;;  %v6516_v33 = vld [vmem:[%s7509_s17 + $0x70c] sm:$0xf0]  ;;  %v5761_v44 = vor.u32 %v6420_v24, %v5760_v38  ;;  %4503 = vmatpush.bf16.msrb.mxu2 %v6033_v32  ;;  %v6378_v4 = vld [vmem:[%s7509_s17 + $0x2c4] sm:$0xf]  ;;  %v5477_v12 = vor.u32 %v6346_v0, %v5474_v3 }
 0x3a9   : > { %v6016_v29 = vld [vmem:[%s7509_s17 + $0x600] sm:$0xf]  ;;  %v5232_v47 = vld [vmem:[#allocation3 + $0x10] sm:$0xf]  ;;  %v5889_v49 = vor.u32 %v6452_v27, %v5888_v25  ;;  %4517 = vmatpush.bf16.msrb.mxu3 %v6161_v54  ;;  %v5602_v5 = vld [vmem:[%s7509_s17 + $0x2d0] sm:$0xf0] }
 0x3aa   : > { %v6144_v37 = vld [vmem:[%s7509_s17 + $0x700] sm:$0xf]  ;;  %v6288_v48 = vld [vmem:[#allocation3 + $0x2c] sm:$0xf0]  ;;  %v6017_v50 = vor.u32 %v6484_v30, %v6016_v29  ;;  %4476 = vmatpush.bf16.msrb.mxu0 %v5761_v44  ;;  %v6410_v8 = vld [vmem:[%s7509_s17 + $0x3c4] sm:$0xf]  ;;  %v5605_v13 = vor.u32 %v6378_v4, %v5602_v5 }
 0x3ab   : > { %v6145_v55 = vor.u32 %v6516_v33, %v6144_v37  ;;  %v8746_v2 = vor.u32 %v6288_v48, %v5232_v47  ;;  %4490 = vmatpush.bf16.msrb.mxu1 %v5889_v49  ;;  %v5730_v9 = vld [vmem:[%s7509_s17 + $0x3d0] sm:$0xf0]  ;;  %v6310_v14 = vld [vmem:[%s7509_s17 + $0xa4] sm:$0xf] }
 0x3ac   : > { %4504 = vmatpush.bf16.msrb.mxu2 %v6017_v50  ;;  %v5330_v15 = vld [vmem:[%s7509_s17 + $0xb0] sm:$0xf0]  ;;  %v6342_v16 = vld [vmem:[%s7509_s17 + $0x1a4] sm:$0xf]  ;;  %v5733_v17 = vor.u32 %v6410_v8, %v5730_v9 }
 0x3ad   : > { %4518 = vmatpush.bf16.msrb.mxu3 %v6145_v55  ;;  %4477 = vmatmul.bf16.vlgmr.msrb.gmra.mxu0 %v8746_v2  ;;  %v5458_v18 = vld [vmem:[%s7509_s17 + $0x1b0] sm:$0xf0]  ;;  %v6374_v19 = vld [vmem:[%s7509_s17 + $0x2a4] sm:$0xf]  ;;  %v5333_v38 = vor.u32 %v6310_v14, %v5330_v15 }
 0x3ae   : > { %4525 = vmatpush.bf16.msra.mxu0 %v5365_v56  ;;  %v5586_v20 = vld [vmem:[%s7509_s17 + $0x2b0] sm:$0xf0]  ;;  %4491 = vmatmul.bf16.vlgmr.msrb.gmra.mxu1 %v8753_v7  ;;  %v6406_v22 = vld [vmem:[%s7509_s17 + $0x3a4] sm:$0xf]  ;;  %v5461_v24 = vor.u32 %v6342_v16, %v5458_v18 }
 0x3af   : > { %4539 = vmatpush.bf16.msra.mxu1 %v5493_v60  ;;  %4505 = vmatmul.bf16.vlgmr.msrb.gmra.mxu2 %v8751_v6  ;;  %v5714_v23 = vld [vmem:[%s7509_s17 + $0x3b0] sm:$0xf0]  ;;  %v5589_v28 = vor.u32 %v6374_v19, %v5586_v20  ;;  %v6306_v25 = vld [vmem:[%s7509_s17 + $0x84] sm:$0xf] }
 0x3b0   : > { %4553 = vmatpush.bf16.msra.mxu2 %v5621_v61  ;;  %4519 = vmatmul.bf16.vlgmr.msrb.gmra.mxu3 %v8757_v10  ;;  %v5314_v27 = vld [vmem:[%s7509_s17 + $0x90] sm:$0xf0]  ;;  %v6338_v29 = vld [vmem:[%s7509_s17 + $0x184] sm:$0xf]  ;;  %v5717_v30 = vor.u32 %v6406_v22, %v5714_v23 }
 0x3b1   : > { %4567 = vmatpush.bf16.msra.mxu3 %v5749_v1  ;;  %v5442_v31 = vld [vmem:[%s7509_s17 + $0x190] sm:$0xf0]  ;;  %v6370_v32 = vld [vmem:[%s7509_s17 + $0x284] sm:$0xf]  ;;  %v5317_v54 = vor.u32 %v6306_v25, %v5314_v27 }
 0x3b2   : > { %4526 = vmatpush.bf16.msra.mxu0 %v5349_v11  ;;  %v5570_v37 = vld [vmem:[%s7509_s17 + $0x290] sm:$0xf0]  ;;  %v6402_v33 = vld [vmem:[%s7509_s17 + $0x384] sm:$0xf]  ;;  %v5445_v36 = vor.u32 %v6338_v29, %v5442_v31 }
 0x3b3   : > { %4540 = vmatpush.bf16.msra.mxu1 %v5477_v12  ;;  %v5698_v34 = vld [vmem:[%s7509_s17 + $0x390] sm:$0xf0]  ;;  %v5573_v39 = vor.u32 %v6370_v32, %v5570_v37  ;;  %v6302_v45 = vld [vmem:[%s7509_s17 + $0x64] sm:$0xf] }
 0x3b4   : > { %4554 = vmatpush.bf16.msra.mxu2 %v5605_v13  ;;  %v5298_v40 = vld [vmem:[%s7509_s17 + $0x70] sm:$0xf0]  ;;  %v6334_v41 = vld [vmem:[%s7509_s17 + $0x164] sm:$0xf]  ;;  %v5701_v43 = vor.u32 %v6402_v33, %v5698_v34 }
 0x3b5   : > { %4568 = vmatpush.bf16.msra.mxu3 %v5733_v17  ;;  %v5426_v44 = vld [vmem:[%s7509_s17 + $0x170] sm:$0xf0]  ;;  %v6366_v46 = vld [vmem:[%s7509_s17 + $0x264] sm:$0xf]  ;;  %v5301_v50 = vor.u32 %v6302_v45, %v5298_v40 }
 0x3b6   : > { %4527 = vmatpush.bf16.msra.mxu0 %v5333_v38  ;;  %v5554_v47 = vld [vmem:[%s7509_s17 + $0x270] sm:$0xf0]  ;;  %v6398_v48 = vld [vmem:[%s7509_s17 + $0x364] sm:$0xf]  ;;  %v5429_v53 = vor.u32 %v6334_v41, %v5426_v44 }
 0x3b7   : > { %4541 = vmatpush.bf16.msra.mxu1 %v5461_v24  ;;  %v5682_v49 = vld [vmem:[%s7509_s17 + $0x370] sm:$0xf0]  ;;  %v5557_v51 = vor.u32 %v6366_v46, %v5554_v47  ;;  %v6298_v52 = vld [vmem:[%s7509_s17 + $0x44] sm:$0xf] }
 0x3b8   : > { %4555 = vmatpush.bf16.msra.mxu2 %v5589_v28  ;;  %v5282_v55 = vld [vmem:[%s7509_s17 + $0x50] sm:$0xf0]  ;;  %v6330_v56 = vld [vmem:[%s7509_s17 + $0x144] sm:$0xf]  ;;  %v5685_v57 = vor.u32 %v6398_v48, %v5682_v49 }
 0x3b9   : > { %4569 = vmatpush.bf16.msra.mxu3 %v5717_v30  ;;  %v5410_v58 = vld [vmem:[%s7509_s17 + $0x150] sm:$0xf0]  ;;  %v6362_v59 = vld [vmem:[%s7509_s17 + $0x244] sm:$0xf]  ;;  %v5285_v63 = vor.u32 %v6298_v52, %v5282_v55 }
 0x3ba   : > { %4528 = vmatpush.bf16.msra.mxu0 %v5317_v54  ;;  %v5538_v60 = vld [vmem:[%s7509_s17 + $0x250] sm:$0xf0]  ;;  %v6394_v61 = vld [vmem:[%s7509_s17 + $0x344] sm:$0xf]  ;;  %v5413_v0 = vor.u32 %v6330_v56, %v5410_v58 }
 0x3bb   : > { %4542 = vmatpush.bf16.msra.mxu1 %v5445_v36  ;;  %v5666_v62 = vld [vmem:[%s7509_s17 + $0x350] sm:$0xf0]  ;;  %v5541_v1 = vor.u32 %v6362_v59, %v5538_v60  ;;  %v6294_v3 = vld [vmem:[%s7509_s17 + $0x24] sm:$0xf] }
 0x3bc   : > { %4556 = vmatpush.bf16.msra.mxu2 %v5573_v39  ;;  %v5266_v4 = vld [vmem:[%s7509_s17 + $0x30] sm:$0xf0]  ;;  %v6326_v5 = vld [vmem:[%s7509_s17 + $0x124] sm:$0xf]  ;;  %v5669_v8 = vor.u32 %v6394_v61, %v5666_v62 }
 0x3bd   : > { %4570 = vmatpush.bf16.msra.mxu3 %v5701_v43  ;;  %v5394_v9 = vld [vmem:[%s7509_s17 + $0x130] sm:$0xf0]  ;;  %v6358_v11 = vld [vmem:[%s7509_s17 + $0x224] sm:$0xf]  ;;  %v5269_v15 = vor.u32 %v6294_v3, %v5266_v4 }
 0x3be   : > { %4529 = vmatpush.bf16.msra.mxu0 %v5301_v50  ;;  %v5522_v12 = vld [vmem:[%s7509_s17 + $0x230] sm:$0xf0]  ;;  %v6390_v13 = vld [vmem:[%s7509_s17 + $0x324] sm:$0xf]  ;;  %v5397_v18 = vor.u32 %v6326_v5, %v5394_v9 }
 0x3bf   : > { %4543 = vmatpush.bf16.msra.mxu1 %v5429_v53  ;;  %v5650_v14 = vld [vmem:[%s7509_s17 + $0x330] sm:$0xf0]  ;;  %v6290_v16 = vld [vmem:[%s7509_s17 + $0x4] sm:$0xf]  ;;  %v5525_v19 = vor.u32 %v6358_v11, %v5522_v12 }
 0x3c0   : > { %4557 = vmatpush.bf16.msra.mxu2 %v5557_v51  ;;  %v5250_v17 = vld [vmem:[%s7509_s17 + $0x10] sm:$0xf0]  ;;  %v6322_v20 = vld [vmem:[%s7509_s17 + $0x104] sm:$0xf]  ;;  %v5653_v38 = vor.u32 %v6390_v13, %v5650_v14 }
 0x3c1   : > { %4571 = vmatpush.bf16.msra.mxu3 %v5685_v57  ;;  %v5378_v22 = vld [vmem:[%s7509_s17 + $0x110] sm:$0xf0]  ;;  %v6354_v23 = vld [vmem:[%s7509_s17 + $0x204] sm:$0xf]  ;;  %v5253_v31 = vor.u32 %v6290_v16, %v5250_v17 }
 0x3c2   : > { %4530 = vmatpush.bf16.msra.mxu0 %v5285_v63  ;;  %v5506_v24 = vld [vmem:[%s7509_s17 + $0x210] sm:$0xf0]  ;;  %v6386_v28 = vld [vmem:[%s7509_s17 + $0x304] sm:$0xf]  ;;  %v5381_v34 = vor.u32 %v6322_v20, %v5378_v22 }
 0x3c3   : > { %4544 = vmatpush.bf16.msra.mxu1 %v5413_v0  ;;  %v5634_v25 = vld [vmem:[%s7509_s17 + $0x310] sm:$0xf0]  ;;  %v6446_v27 = vld [vmem:[%s7509_s17 + $0x4e4] sm:$0xf]  ;;  %v5509_v54 = vor.u32 %v6354_v23, %v5506_v24 }
 0x3c4   : > { %4558 = vmatpush.bf16.msra.mxu2 %v5541_v1  ;;  %v5874_v29 = vld [vmem:[%s7509_s17 + $0x4f0] sm:$0xf0]  ;;  %v6478_v30 = vld [vmem:[%s7509_s17 + $0x5e4] sm:$0xf]  ;;  %v5637_v45 = vor.u32 %v6386_v28, %v5634_v25 }
 0x3c5   : > { %4572 = vmatpush.bf16.msra.mxu3 %v5669_v8  ;;  %v6002_v32 = vld [vmem:[%s7509_s17 + $0x5f0] sm:$0xf0]  ;;  %v6510_v37 = vld [vmem:[%s7509_s17 + $0x6e4] sm:$0xf]  ;;  %v5877_v40 = vor.u32 %v6446_v27, %v5874_v29 }
 0x3c6   : > { %4531 = vmatpush.bf16.msra.mxu0 %v5269_v15  ;;  %v6130_v33 = vld [vmem:[%s7509_s17 + $0x6f0] sm:$0xf0]  ;;  %v6542_v36 = vld [vmem:[%s7509_s17 + $0x7e4] sm:$0xf]  ;;  %v6005_v41 = vor.u32 %v6478_v30, %v6002_v32 }
 0x3c7   : > { %4545 = vmatpush.bf16.msra.mxu1 %v5397_v18  ;;  %v6258_v39 = vld [vmem:[%s7509_s17 + $0x7f0] sm:$0xf0]  ;;  %v6133_v43 = vor.u32 %v6510_v37, %v6130_v33  ;;  %v6442_v44 = vld [vmem:[%s7509_s17 + $0x4c4] sm:$0xf] }
 0x3c8   : > { %4559 = vmatpush.bf16.msra.mxu2 %v5525_v19  ;;  %v5858_v46 = vld [vmem:[%s7509_s17 + $0x4d0] sm:$0xf0]  ;;  %v6474_v47 = vld [vmem:[%s7509_s17 + $0x5c4] sm:$0xf]  ;;  %v6261_v48 = vor.u32 %v6542_v36, %v6258_v39 }
 0x3c9   : > { %4573 = vmatpush.bf16.msra.mxu3 %v5653_v38  ;;  %v5986_v49 = vld [vmem:[%s7509_s17 + $0x5d0] sm:$0xf0]  ;;  %v6506_v50 = vld [vmem:[%s7509_s17 + $0x6c4] sm:$0xf]  ;;  %v5861_v55 = vor.u32 %v6442_v44, %v5858_v46 }
 0x3ca   : > { %4532 = vmatpush.bf16.msra.mxu0 %v5253_v31  ;;  %v6114_v53 = vld [vmem:[%s7509_s17 + $0x6d0] sm:$0xf0]  ;;  %v6538_v51 = vld [vmem:[%s7509_s17 + $0x7c4] sm:$0xf]  ;;  %v5989_v56 = vor.u32 %v6474_v47, %v5986_v49 }
 0x3cb   : > { %4546 = vmatpush.bf16.msra.mxu1 %v5381_v34  ;;  %v6242_v52 = vld [vmem:[%s7509_s17 + $0x7d0] sm:$0xf0]  ;;  %v6117_v57 = vor.u32 %v6506_v50, %v6114_v53  ;;  %v6438_v58 = vld [vmem:[%s7509_s17 + $0x4a4] sm:$0xf] }
 0x3cc   : > { %4560 = vmatpush.bf16.msra.mxu2 %v5509_v54  ;;  %v5842_v59 = vld [vmem:[%s7509_s17 + $0x4b0] sm:$0xf0]  ;;  %v6470_v60 = vld [vmem:[%s7509_s17 + $0x5a4] sm:$0xf]  ;;  %v6245_v61 = vor.u32 %v6538_v51, %v6242_v52 }
 0x3cd   : > { %4574 = vmatpush.bf16.msra.mxu3 %v5637_v45  ;;  %v5970_v62 = vld [vmem:[%s7509_s17 + $0x5b0] sm:$0xf0]  ;;  %v6502_v63 = vld [vmem:[%s7509_s17 + $0x6a4] sm:$0xf]  ;;  %4533 = vmatmul.bf16.vlgmr.msra.gmra.mxu0 %v8677_v21  ;;  %v5845_v4 = vor.u32 %v6438_v58, %v5842_v59 }
 0x3ce   : > { %4581 = vmatpush.bf16.msrb.mxu0 %v5877_v40  ;;  %v6098_v0 = vld [vmem:[%s7509_s17 + $0x6b0] sm:$0xf0]  ;;  %v6534_v1 = vld [vmem:[%s7509_s17 + $0x7a4] sm:$0xf]  ;;  %4547 = vmatmul.bf16.vlgmr.msra.gmra.mxu1 %v8689_v35  ;;  %v5973_v5 = vor.u32 %v6470_v60, %v5970_v62 }
 0x3cf   : > { %4595 = vmatpush.bf16.msrb.mxu1 %v6005_v41  ;;  %v6226_v3 = vld [vmem:[%s7509_s17 + $0x7b0] sm:$0xf0]  ;;  %4561 = vmatmul.bf16.vlgmr.msra.gmra.mxu2 %v8682_v26  ;;  %v6101_v8 = vor.u32 %v6502_v63, %v6098_v0  ;;  %v6434_v9 = vld [vmem:[%s7509_s17 + $0x484] sm:$0xf] }
 0x3d0   : > { %4609 = vmatpush.bf16.msrb.mxu2 %v6133_v43  ;;  %4575 = vmatmul.bf16.vlgmr.msra.gmra.mxu3 %v8694_v42  ;;  %v5826_v11 = vld [vmem:[%s7509_s17 + $0x490] sm:$0xf0]  ;;  %v6466_v12 = vld [vmem:[%s7509_s17 + $0x584] sm:$0xf]  ;;  %v6229_v13 = vor.u32 %v6534_v1, %v6226_v3 }
 0x3d1   : > { %4623 = vmatpush.bf16.msrb.mxu3 %v6261_v48  ;;  %v5954_v14 = vld [vmem:[%s7509_s17 + $0x590] sm:$0xf0]  ;;  %v6498_v15 = vld [vmem:[%s7509_s17 + $0x684] sm:$0xf]  ;;  %v5829_v19 = vor.u32 %v6434_v9, %v5826_v11  ;;  %v5368_v11 = vld [vmem:[%s7509_s17 + $0xe8] sm:$0xf] }
 0x3d2   : > { %4582 = vmatpush.bf16.msrb.mxu0 %v5861_v55  ;;  %v6082_v16 = vld [vmem:[%s7509_s17 + $0x690] sm:$0xf0]  ;;  %v6530_v17 = vld [vmem:[%s7509_s17 + $0x784] sm:$0xf]  ;;  %v5957_v20 = vor.u32 %v6466_v12, %v5954_v14  ;;  %v6321_v12 = vld [vmem:[%s7509_s17 + $0xf4] sm:$0xf0] }
 0x3d3   : > { %4596 = vmatpush.bf16.msrb.mxu1 %v5989_v56  ;;  %v6210_v18 = vld [vmem:[%s7509_s17 + $0x790] sm:$0xf0]  ;;  %v6085_v22 = vor.u32 %v6498_v15, %v6082_v16  ;;  %v6430_v23 = vld [vmem:[%s7509_s17 + $0x464] sm:$0xf]  ;;  %v6353_v15 = vld [vmem:[%s7509_s17 + $0x1f4] sm:$0xf0] }
 0x3d4   : > { %4610 = vmatpush.bf16.msrb.mxu2 %v6117_v57  ;;  %v5810_v38 = vld [vmem:[%s7509_s17 + $0x470] sm:$0xf0]  ;;  %v6462_v24 = vld [vmem:[%s7509_s17 + $0x564] sm:$0xf]  ;;  %v6213_v28 = vor.u32 %v6530_v17, %v6210_v18  ;;  %v5624_v16 = vld [vmem:[%s7509_s17 + $0x2e8] sm:$0xf] }
 0x3d5   : > { %4624 = vmatpush.bf16.msrb.mxu3 %v6245_v61  ;;  %v5938_v25 = vld [vmem:[%s7509_s17 + $0x570] sm:$0xf0]  ;;  %v6494_v27 = vld [vmem:[%s7509_s17 + $0x664] sm:$0xf]  ;;  %v5813_v32 = vor.u32 %v6430_v23, %v5810_v38  ;;  %v6385_v17 = vld [vmem:[%s7509_s17 + $0x2f4] sm:$0xf0]  ;;  %v5369_v38 = vor.u32 %v6321_v12, %v5368_v11 }
 0x3d6   : > { %4583 = vmatpush.bf16.msrb.mxu0 %v5845_v4  ;;  %v6066_v29 = vld [vmem:[%s7509_s17 + $0x670] sm:$0xf0]  ;;  %v6526_v30 = vld [vmem:[%s7509_s17 + $0x764] sm:$0xf]  ;;  %v5941_v37 = vor.u32 %v6462_v24, %v5938_v25  ;;  %v5352_v25 = vld [vmem:[%s7509_s17 + $0xc8] sm:$0xf] }
 0x3d7   : > { %4597 = vmatpush.bf16.msrb.mxu1 %v5973_v5  ;;  %v6194_v31 = vld [vmem:[%s7509_s17 + $0x770] sm:$0xf0]  ;;  %v6069_v33 = vor.u32 %v6494_v27, %v6066_v29  ;;  %v6426_v34 = vld [vmem:[%s7509_s17 + $0x444] sm:$0xf]  ;;  %v6317_v27 = vld [vmem:[%s7509_s17 + $0xd4] sm:$0xf0] }
 0x3d8   : > { %4611 = vmatpush.bf16.msrb.mxu2 %v6101_v8  ;;  %v5794_v54 = vld [vmem:[%s7509_s17 + $0x450] sm:$0xf0]  ;;  %v6458_v36 = vld [vmem:[%s7509_s17 + $0x544] sm:$0xf]  ;;  %v6197_v39 = vor.u32 %v6526_v30, %v6194_v31  ;;  %v5480_v29 = vld [vmem:[%s7509_s17 + $0x1c8] sm:$0xf] }
 0x3d9   : > { %4625 = vmatpush.bf16.msrb.mxu3 %v6229_v13  ;;  %v5922_v45 = vld [vmem:[%s7509_s17 + $0x550] sm:$0xf0]  ;;  %v6490_v40 = vld [vmem:[%s7509_s17 + $0x644] sm:$0xf]  ;;  %v5797_v46 = vor.u32 %v6426_v34, %v5794_v54  ;;  %v5496_v13 = vld [vmem:[%s7509_s17 + $0x1e8] sm:$0xf]  ;;  %v5353_v54 = vor.u32 %v6317_v27, %v5352_v25 }
 0x3da   : > { %4584 = vmatpush.bf16.msrb.mxu0 %v5829_v19  ;;  %v6050_v41 = vld [vmem:[%s7509_s17 + $0x650] sm:$0xf0]  ;;  %v6522_v43 = vld [vmem:[%s7509_s17 + $0x744] sm:$0xf]  ;;  %v5925_v47 = vor.u32 %v6458_v36, %v5922_v45  ;;  %v5497_v24 = vor.u32 %v6353_v15, %v5496_v13  ;;  %v6349_v31 = vld [vmem:[%s7509_s17 + $0x1d4] sm:$0xf0] }
 0x3db   : > { %4598 = vmatpush.bf16.msrb.mxu1 %v5957_v20  ;;  %v6178_v44 = vld [vmem:[%s7509_s17 + $0x750] sm:$0xf0]  ;;  %v6053_v48 = vor.u32 %v6490_v40, %v6050_v41  ;;  %v6422_v49 = vld [vmem:[%s7509_s17 + $0x424] sm:$0xf]  ;;  %v5752_v20 = vld [vmem:[%s7509_s17 + $0x3e8] sm:$0xf]  ;;  %v5481_v36 = vor.u32 %v6349_v31, %v5480_v29 }
 0x3dc   : > { %4612 = vmatpush.bf16.msrb.mxu2 %v6085_v22  ;;  %v5778_v50 = vld [vmem:[%s7509_s17 + $0x430] sm:$0xf0]  ;;  %v6454_v53 = vld [vmem:[%s7509_s17 + $0x524] sm:$0xf]  ;;  %v6181_v51 = vor.u32 %v6522_v43, %v6178_v44  ;;  %v6417_v22 = vld [vmem:[%s7509_s17 + $0x3f4] sm:$0xf0] }
 0x3dd   : > { %4626 = vmatpush.bf16.msrb.mxu3 %v6213_v28  ;;  %v5906_v52 = vld [vmem:[%s7509_s17 + $0x530] sm:$0xf0]  ;;  %v6486_v55 = vld [vmem:[%s7509_s17 + $0x624] sm:$0xf]  ;;  %v5781_v59 = vor.u32 %v6422_v49, %v5778_v50  ;;  %v5625_v28 = vor.u32 %v6385_v17, %v5624_v16  ;;  %v5753_v30 = vor.u32 %v6417_v22, %v5752_v20  ;;  %v6413_v34 = vld [vmem:[%s7509_s17 + $0x3d4] sm:$0xf0] }
 0x3de   : > { %4585 = vmatpush.bf16.msrb.mxu0 %v5813_v32  ;;  %v6034_v56 = vld [vmem:[%s7509_s17 + $0x630] sm:$0xf0]  ;;  %v6518_v57 = vld [vmem:[%s7509_s17 + $0x724] sm:$0xf]  ;;  %v5909_v62 = vor.u32 %v6454_v53, %v5906_v52  ;;  %v5608_v32 = vld [vmem:[%s7509_s17 + $0x2c8] sm:$0xf] }
 0x3df   : > { %4599 = vmatpush.bf16.msrb.mxu1 %v5941_v37  ;;  %v6162_v58 = vld [vmem:[%s7509_s17 + $0x730] sm:$0xf0]  ;;  %v6418_v60 = vld [vmem:[%s7509_s17 + $0x404] sm:$0xf]  ;;  %v6037_v63 = vor.u32 %v6486_v55, %v6034_v56  ;;  %v6381_v37 = vld [vmem:[%s7509_s17 + $0x2d4] sm:$0xf0] }
 0x3e0   : > { %4613 = vmatpush.bf16.msrb.mxu2 %v6069_v33  ;;  %v5762_v61 = vld [vmem:[%s7509_s17 + $0x410] sm:$0xf0]  ;;  %v6450_v0 = vld [vmem:[%s7509_s17 + $0x504] sm:$0xf]  ;;  %v6165_v4 = vor.u32 %v6518_v57, %v6162_v58  ;;  %v5736_v33 = vld [vmem:[%s7509_s17 + $0x3c8] sm:$0xf] }
 0x3e1   : > { %4627 = vmatpush.bf16.msrb.mxu3 %v6197_v39  ;;  %v5890_v1 = vld [vmem:[%s7509_s17 + $0x510] sm:$0xf0]  ;;  %v6482_v3 = vld [vmem:[%s7509_s17 + $0x604] sm:$0xf]  ;;  %v5765_v14 = vor.u32 %v6418_v60, %v5762_v61  ;;  %v5609_v39 = vor.u32 %v6381_v37, %v5608_v32  ;;  %v5336_v45 = vld [vmem:[%s7509_s17 + $0xa8] sm:$0xf]  ;;  %v5737_v43 = vor.u32 %v6413_v34, %v5736_v33 }
 0x3e2   : > { %4586 = vmatpush.bf16.msrb.mxu0 %v5797_v46  ;;  %v6018_v5 = vld [vmem:[%s7509_s17 + $0x610] sm:$0xf0]  ;;  %v6514_v8 = vld [vmem:[%s7509_s17 + $0x704] sm:$0xf]  ;;  %v5893_v18 = vor.u32 %v6450_v0, %v5890_v1  ;;  %v6313_v40 = vld [vmem:[%s7509_s17 + $0xb4] sm:$0xf0] }
 0x3e3   : > { %4600 = vmatpush.bf16.msrb.mxu1 %v5925_v47  ;;  %v6146_v9 = vld [vmem:[%s7509_s17 + $0x710] sm:$0xf0]  ;;  %v6021_v19 = vor.u32 %v6482_v3, %v6018_v5  ;;  %v5464_v41 = vld [vmem:[%s7509_s17 + $0x1a8] sm:$0xf]  ;;  %v6345_v44 = vld [vmem:[%s7509_s17 + $0x1b4] sm:$0xf0]  ;;  %v5337_v50 = vor.u32 %v6313_v40, %v5336_v45 }
 0x3e4   : > { %4614 = vmatpush.bf16.msrb.mxu2 %v6053_v48  ;;  %v6149_v23 = vor.u32 %v6514_v8, %v6146_v9  ;;  %v5592_v46 = vld [vmem:[%s7509_s17 + $0x2a8] sm:$0xf]  ;;  %v6377_v47 = vld [vmem:[%s7509_s17 + $0x2b4] sm:$0xf0]  ;;  %v5465_v53 = vor.u32 %v6345_v44, %v5464_v41 }
 0x3e5   : > { %4628 = vmatpush.bf16.msrb.mxu3 %v6181_v51  ;;  %v5720_v48 = vld [vmem:[%s7509_s17 + $0x3a8] sm:$0xf]  ;;  %v6409_v49 = vld [vmem:[%s7509_s17 + $0x3b4] sm:$0xf0]  ;;  %v5593_v51 = vor.u32 %v6377_v47, %v5592_v46 }
 0x3e6   : > { %4587 = vmatpush.bf16.msrb.mxu0 %v5781_v59  ;;  %v5320_v52 = vld [vmem:[%s7509_s17 + $0x88] sm:$0xf]  ;;  %v6309_v55 = vld [vmem:[%s7509_s17 + $0x94] sm:$0xf0]  ;;  %v5721_v57 = vor.u32 %v6409_v49, %v5720_v48 }
 0x3e7   : > { %4601 = vmatpush.bf16.msrb.mxu1 %v5909_v62  ;;  %v5448_v56 = vld [vmem:[%s7509_s17 + $0x188] sm:$0xf]  ;;  %v6341_v58 = vld [vmem:[%s7509_s17 + $0x194] sm:$0xf0] }
 0x3e8   : > { %4615 = vmatpush.bf16.msrb.mxu2 %v6037_v63  ;;  %v5576_v59 = vld [vmem:[%s7509_s17 + $0x288] sm:$0xf]  ;;  %v6373_v60 = vld [vmem:[%s7509_s17 + $0x294] sm:$0xf0]  ;;  %v5321_v63 = vor.u32 %v6309_v55, %v5320_v52  ;;  %v5449_v0 = vor.u32 %v6341_v58, %v5448_v56 }
 0x3e9   : > { %4629 = vmatpush.bf16.msrb.mxu3 %v6165_v4  ;;  %v5704_v61 = vld [vmem:[%s7509_s17 + $0x388] sm:$0xf]  ;;  %v6405_v62 = vld [vmem:[%s7509_s17 + $0x394] sm:$0xf0]  ;;  %v5577_v1 = vor.u32 %v6373_v60, %v5576_v59 }
 0x3ea   : > { %4588 = vmatpush.bf16.msrb.mxu0 %v5765_v14  ;;  %v5304_v3 = vld [vmem:[%s7509_s17 + $0x68] sm:$0xf]  ;;  %v6305_v4 = vld [vmem:[%s7509_s17 + $0x74] sm:$0xf0]  ;;  %v5705_v8 = vor.u32 %v6405_v62, %v5704_v61 }
 0x3eb   : > { %4602 = vmatpush.bf16.msrb.mxu1 %v5893_v18  ;;  %v5432_v5 = vld [vmem:[%s7509_s17 + $0x168] sm:$0xf]  ;;  %v6337_v9 = vld [vmem:[%s7509_s17 + $0x174] sm:$0xf0]  ;;  %v5305_v15 = vor.u32 %v6305_v4, %v5304_v3 }
 0x3ec   : > { %4616 = vmatpush.bf16.msrb.mxu2 %v6021_v19  ;;  %v5560_v11 = vld [vmem:[%s7509_s17 + $0x268] sm:$0xf]  ;;  %v6369_v12 = vld [vmem:[%s7509_s17 + $0x274] sm:$0xf0]  ;;  %v5433_v16 = vor.u32 %v6337_v9, %v5432_v5 }
 0x3ed   : > { %4630 = vmatpush.bf16.msrb.mxu3 %v6149_v23  ;;  %4589 = vmatmul.bf16.vlgmr.msrb.gmra.mxu0 %v8746_v2  ;;  %v5688_v13 = vld [vmem:[%s7509_s17 + $0x368] sm:$0xf]  ;;  %v6401_v14 = vld [vmem:[%s7509_s17 + $0x374] sm:$0xf0]  ;;  %v5561_v17 = vor.u32 %v6369_v12, %v5560_v11 }
 0x3ee   : > { %4637 = vmatpush.bf16.msra.mxu0 %v5369_v38  ;;  %4603 = vmatmul.bf16.vlgmr.msrb.gmra.mxu1 %v8753_v7  ;;  %v5288_v18 = vld [vmem:[%s7509_s17 + $0x48] sm:$0xf]  ;;  %v6301_v19 = vld [vmem:[%s7509_s17 + $0x54] sm:$0xf0]  ;;  %v5689_v22 = vor.u32 %v6401_v14, %v5688_v13 }
 0x3ef   : > { %4651 = vmatpush.bf16.msra.mxu1 %v5497_v24  ;;  %4617 = vmatmul.bf16.vlgmr.msrb.gmra.mxu2 %v8751_v6  ;;  %v5416_v20 = vld [vmem:[%s7509_s17 + $0x148] sm:$0xf]  ;;  %v6333_v23 = vld [vmem:[%s7509_s17 + $0x154] sm:$0xf0]  ;;  %v5289_v27 = vor.u32 %v6301_v19, %v5288_v18 }
 0x3f0   : > { %4665 = vmatpush.bf16.msra.mxu2 %v5625_v28  ;;  %4631 = vmatmul.bf16.vlgmr.msrb.gmra.mxu3 %v8757_v10  ;;  %v5544_v38 = vld [vmem:[%s7509_s17 + $0x248] sm:$0xf]  ;;  %v6365_v24 = vld [vmem:[%s7509_s17 + $0x254] sm:$0xf0]  ;;  %v5417_v29 = vor.u32 %v6333_v23, %v5416_v20 }
 0x3f1   : > { %4679 = vmatpush.bf16.msra.mxu3 %v5753_v30  ;;  %v5672_v28 = vld [vmem:[%s7509_s17 + $0x348] sm:$0xf]  ;;  %v6397_v25 = vld [vmem:[%s7509_s17 + $0x354] sm:$0xf0]  ;;  %v5545_v30 = vor.u32 %v6365_v24, %v5544_v38 }
 0x3f2   : > { %4638 = vmatpush.bf16.msra.mxu0 %v5353_v54  ;;  %v5272_v31 = vld [vmem:[%s7509_s17 + $0x28] sm:$0xf]  ;;  %v6297_v32 = vld [vmem:[%s7509_s17 + $0x34] sm:$0xf0]  ;;  %v5673_v33 = vor.u32 %v6397_v25, %v5672_v28 }
 0x3f3   : > { %4652 = vmatpush.bf16.msra.mxu1 %v5481_v36  ;;  %v5400_v37 = vld [vmem:[%s7509_s17 + $0x128] sm:$0xf]  ;;  %v6329_v34 = vld [vmem:[%s7509_s17 + $0x134] sm:$0xf0]  ;;  %v5273_v40 = vor.u32 %v6297_v32, %v5272_v31 }
 0x3f4   : > { %4666 = vmatpush.bf16.msra.mxu2 %v5609_v39  ;;  %v5528_v54 = vld [vmem:[%s7509_s17 + $0x228] sm:$0xf]  ;;  %v6361_v36 = vld [vmem:[%s7509_s17 + $0x234] sm:$0xf0]  ;;  %v5401_v44 = vor.u32 %v6329_v34, %v5400_v37 }
 0x3f5   : > { %4680 = vmatpush.bf16.msra.mxu3 %v5737_v43  ;;  %v5656_v39 = vld [vmem:[%s7509_s17 + $0x328] sm:$0xf]  ;;  %v6393_v45 = vld [vmem:[%s7509_s17 + $0x334] sm:$0xf0]  ;;  %v5529_v46 = vor.u32 %v6361_v36, %v5528_v54 }
 0x3f6   : > { %4639 = vmatpush.bf16.msra.mxu0 %v5337_v50  ;;  %v5256_v41 = vld [vmem:[%s7509_s17 + $0x8] sm:$0xf]  ;;  %v6293_v43 = vld [vmem:[%s7509_s17 + $0x14] sm:$0xf0]  ;;  %v5657_v50 = vor.u32 %v6393_v45, %v5656_v39 }
 0x3f7   : > { %4653 = vmatpush.bf16.msra.mxu1 %v5465_v53  ;;  %v5384_v47 = vld [vmem:[%s7509_s17 + $0x108] sm:$0xf]  ;;  %v6325_v48 = vld [vmem:[%s7509_s17 + $0x114] sm:$0xf0]  ;;  %v5257_v58 = vor.u32 %v6293_v43, %v5256_v41 }
 0x3f8   : > { %4667 = vmatpush.bf16.msra.mxu2 %v5593_v51  ;;  %v5512_v49 = vld [vmem:[%s7509_s17 + $0x208] sm:$0xf]  ;;  %v6357_v53 = vld [vmem:[%s7509_s17 + $0x214] sm:$0xf0]  ;;  %v5385_v62 = vor.u32 %v6325_v48, %v5384_v47 }
 0x3f9   : > { %4681 = vmatpush.bf16.msra.mxu3 %v5721_v57  ;;  %v5640_v51 = vld [vmem:[%s7509_s17 + $0x308] sm:$0xf]  ;;  %v6389_v52 = vld [vmem:[%s7509_s17 + $0x314] sm:$0xf0] }
 0x3fa   : > { %4640 = vmatpush.bf16.msra.mxu0 %v5321_v63  ;;  %v5880_v55 = vld [vmem:[%s7509_s17 + $0x4e8] sm:$0xf]  ;;  %v6449_v56 = vld [vmem:[%s7509_s17 + $0x4f4] sm:$0xf0]  ;;  %v5513_v63 = vor.u32 %v6357_v53, %v5512_v49  ;;  %v5641_v3 = vor.u32 %v6389_v52, %v5640_v51 }
 0x3fb   : > { %4654 = vmatpush.bf16.msra.mxu1 %v5449_v0  ;;  %v6008_v57 = vld [vmem:[%s7509_s17 + $0x5e8] sm:$0xf]  ;;  %v6481_v59 = vld [vmem:[%s7509_s17 + $0x5f4] sm:$0xf0]  ;;  %v5881_v4 = vor.u32 %v6449_v56, %v5880_v55 }
 0x3fc   : > { %4668 = vmatpush.bf16.msra.mxu2 %v5577_v1  ;;  %v6136_v60 = vld [vmem:[%s7509_s17 + $0x6e8] sm:$0xf]  ;;  %v6513_v61 = vld [vmem:[%s7509_s17 + $0x6f4] sm:$0xf0]  ;;  %v6009_v5 = vor.u32 %v6481_v59, %v6008_v57 }
 0x3fd   : > { %4682 = vmatpush.bf16.msra.mxu3 %v5705_v8  ;;  %v6264_v0 = vld [vmem:[%s7509_s17 + $0x7e8] sm:$0xf]  ;;  %v6545_v1 = vld [vmem:[%s7509_s17 + $0x7f4] sm:$0xf0]  ;;  %v6137_v8 = vor.u32 %v6513_v61, %v6136_v60 }
 0x3fe   : > { %4641 = vmatpush.bf16.msra.mxu0 %v5305_v15  ;;  %v5864_v9 = vld [vmem:[%s7509_s17 + $0x4c8] sm:$0xf]  ;;  %v6445_v11 = vld [vmem:[%s7509_s17 + $0x4d4] sm:$0xf0]  ;;  %v6265_v13 = vor.u32 %v6545_v1, %v6264_v0 }
 0x3ff   : > { %4655 = vmatpush.bf16.msra.mxu1 %v5433_v16  ;;  %v5992_v12 = vld [vmem:[%s7509_s17 + $0x5c8] sm:$0xf]  ;;  %v6477_v14 = vld [vmem:[%s7509_s17 + $0x5d4] sm:$0xf0]  ;;  %v5865_v19 = vor.u32 %v6445_v11, %v5864_v9 }
 0x400   : > { %4669 = vmatpush.bf16.msra.mxu2 %v5561_v17  ;;  %v6120_v15 = vld [vmem:[%s7509_s17 + $0x6c8] sm:$0xf]  ;;  %v6509_v16 = vld [vmem:[%s7509_s17 + $0x6d4] sm:$0xf0]  ;;  %v5993_v20 = vor.u32 %v6477_v14, %v5992_v12 }
 0x401   : > { %4683 = vmatpush.bf16.msra.mxu3 %v5689_v22  ;;  %v6248_v17 = vld [vmem:[%s7509_s17 + $0x7c8] sm:$0xf]  ;;  %v6541_v18 = vld [vmem:[%s7509_s17 + $0x7d4] sm:$0xf0]  ;;  %v6121_v22 = vor.u32 %v6509_v16, %v6120_v15 }
 0x402   : > { %4642 = vmatpush.bf16.msra.mxu0 %v5289_v27  ;;  %v5848_v23 = vld [vmem:[%s7509_s17 + $0x4a8] sm:$0xf]  ;;  %v6441_v38 = vld [vmem:[%s7509_s17 + $0x4b4] sm:$0xf0]  ;;  %v6249_v28 = vor.u32 %v6541_v18, %v6248_v17 }
 0x403   : > { %4656 = vmatpush.bf16.msra.mxu1 %v5417_v29  ;;  %v5976_v24 = vld [vmem:[%s7509_s17 + $0x5a8] sm:$0xf]  ;;  %v6473_v25 = vld [vmem:[%s7509_s17 + $0x5b4] sm:$0xf0]  ;;  %v5849_v32 = vor.u32 %v6441_v38, %v5848_v23 }
 0x404   : > { %4670 = vmatpush.bf16.msra.mxu2 %v5545_v30  ;;  %v6104_v27 = vld [vmem:[%s7509_s17 + $0x6a8] sm:$0xf]  ;;  %v6505_v29 = vld [vmem:[%s7509_s17 + $0x6b4] sm:$0xf0]  ;;  %v5977_v37 = vor.u32 %v6473_v25, %v5976_v24 }
 0x405   : > { %4684 = vmatpush.bf16.msra.mxu3 %v5673_v33  ;;  %v6232_v30 = vld [vmem:[%s7509_s17 + $0x7a8] sm:$0xf]  ;;  %v6537_v31 = vld [vmem:[%s7509_s17 + $0x7b4] sm:$0xf0]  ;;  %v6105_v33 = vor.u32 %v6505_v29, %v6104_v27 }
 0x406   : > { %4643 = vmatpush.bf16.msra.mxu0 %v5273_v40  ;;  %v5832_v34 = vld [vmem:[%s7509_s17 + $0x488] sm:$0xf]  ;;  %v6437_v54 = vld [vmem:[%s7509_s17 + $0x494] sm:$0xf0]  ;;  %v6233_v39 = vor.u32 %v6537_v31, %v6232_v30 }
 0x407   : > { %4657 = vmatpush.bf16.msra.mxu1 %v5401_v44  ;;  %v5960_v36 = vld [vmem:[%s7509_s17 + $0x588] sm:$0xf]  ;;  %v6469_v45 = vld [vmem:[%s7509_s17 + $0x594] sm:$0xf0] }
 0x408   : > { %4671 = vmatpush.bf16.msra.mxu2 %v5529_v46  ;;  %v6088_v40 = vld [vmem:[%s7509_s17 + $0x688] sm:$0xf]  ;;  %v6501_v41 = vld [vmem:[%s7509_s17 + $0x694] sm:$0xf0]  ;;  %v5833_v46 = vor.u32 %v6437_v54, %v5832_v34  ;;  %v5961_v47 = vor.u32 %v6469_v45, %v5960_v36  ;;  %v6319_v54 = vld [vmem:[%s7509_s17 + $0xec] sm:$0xf] }
 0x409   : > { %4685 = vmatpush.bf16.msra.mxu3 %v5657_v50  ;;  %v6216_v43 = vld [vmem:[%s7509_s17 + $0x788] sm:$0xf]  ;;  %v6533_v44 = vld [vmem:[%s7509_s17 + $0x794] sm:$0xf0]  ;;  %v6089_v48 = vor.u32 %v6501_v41, %v6088_v40  ;;  %v5370_v36 = vld [vmem:[%s7509_s17 + $0xf8] sm:$0xf0] }
 0x40a   : > { %4644 = vmatpush.bf16.msra.mxu0 %v5257_v58  ;;  %v5816_v49 = vld [vmem:[%s7509_s17 + $0x468] sm:$0xf]  ;;  %v6433_v50 = vld [vmem:[%s7509_s17 + $0x474] sm:$0xf0]  ;;  %v6217_v51 = vor.u32 %v6533_v44, %v6216_v43  ;;  %v5498_v40 = vld [vmem:[%s7509_s17 + $0x1f8] sm:$0xf0] }
 0x40b   : > { %4658 = vmatpush.bf16.msra.mxu1 %v5385_v62  ;;  %v5944_v53 = vld [vmem:[%s7509_s17 + $0x568] sm:$0xf]  ;;  %v6465_v52 = vld [vmem:[%s7509_s17 + $0x574] sm:$0xf0]  ;;  %v5817_v59 = vor.u32 %v6433_v50, %v5816_v49  ;;  %v6383_v41 = vld [vmem:[%s7509_s17 + $0x2ec] sm:$0xf]  ;;  %v5373_v50 = vor.u32 %v6319_v54, %v5370_v36 }
 0x40c   : > { %4672 = vmatpush.bf16.msra.mxu2 %v5513_v63  ;;  %v6072_v55 = vld [vmem:[%s7509_s17 + $0x668] sm:$0xf]  ;;  %v6497_v56 = vld [vmem:[%s7509_s17 + $0x674] sm:$0xf0]  ;;  %v5945_v60 = vor.u32 %v6465_v52, %v5944_v53  ;;  %v5626_v43 = vld [vmem:[%s7509_s17 + $0x2f8] sm:$0xf0] }
 0x40d   : > { %4686 = vmatpush.bf16.msra.mxu3 %v5641_v3  ;;  %4645 = vmatmul.bf16.vlgmr.msra.gmra.mxu0 %v8677_v21  ;;  %v6200_v57 = vld [vmem:[%s7509_s17 + $0x768] sm:$0xf]  ;;  %v6529_v58 = vld [vmem:[%s7509_s17 + $0x774] sm:$0xf0]  ;;  %v6073_v61 = vor.u32 %v6497_v56, %v6072_v55  ;;  %v6315_v52 = vld [vmem:[%s7509_s17 + $0xcc] sm:$0xf] }
 0x40e   : > { %4693 = vmatpush.bf16.msrb.mxu0 %v5881_v4  ;;  %4659 = vmatmul.bf16.vlgmr.msra.gmra.mxu1 %v8689_v35  ;;  %v5800_v62 = vld [vmem:[%s7509_s17 + $0x448] sm:$0xf]  ;;  %v6429_v63 = vld [vmem:[%s7509_s17 + $0x454] sm:$0xf0]  ;;  %v6201_v1 = vor.u32 %v6529_v58, %v6200_v57  ;;  %v5354_v55 = vld [vmem:[%s7509_s17 + $0xd8] sm:$0xf0] }
 0x40f   : > { %4707 = vmatpush.bf16.msrb.mxu1 %v6009_v5  ;;  %4673 = vmatmul.bf16.vlgmr.msra.gmra.mxu2 %v8682_v26  ;;  %v5928_v0 = vld [vmem:[%s7509_s17 + $0x548] sm:$0xf]  ;;  %v6461_v3 = vld [vmem:[%s7509_s17 + $0x554] sm:$0xf0]  ;;  %v5801_v11 = vor.u32 %v6429_v63, %v5800_v62  ;;  %v6347_v56 = vld [vmem:[%s7509_s17 + $0x1cc] sm:$0xf]  ;;  %v5357_v63 = vor.u32 %v6315_v52, %v5354_v55 }
 0x410   : > { %4721 = vmatpush.bf16.msrb.mxu2 %v6137_v8  ;;  %4687 = vmatmul.bf16.vlgmr.msra.gmra.mxu3 %v8694_v42  ;;  %v6056_v4 = vld [vmem:[%s7509_s17 + $0x648] sm:$0xf]  ;;  %v6493_v5 = vld [vmem:[%s7509_s17 + $0x654] sm:$0xf0]  ;;  %v5929_v12 = vor.u32 %v6461_v3, %v5928_v0  ;;  %v5482_v58 = vld [vmem:[%s7509_s17 + $0x1d8] sm:$0xf0] }
 0x411   : > { %4735 = vmatpush.bf16.msrb.mxu3 %v6265_v13  ;;  %v6184_v8 = vld [vmem:[%s7509_s17 + $0x748] sm:$0xf]  ;;  %v6525_v9 = vld [vmem:[%s7509_s17 + $0x754] sm:$0xf0]  ;;  %v6057_v13 = vor.u32 %v6493_v5, %v6056_v4  ;;  %v5738_v62 = vld [vmem:[%s7509_s17 + $0x3d8] sm:$0xf0]  ;;  %v5485_v0 = vor.u32 %v6347_v56, %v5482_v58 }
 0x412   : > { %4694 = vmatpush.bf16.msrb.mxu0 %v5865_v19  ;;  %v5784_v14 = vld [vmem:[%s7509_s17 + $0x428] sm:$0xf]  ;;  %v6425_v15 = vld [vmem:[%s7509_s17 + $0x434] sm:$0xf0]  ;;  %v6185_v17 = vor.u32 %v6525_v9, %v6184_v8  ;;  %v6311_v3 = vld [vmem:[%s7509_s17 + $0xac] sm:$0xf] }
 0x413   : > { %4708 = vmatpush.bf16.msrb.mxu1 %v5993_v20  ;;  %v5912_v16 = vld [vmem:[%s7509_s17 + $0x528] sm:$0xf]  ;;  %v6457_v18 = vld [vmem:[%s7509_s17 + $0x534] sm:$0xf0]  ;;  %v5785_v38 = vor.u32 %v6425_v15, %v5784_v14  ;;  %v5338_v4 = vld [vmem:[%s7509_s17 + $0xb8] sm:$0xf0] }
 0x414   : > { %4722 = vmatpush.bf16.msrb.mxu2 %v6121_v22  ;;  %v6040_v19 = vld [vmem:[%s7509_s17 + $0x628] sm:$0xf]  ;;  %v6489_v20 = vld [vmem:[%s7509_s17 + $0x634] sm:$0xf0]  ;;  %v5913_v25 = vor.u32 %v6457_v18, %v5912_v16  ;;  %v6343_v5 = vld [vmem:[%s7509_s17 + $0x1ac] sm:$0xf]  ;;  %v5341_v15 = vor.u32 %v6311_v3, %v5338_v4 }
 0x415   : > { %4736 = vmatpush.bf16.msrb.mxu3 %v6249_v28  ;;  %v6168_v22 = vld [vmem:[%s7509_s17 + $0x728] sm:$0xf]  ;;  %v6521_v23 = vld [vmem:[%s7509_s17 + $0x734] sm:$0xf0]  ;;  %v6041_v27 = vor.u32 %v6489_v20, %v6040_v19  ;;  %v5466_v9 = vld [vmem:[%s7509_s17 + $0x1b8] sm:$0xf0] }
 0x416   : > { %4695 = vmatpush.bf16.msrb.mxu0 %v5849_v32  ;;  %v5768_v24 = vld [vmem:[%s7509_s17 + $0x408] sm:$0xf]  ;;  %v6421_v28 = vld [vmem:[%s7509_s17 + $0x414] sm:$0xf0]  ;;  %v6169_v32 = vor.u32 %v6521_v23, %v6168_v22  ;;  %v5722_v14 = vld [vmem:[%s7509_s17 + $0x3b8] sm:$0xf0]  ;;  %v5469_v16 = vor.u32 %v6343_v5, %v5466_v9 }
 0x417   : > { %4709 = vmatpush.bf16.msrb.mxu1 %v5977_v37  ;;  %v5896_v29 = vld [vmem:[%s7509_s17 + $0x508] sm:$0xf]  ;;  %v6453_v30 = vld [vmem:[%s7509_s17 + $0x514] sm:$0xf0]  ;;  %v5769_v45 = vor.u32 %v6421_v28, %v5768_v24  ;;  %v6307_v18 = vld [vmem:[%s7509_s17 + $0x8c] sm:$0xf] }
 0x418   : > { %4723 = vmatpush.bf16.msrb.mxu2 %v6105_v33  ;;  %v6024_v31 = vld [vmem:[%s7509_s17 + $0x608] sm:$0xf]  ;;  %v6485_v37 = vld [vmem:[%s7509_s17 + $0x614] sm:$0xf0]  ;;  %v5897_v44 = vor.u32 %v6453_v30, %v5896_v29  ;;  %v5322_v19 = vld [vmem:[%s7509_s17 + $0x98] sm:$0xf0]  ;;  %v9051_v29 = vpop.f32.mrf.mxu0 }
 0x419   : > { %4737 = vmatpush.bf16.msrb.mxu3 %v6233_v39  ;;  %v6152_v33 = vld [vmem:[%s7509_s17 + $0x708] sm:$0xf]  ;;  %v6517_v34 = vld [vmem:[%s7509_s17 + $0x714] sm:$0xf0]  ;;  %v6351_v39 = vld [vmem:[%s7509_s17 + $0x1ec] sm:$0xf] }
 0x41a   : > { %4696 = vmatpush.bf16.msrb.mxu0 %v5833_v46  ;;  %v6025_v46 = vor.u32 %v6485_v37, %v6024_v31  ;;  %v6153_v49 = vor.u32 %v6517_v34, %v6152_v33  ;;  %v5501_v53 = vor.u32 %v6351_v39, %v5498_v40  ;;  %v6339_v20 = vld [vmem:[%s7509_s17 + $0x18c] sm:$0xf]  ;;  %v5450_v23 = vld [vmem:[%s7509_s17 + $0x198] sm:$0xf0]  ;;  %v9056_v34 = vpop.f32.mrf.mxu1 }
 0x41b   : > { %4710 = vmatpush.bf16.msrb.mxu1 %v5961_v47  ;;  %v6415_v47 = vld [vmem:[%s7509_s17 + $0x3ec] sm:$0xf]  ;;  %v5578_v24 = vld [vmem:[%s7509_s17 + $0x298] sm:$0xf0]  ;;  %v5453_v30 = vor.u32 %v6339_v20, %v5450_v23 }
 0x41c   : > { %4724 = vmatpush.bf16.msrb.mxu2 %v6089_v48  ;;  %v5754_v48 = vld [vmem:[%s7509_s17 + $0x3f8] sm:$0xf0]  ;;  %v6403_v28 = vld [vmem:[%s7509_s17 + $0x38c] sm:$0xf] }
 0x41d   : > { %4738 = vmatpush.bf16.msrb.mxu3 %v6217_v51  ;;  %v5629_v51 = vor.u32 %v6383_v41, %v5626_v43  ;;  %v5757_v57 = vor.u32 %v6415_v47, %v5754_v48  ;;  %v5306_v37 = vld [vmem:[%s7509_s17 + $0x78] sm:$0xf0]  ;;  %v6335_v33 = vld [vmem:[%s7509_s17 + $0x16c] sm:$0xf] }
 0x41e   : > { %4697 = vmatpush.bf16.msrb.mxu0 %v5817_v59  ;;  %v6379_v59 = vld [vmem:[%s7509_s17 + $0x2cc] sm:$0xf]  ;;  %v5434_v36 = vld [vmem:[%s7509_s17 + $0x178] sm:$0xf0] }
 0x41f   : > { %4711 = vmatpush.bf16.msrb.mxu1 %v5945_v60  ;;  %v5610_v60 = vld [vmem:[%s7509_s17 + $0x2d8] sm:$0xf0]  ;;  %v6367_v39 = vld [vmem:[%s7509_s17 + $0x26c] sm:$0xf] }
 0x420   : > { %4725 = vmatpush.bf16.msrb.mxu2 %v6073_v61  ;;  %v6411_v61 = vld [vmem:[%s7509_s17 + $0x3cc] sm:$0xf]  ;;  %v5690_v41 = vld [vmem:[%s7509_s17 + $0x378] sm:$0xf0] }
 0x421   : > { %4739 = vmatpush.bf16.msrb.mxu3 %v6201_v1  ;;  %v5613_v1 = vor.u32 %v6379_v59, %v5610_v60  ;;  %v5741_v8 = vor.u32 %v6411_v61, %v5738_v62  ;;  %v6399_v40 = vld [vmem:[%s7509_s17 + $0x36c] sm:$0xf]  ;;  %v5290_v48 = vld [vmem:[%s7509_s17 + $0x58] sm:$0xf0]  ;;  %v9073_v59 = vpop.f32.mrf.mxu3 }
 0x422   : > { %4698 = vmatpush.bf16.msrb.mxu0 %v5801_v11  ;;  %v6375_v11 = vld [vmem:[%s7509_s17 + $0x2ac] sm:$0xf]  ;;  %v5546_v52 = vld [vmem:[%s7509_s17 + $0x258] sm:$0xf0] }
 0x423   : > { %4712 = vmatpush.bf16.msrb.mxu1 %v5929_v12  ;;  %v5594_v12 = vld [vmem:[%s7509_s17 + $0x2b8] sm:$0xf0]  ;;  %v6299_v47 = vld [vmem:[%s7509_s17 + $0x4c] sm:$0xf] }
 0x424   : > { %4726 = vmatpush.bf16.msrb.mxu2 %v6057_v13  ;;  %v6407_v13 = vld [vmem:[%s7509_s17 + $0x3ac] sm:$0xf]  ;;  %v5674_v56 = vld [vmem:[%s7509_s17 + $0x358] sm:$0xf0]  ;;  %v5293_v58 = vor.u32 %v6299_v47, %v5290_v48 }
 0x425   : > { %4740 = vmatpush.bf16.msrb.mxu3 %v6185_v17  ;;  %v5597_v17 = vor.u32 %v6375_v11, %v5594_v12  ;;  %v5725_v22 = vor.u32 %v6407_v13, %v5722_v14  ;;  %v6395_v55 = vld [vmem:[%s7509_s17 + $0x34c] sm:$0xf]  ;;  %v5402_v3 = vld [vmem:[%s7509_s17 + $0x138] sm:$0xf0]  ;;  %v9085_v12 = vpop.f32.mrf.mxu1 }
 0x426   : > { %4699 = vmatpush.bf16.msrb.mxu0 %v5785_v38  ;;  %v6371_v38 = vld [vmem:[%s7509_s17 + $0x28c] sm:$0xf]  ;;  %v5530_v5 = vld [vmem:[%s7509_s17 + $0x238] sm:$0xf0] }
 0x427   : > { %4713 = vmatpush.bf16.msrb.mxu1 %v5913_v25  ;;  %v5706_v25 = vld [vmem:[%s7509_s17 + $0x398] sm:$0xf0]  ;;  %v5581_v31 = vor.u32 %v6371_v38, %v5578_v24  ;;  %v6295_v62 = vld [vmem:[%s7509_s17 + $0x2c] sm:$0xf] }
 0x428   : > { %4727 = vmatpush.bf16.msrb.mxu2 %v6041_v27  ;;  %v5325_v27 = vor.u32 %v6307_v18, %v5322_v19  ;;  %v5709_v54 = vor.u32 %v6403_v28, %v5706_v25  ;;  %v6359_v4 = vld [vmem:[%s7509_s17 + $0x22c] sm:$0xf]  ;;  %v5658_v11 = vld [vmem:[%s7509_s17 + $0x338] sm:$0xf0] }
 0x429   : > { %4741 = vmatpush.bf16.msrb.mxu3 %v6169_v32  ;;  %v6303_v32 = vld [vmem:[%s7509_s17 + $0x6c] sm:$0xf]  ;;  %v5386_v19 = vld [vmem:[%s7509_s17 + $0x118] sm:$0xf0] }
 0x42a   : > { %4700 = vmatpush.bf16.msrb.mxu0 %v5769_v45  ;;  %v5562_v45 = vld [vmem:[%s7509_s17 + $0x278] sm:$0xf0]  ;;  %v5309_v43 = vor.u32 %v6303_v32, %v5306_v37  ;;  %v6391_v9 = vld [vmem:[%s7509_s17 + $0x32c] sm:$0xf] }
 0x42b   : > { %4714 = vmatpush.bf16.msrb.mxu1 %v5897_v44  ;;  %v5437_v44 = vor.u32 %v6335_v33, %v5434_v36  ;;  %v6291_v14 = vld [vmem:[%s7509_s17 + $0xc] sm:$0xf]  ;;  %v5514_v23 = vld [vmem:[%s7509_s17 + $0x218] sm:$0xf0] }
 0x42c   : > { %4728 = vmatpush.bf16.msrb.mxu2 %v6025_v46  ;;  %v5565_v46 = vor.u32 %v6367_v39, %v5562_v45  ;;  %v6323_v18 = vld [vmem:[%s7509_s17 + $0x10c] sm:$0xf]  ;;  %v5642_v24 = vld [vmem:[%s7509_s17 + $0x318] sm:$0xf0] }
 0x42d   : > { %4742 = vmatpush.bf16.msrb.mxu3 %v6153_v49  ;;  %4701 = vmatmul.bf16.vlgmr.msrb.gmra.mxu0 %v8746_v2  ;;  %v6331_v49 = vld [vmem:[%s7509_s17 + $0x14c] sm:$0xf]  ;;  %v5882_v25 = vld [vmem:[%s7509_s17 + $0x4f8] sm:$0xf0]  ;;  %v5389_v33 = vor.u32 %v6323_v18, %v5386_v19 }
 0x42e   : > { %4749 = vmatpush.bf16.msra.mxu0 %v5373_v50  ;;  %4715 = vmatmul.bf16.vlgmr.msrb.gmra.mxu1 %v8753_v7  ;;  %v5693_v50 = vor.u32 %v6399_v40, %v5690_v41  ;;  %v6355_v20 = vld [vmem:[%s7509_s17 + $0x20c] sm:$0xf]  ;;  %v6138_v37 = vld [vmem:[%s7509_s17 + $0x6f8] sm:$0xf0] }
 0x42f   : > { %4763 = vmatpush.bf16.msra.mxu1 %v5501_v53  ;;  %4729 = vmatmul.bf16.vlgmr.msrb.gmra.mxu2 %v8751_v6  ;;  %v5418_v53 = vld [vmem:[%s7509_s17 + $0x158] sm:$0xf0]  ;;  %v6387_v38 = vld [vmem:[%s7509_s17 + $0x30c] sm:$0xf] }
 0x430   : > { %4777 = vmatpush.bf16.msra.mxu2 %v5629_v51  ;;  %4743 = vmatmul.bf16.vlgmr.msrb.gmra.mxu3 %v8757_v10  ;;  %v6363_v51 = vld [vmem:[%s7509_s17 + $0x24c] sm:$0xf]  ;;  %v5421_v60 = vor.u32 %v6331_v49, %v5418_v53  ;;  %v6266_v39 = vld [vmem:[%s7509_s17 + $0x7f8] sm:$0xf0]  ;;  %v5645_v40 = vor.u32 %v6387_v38, %v5642_v24 }
 0x431   : > { %4791 = vmatpush.bf16.msra.mxu3 %v5757_v57  ;;  %v9071_v57 = vpop.f32.mrf.mxu2  ;;  %v5549_v61 = vor.u32 %v6363_v51, %v5546_v52  ;;  %v6447_v28 = vld [vmem:[%s7509_s17 + $0x4ec] sm:$0xf]  ;;  %v5866_v48 = vld [vmem:[%s7509_s17 + $0x4d8] sm:$0xf0] }
 0x432   : > { %4750 = vmatpush.bf16.msra.mxu0 %v5357_v63  ;;  %v5274_v63 = vld [vmem:[%s7509_s17 + $0x38] sm:$0xf0]  ;;  %v6511_v32 = vld [vmem:[%s7509_s17 + $0x6ec] sm:$0xf]  ;;  %v5885_v41 = vor.u32 %v6447_v28, %v5882_v25 }
 0x433   : > { %4764 = vmatpush.bf16.msra.mxu1 %v5485_v0  ;;  %v6327_v0 = vld [vmem:[%s7509_s17 + $0x12c] sm:$0xf]  ;;  %v5277_v13 = vor.u32 %v6295_v62, %v5274_v63  ;;  %v5994_v53 = vld [vmem:[%s7509_s17 + $0x5d8] sm:$0xf0] }
 0x434   : > { %4778 = vmatpush.bf16.msra.mxu2 %v5613_v1  ;;  %v5677_v1 = vor.u32 %v6395_v55, %v5674_v56  ;;  %v6543_v36 = vld [vmem:[%s7509_s17 + $0x7ec] sm:$0xf]  ;;  %v6122_v52 = vld [vmem:[%s7509_s17 + $0x6d8] sm:$0xf0] }
 0x435   : > { %4792 = vmatpush.bf16.msra.mxu3 %v5741_v8  ;;  %v9081_v8 = vpop.f32.mrf.mxu0  ;;  %v6443_v47 = vld [vmem:[%s7509_s17 + $0x4cc] sm:$0xf]  ;;  %v5834_v18 = vld [vmem:[%s7509_s17 + $0x498] sm:$0xf0] }
 0x436   : > { %4751 = vmatpush.bf16.msra.mxu0 %v5341_v15  ;;  %v5258_v15 = vld [vmem:[%s7509_s17 + $0x18] sm:$0xf0]  ;;  %v6475_v49 = vld [vmem:[%s7509_s17 + $0x5cc] sm:$0xf]  ;;  %v4439_v25 = vadd.f32 %v9085_v12, %v9081_v8 }
 0x437   : > { %4765 = vmatpush.bf16.msra.mxu1 %v5469_v16  ;;  %v5405_v16 = vor.u32 %v6327_v0, %v5402_v3  ;;  %v6507_v51 = vld [vmem:[%s7509_s17 + $0x6cc] sm:$0xf]  ;;  %v5997_v62 = vor.u32 %v6475_v49, %v5994_v53  ;;  %v6218_v28 = vld [vmem:[%s7509_s17 + $0x798] sm:$0xf0] }
 0x438   : > { %4779 = vmatpush.bf16.msra.mxu2 %v5597_v17  ;;  %v5533_v17 = vor.u32 %v6359_v4, %v5530_v5  ;;  %v6539_v56 = vld [vmem:[%s7509_s17 + $0x7cc] sm:$0xf]  ;;  %v6125_v63 = vor.u32 %v6507_v51, %v6122_v52  ;;  %v5978_v5 = vld [vmem:[%s7509_s17 + $0x5b8] sm:$0xf0] }
 0x439   : > { %4793 = vmatpush.bf16.msra.mxu3 %v5725_v22  ;;  %v5661_v22 = vor.u32 %v6391_v9, %v5658_v11  ;;  %v9103_v45 = vpop.f32.mrf.mxu2  ;;  %v6439_v0 = vld [vmem:[%s7509_s17 + $0x4ac] sm:$0xf]  ;;  %v6106_v11 = vld [vmem:[%s7509_s17 + $0x6b8] sm:$0xf0] }
 0x43a   : > { %4752 = vmatpush.bf16.msra.mxu0 %v5325_v27  ;;  %v6479_v27 = vld [vmem:[%s7509_s17 + $0x5ec] sm:$0xf]  ;;  %v5946_v8 = vld [vmem:[%s7509_s17 + $0x578] sm:$0xf0] }
 0x43b   : > { %4766 = vmatpush.bf16.msra.mxu1 %v5453_v30  ;;  %v5261_v30 = vor.u32 %v6291_v14, %v5258_v15  ;;  %v6471_v3 = vld [vmem:[%s7509_s17 + $0x5ac] sm:$0xf]  ;;  %v6234_v14 = vld [vmem:[%s7509_s17 + $0x7b8] sm:$0xf0] }
 0x43c   : > { %4780 = vmatpush.bf16.msra.mxu2 %v5581_v31  ;;  %v6010_v31 = vld [vmem:[%s7509_s17 + $0x5f8] sm:$0xf0]  ;;  %v6503_v9 = vld [vmem:[%s7509_s17 + $0x6ac] sm:$0xf] }
 0x43d   : > { %4794 = vmatpush.bf16.msra.mxu3 %v5709_v54  ;;  %v5517_v54 = vor.u32 %v6355_v20, %v5514_v23  ;;  %v9113_v55 = vpop.f32.mrf.mxu0  ;;  %v6090_v23 = vld [vmem:[%s7509_s17 + $0x698] sm:$0xf0]  ;;  %v6531_v24 = vld [vmem:[%s7509_s17 + $0x78c] sm:$0xf] }
 0x43e   : > { %4753 = vmatpush.bf16.msra.mxu0 %v5309_v43  ;;  %v9105_v43 = vpop.f32.mrf.mxu3  ;;  %v6495_v12 = vld [vmem:[%s7509_s17 + $0x66c] sm:$0xf] }
 0x43f   : > { %4767 = vmatpush.bf16.msra.mxu1 %v5437_v44  ;;  %v6013_v44 = vor.u32 %v6479_v27, %v6010_v31  ;;  %v6427_v49 = vld [vmem:[%s7509_s17 + $0x44c] sm:$0xf] }
 0x440   : > { %4781 = vmatpush.bf16.msra.mxu2 %v5565_v46  ;;  %v6141_v46 = vor.u32 %v6511_v32, %v6138_v37  ;;  %v6463_v37 = vld [vmem:[%s7509_s17 + $0x56c] sm:$0xf] }
 0x441   : > { %4795 = vmatpush.bf16.msra.mxu3 %v5693_v50  ;;  %v6269_v50 = vor.u32 %v6543_v36, %v6266_v39  ;;  %v9134_v19 = vpop.f32.mrf.mxu2  ;;  %v6074_v36 = vld [vmem:[%s7509_s17 + $0x678] sm:$0xf0]  ;;  %v6459_v53 = vld [vmem:[%s7509_s17 + $0x54c] sm:$0xf] }
 0x442   : > { %4754 = vmatpush.bf16.msra.mxu0 %v5293_v58  ;;  %v6250_v58 = vld [vmem:[%s7509_s17 + $0x7d8] sm:$0xf0]  ;;  %v6491_v52 = vld [vmem:[%s7509_s17 + $0x64c] sm:$0xf] }
 0x443   : > { %4768 = vmatpush.bf16.msra.mxu1 %v5421_v60  ;;  %v9117_v60 = vpop.f32.mrf.mxu1  ;;  %v6253_v4 = vor.u32 %v6539_v56, %v6250_v58  ;;  %v6058_v56 = vld [vmem:[%s7509_s17 + $0x658] sm:$0xf0]  ;;  %v6523_v58 = vld [vmem:[%s7509_s17 + $0x74c] sm:$0xf] }
 0x444   : > { %4782 = vmatpush.bf16.msra.mxu2 %v5549_v61  ;;  %v5869_v61 = vor.u32 %v6443_v47, %v5866_v48  ;;  %v5949_v47 = vor.u32 %v6463_v37, %v5946_v8  ;;  %v6077_v48 = vor.u32 %v6495_v12, %v6074_v36 }
 0x445   : > { %4796 = vmatpush.bf16.msra.mxu3 %v5677_v1  ;;  %v5850_v1 = vld [vmem:[%s7509_s17 + $0x4b8] sm:$0xf0] }
 0x446   : > { %4755 = vmatpush.bf16.msra.mxu0 %v5277_v13  ;;  %v6535_v13 = vld [vmem:[%s7509_s17 + $0x7ac] sm:$0xf]  ;;  %v5853_v15 = vor.u32 %v6439_v0, %v5850_v1  ;;  %v9141_v38 = vpop.f32.mrf.mxu3 }
 0x447   : > { %4769 = vmatpush.bf16.msra.mxu1 %v5405_v16  ;;  %v6109_v16 = vor.u32 %v6503_v9, %v6106_v11  ;;  %v6237_v20 = vor.u32 %v6535_v13, %v6234_v14  ;;  %v6423_v9 = vld [vmem:[%s7509_s17 + $0x42c] sm:$0xf]  ;;  %v5914_v14 = vld [vmem:[%s7509_s17 + $0x538] sm:$0xf0] }
 0x448   : > { %4783 = vmatpush.bf16.msra.mxu2 %v5533_v17  ;;  %v6435_v17 = vld [vmem:[%s7509_s17 + $0x48c] sm:$0xf] }
 0x449   : > { %4797 = vmatpush.bf16.msra.mxu3 %v5661_v22  ;;  %v6499_v22 = vld [vmem:[%s7509_s17 + $0x68c] sm:$0xf]  ;;  %v5837_v27 = vor.u32 %v6435_v17, %v5834_v18 }
 0x44a   : > { %4756 = vmatpush.bf16.msra.mxu0 %v5261_v30  ;;  %v4480_v30 = vpop.f32.mrf.mxu0  ;;  %v6093_v32 = vor.u32 %v6499_v22, %v6090_v23  ;;  %v6455_v11 = vld [vmem:[%s7509_s17 + $0x52c] sm:$0xf] }
 0x44b   : > { %4770 = vmatpush.bf16.msra.mxu1 %v5389_v33  ;;  %v4494_v33 = vpop.f32.mrf.mxu1  ;;  %v6519_v18 = vld [vmem:[%s7509_s17 + $0x72c] sm:$0xf] }
 0x44c   : > { %4784 = vmatpush.bf16.msra.mxu2 %v5517_v54  ;;  %v6221_v54 = vor.u32 %v6531_v24, %v6218_v28  ;;  %v6419_v23 = vld [vmem:[%s7509_s17 + $0x40c] sm:$0xf] }
 0x44d   : > { %4798 = vmatpush.bf16.msra.mxu3 %v5645_v40  ;;  %4757 = vmatmul.bf16.vlgmr.msra.gmra.mxu0 %v8677_v21  ;;  %v5962_v21 = vld [vmem:[%s7509_s17 + $0x598] sm:$0xf0]  ;;  %v6527_v40 = vld [vmem:[%s7509_s17 + $0x76c] sm:$0xf] }
 0x44e   : > { %4805 = vmatpush.bf16.msrb.mxu0 %v5885_v41  ;;  %4771 = vmatmul.bf16.vlgmr.msra.gmra.mxu1 %v8689_v35  ;;  %v4437_v35 = vadd.f32 %v9056_v34, %v9051_v29  ;;  %v6431_v29 = vld [vmem:[%s7509_s17 + $0x46c] sm:$0xf]  ;;  %v5818_v34 = vld [vmem:[%s7509_s17 + $0x478] sm:$0xf0]  ;;  %v4522_v1 = vpop.f32.mrf.mxu3 }
 0x44f   : > { %4819 = vmatpush.bf16.msrb.mxu1 %v6013_v44  ;;  %4785 = vmatmul.bf16.vlgmr.msra.gmra.mxu2 %v8682_v26  ;;  %v5981_v26 = vor.u32 %v6471_v3, %v5978_v5  ;;  %v6202_v41 = vld [vmem:[%s7509_s17 + $0x778] sm:$0xf0]  ;;  %v4453_v44 = vadd.f32 %v9103_v45, %v4439_v25  ;;  %v6451_v24 = vld [vmem:[%s7509_s17 + $0x50c] sm:$0xf] }
 0x450   : > { %4833 = vmatpush.bf16.msrb.mxu2 %v6141_v46  ;;  %4799 = vmatmul.bf16.vlgmr.msra.gmra.mxu3 %v8694_v42  ;;  %v6467_v42 = vld [vmem:[%s7509_s17 + $0x58c] sm:$0xf]  ;;  %v4451_v39 = vadd.f32 %v9071_v57, %v4437_v35  ;;  %v5821_v46 = vor.u32 %v6431_v29, %v5818_v34  ;;  %v6205_v51 = vor.u32 %v6527_v40, %v6202_v41  ;;  %v5930_v57 = vld [vmem:[%s7509_s17 + $0x558] sm:$0xf0] }
 0x451   : > { %4847 = vmatpush.bf16.msrb.mxu3 %v6269_v50  ;;  %v5965_v31 = vor.u32 %v6467_v42, %v5962_v21  ;;  %v5802_v50 = vld [vmem:[%s7509_s17 + $0x458] sm:$0xf0]  ;;  %v5933_v3 = vor.u32 %v6459_v53, %v5930_v57  ;;  %v5917_v21 = vor.u32 %v6455_v11, %v5914_v14 }
 0x452   : > { %4806 = vmatpush.bf16.msrb.mxu0 %v5869_v61  ;;  %v4465_v45 = vadd.f32 %v9073_v59, %v4451_v39  ;;  %v6186_v61 = vld [vmem:[%s7509_s17 + $0x758] sm:$0xf0]  ;;  %v5805_v0 = vor.u32 %v6427_v49, %v5802_v50  ;;  %v4534_v5 = vpop.f32.mrf.mxu0 }
 0x453   : > { %4820 = vmatpush.bf16.msrb.mxu1 %v5997_v62  ;;  %v4467_v62 = vadd.f32 %v9105_v43, %v4453_v44  ;;  %v5786_v59 = vld [vmem:[%s7509_s17 + $0x438] sm:$0xf0]  ;;  %v6189_v43 = vor.u32 %v6523_v58, %v6186_v61 }
 0x454   : > { %4834 = vmatpush.bf16.msrb.mxu2 %v6125_v63  ;;  %v4508_v63 = vpop.f32.mrf.mxu2  ;;  %v4479_v17 = vadd.f32 %v9113_v55, %v4465_v45  ;;  %v6170_v42 = vld [vmem:[%s7509_s17 + $0x738] sm:$0xf0]  ;;  %v6483_v55 = vld [vmem:[%s7509_s17 + $0x60c] sm:$0xf] }
 0x455   : > { %4848 = vmatpush.bf16.msrb.mxu3 %v6253_v4  ;;  %v6061_v4 = vor.u32 %v6491_v52, %v6058_v56  ;;  %v4481_v13 = vadd.f32 %v4480_v30, %v4467_v62  ;;  %v5770_v35 = vld [vmem:[%s7509_s17 + $0x418] sm:$0xf0]  ;;  %v6173_v25 = vor.u32 %v6519_v18, %v6170_v42 }
 0x456   : > { %4807 = vmatpush.bf16.msrb.mxu0 %v5853_v15  ;;  %v6487_v15 = vld [vmem:[%s7509_s17 + $0x62c] sm:$0xf]  ;;  %v6026_v30 = vld [vmem:[%s7509_s17 + $0x618] sm:$0xf0]  ;;  %v5773_v37 = vor.u32 %v6419_v23, %v5770_v35  ;;  %v4576_v36 = vpop.f32.mrf.mxu3 }
 0x457   : > { %4821 = vmatpush.bf16.msrb.mxu1 %v5981_v26  ;;  %v6042_v26 = vld [vmem:[%s7509_s17 + $0x638] sm:$0xf0]  ;;  %v4495_v28 = vadd.f32 %v4494_v33, %v4481_v13  ;;  %v6029_v12 = vor.u32 %v6483_v55, %v6026_v30 }
 0x458   : > { %4835 = vmatpush.bf16.msrb.mxu2 %v6109_v16  ;;  %v4548_v16 = vpop.f32.mrf.mxu1  ;;  %v6045_v22 = vor.u32 %v6487_v15, %v6042_v26  ;;  %v6154_v29 = vld [vmem:[%s7509_s17 + $0x718] sm:$0xf0] }
 0x459   : > { %4849 = vmatpush.bf16.msrb.mxu3 %v6237_v20  ;;  %v5789_v20 = vor.u32 %v6423_v9, %v5786_v59  ;;  %v4509_v34 = vadd.f32 %v4508_v63, %v4495_v28 }
 0x45a   : > { %4808 = vmatpush.bf16.msrb.mxu0 %v5837_v27  ;;  %v5898_v27 = vld [vmem:[%s7509_s17 + $0x518] sm:$0xf0]  ;;  %v4536_v40 = vpop.f32.mrf.mxu0 }
 0x45b   : > { %4822 = vmatpush.bf16.msrb.mxu1 %v5965_v31  ;;  %v4493_v31 = vadd.f32 %v9117_v60, %v4479_v17  ;;  %v5901_v8 = vor.u32 %v6451_v24, %v5898_v27  ;;  %v4523_v41 = vadd.f32 %v4522_v1, %v4509_v34 }
 0x45c   : > { %4836 = vmatpush.bf16.msrb.mxu2 %v6093_v32  ;;  %v6515_v32 = vld [vmem:[%s7509_s17 + $0x70c] sm:$0xf] }
 0x45d   : > { %4850 = vmatpush.bf16.msrb.mxu3 %v6221_v54  ;;  %v4562_v54 = vpop.f32.mrf.mxu2  ;;  %v6157_v33 = vor.u32 %v6515_v32, %v6154_v29  ;;  %v4507_v39 = vadd.f32 %v9134_v19, %v4493_v31 }
 0x45e   : > { %4809 = vmatpush.bf16.msrb.mxu0 %v5821_v46  ;;  %v4549_v46 = vadd.f32 %v4548_v16, %v4534_v5 }
 0x45f   : > { %4823 = vmatpush.bf16.msrb.mxu1 %v5949_v47  ;;  %v4521_v60 = vadd.f32 %v9141_v38, %v4507_v39  ;;  %v4578_v47 = vpop.f32.mrf.mxu3 }
 0x460   : > { %4837 = vmatpush.bf16.msrb.mxu2 %v6077_v48  ;;  %v4550_v44 = vpop.f32.mrf.mxu1  ;;  %v4563_v48 = vadd.f32 %v4562_v54, %v4549_v46  ;;  %v4861_v54 = vld [vmem:[#allocation2] sm:$0xff] }
 0x461   : > { %4851 = vmatpush.bf16.msrb.mxu3 %v6205_v51  ;;  %v4551_v49 = vadd.f32 %v4550_v44, %v4536_v40 }
 0x462   : > { %4810 = vmatpush.bf16.msrb.mxu0 %v5805_v0  ;;  %v4577_v51 = vadd.f32 %v4576_v36, %v4563_v48  ;;  %v4862_v36 = vld [vmem:[#allocation2 + $0x8] sm:$0xff] }
 0x463   : > { %4824 = vmatpush.bf16.msrb.mxu1 %v5933_v3 }
 0x464   : > { %4838 = vmatpush.bf16.msrb.mxu2 %v6061_v4 }
 0x465   : > { %4852 = vmatpush.bf16.msrb.mxu3 %v6189_v43  ;;  %v4564_v19 = vpop.f32.mrf.mxu2 }
 0x466   : > { %4811 = vmatpush.bf16.msrb.mxu0 %v5789_v20  ;;  %v4565_v57 = vadd.f32 %v4564_v19, %v4551_v49 }
 0x467   : > { %4825 = vmatpush.bf16.msrb.mxu1 %v5917_v21 }
 0x468   : > { %4839 = vmatpush.bf16.msrb.mxu2 %v6045_v22  ;;  %v4579_v38 = vadd.f32 %v4578_v47, %v4565_v57 }
 0x469   : > { %4853 = vmatpush.bf16.msrb.mxu3 %v6173_v25 }
 0x46a   : > { %4812 = vmatpush.bf16.msrb.mxu0 %v5773_v37  ;;  %v4590_v50 = vpop.f32.mrf.mxu0 }
 0x46b   : > { %4826 = vmatpush.bf16.msrb.mxu1 %v5901_v8  ;;  %v4604_v53 = vpop.f32.mrf.mxu1  ;;  %v4591_v56 = vadd.f32 %v4590_v50, %v4577_v51 }
 0x46c   : > { %4840 = vmatpush.bf16.msrb.mxu2 %v6029_v12 }
 0x46d   : > { %4854 = vmatpush.bf16.msrb.mxu3 %v6157_v33  ;;  %4813 = vmatmul.bf16.vlgmr.msrb.gmra.mxu0 %v8746_v2 }
 0x46e   : > { %4884 = vmatpush.msra.mxu0 %v4523_v41  ;;  %4827 = vmatmul.bf16.vlgmr.msrb.gmra.mxu1 %v8753_v7 }
 0x46f   : > { %4841 = vmatmul.bf16.vlgmr.msrb.gmra.mxu2 %v8751_v6  ;;  %v4605_v6 = vadd.f32 %v4604_v53, %v4591_v56 }
 0x470   : > { %4855 = vmatmul.bf16.vlgmr.msrb.gmra.mxu3 %v8757_v10  ;;  %4885 = vmatpush.msra.mxu0 %v4521_v60 }
 0x472   : > { %v4618_v52 = vpop.f32.mrf.mxu2  ;;  %v4592_v2 = vpop.f32.mrf.mxu0 }
 0x473   : > { %v4632_v45 = vpop.f32.mrf.mxu3  ;;  %v4593_v7 = vadd.f32 %v4592_v2, %v4579_v38  ;;  %v4606_v58 = vpop.f32.mrf.mxu1  ;;  %v4619_v10 = vadd.f32 %v4618_v52, %v4605_v6 }
 0x475   : > { %v4607_v61 = vadd.f32 %v4606_v58, %v4593_v7  ;;  %v4633_v3 = vadd.f32 %v4632_v45, %v4619_v10 }
 0x47a   : > { %v4620_v62 = vpop.f32.mrf.mxu2 }
 0x47b   : > { %v4621_v63 = vadd.f32 %v4620_v62, %v4607_v61  ;;  %v4634_v0 = vpop.f32.mrf.mxu3 }
 0x47d   : > { %v4635_v1 = vadd.f32 %v4634_v0, %v4621_v63  ;;  %6270 = vmatmul.msk.f32.vlgmr.msra.gmra.mxu0 %vm4863_vm11, %v4861_v54 }
 0x47f   : > { %4907 = vmatpush.msra.mxu1 %v4635_v1  ;;  %v2265_v1 = vld [vmem:[%s7507_s16 + $0x8] sm:$0xff] }
 0x481   : > { %4908 = vmatpush.msra.mxu1 %v4633_v3  ;;  %v2267_v3 = vld [vmem:[%s7507_s16 + $0x18] sm:$0xff] }
 0x482   : > { %6272 = vmatmul.msk.f32.vlgmr.msra.gmra.mxu1 %vm4863_vm11, %v4861_v54 }
 0x485   : > { %6271 = vmatmul.msk.f32.gmra.mxu0 %vm4863_vm11, %v4862_v36 }
 0x48a   : > { %v4646_v4 = vpop.f32.mrf.mxu0  ;;  %6273 = vmatmul.msk.f32.gmra.mxu1 %vm4863_vm11, %v4862_v36 }
 0x48b   : > { %v4660_v5 = vpop.f32.mrf.mxu1 }
 0x48c   : > { %v4661_v43 = vadd.f32 %v4660_v5, %v4646_v4  ;;  %v2315_v4 = vld [vmem:[%s7507_s16 + $0x198] sm:$0xff]  ;;  %v2317_v5 = vld [vmem:[%s7507_s16 + $0x1a8] sm:$0xff] }
 0x492   : > { %v4674_v9 = vpop.f32.mrf.mxu2  ;;  %v4648_v11 = vpop.f32.mrf.mxu0 }
 0x493   : > { %v4688_v59 = vpop.f32.mrf.mxu3  ;;  %v4662_v13 = vpop.f32.mrf.mxu1  ;;  %v4675_v26 = vadd.f32 %v4674_v9, %v4661_v43  ;;  %v2366_v9 = vunpack.c.l.bf16 %v2265_v1  ;;  %v2319_v43 = vld [vmem:[%s7507_s16 + $0x1b8] sm:$0xff] }
 0x494   : > { %v4663_v16 = vadd.f32 %v4662_v13, %v4648_v11  ;;  %v2466_v11 = vunpack.c.l.bf16 %v2315_v4  ;;  %v2269_v13 = vld [vmem:[%s7507_s16 + $0x28] sm:$0xff] }
 0x495   : > { %v4689_v42 = vadd.f32 %v4688_v59, %v4675_v26  ;;  %v2370_v59 = vunpack.c.l.bf16 %v2267_v3  ;;  %v2474_v26 = vunpack.c.l.bf16 %v2319_v43 }
 0x49a   : > { %v4676_v14 = vpop.f32.mrf.mxu2 }
 0x49b   : > { %v4690_v15 = vpop.f32.mrf.mxu3  ;;  %v4677_v20 = vadd.f32 %v4676_v14, %v4663_v16  ;;  %v2470_v14 = vunpack.c.l.bf16 %v2317_v5  ;;  %v2627_v16 = vmax.f32 %v2366_v9, %v2370_v59 }
 0x49d   : > { %v4691_v22 = vadd.f32 %v4690_v15, %v4677_v20  ;;  %v2374_v15 = vunpack.c.l.bf16 %v2269_v13  ;;  %v2751_v20 = vmax.f32 %v2466_v11, %v2470_v14 }
 0x4aa   : > { %v4702_v17 = vpop.f32.mrf.mxu0 }
 0x4ab   : > { %v4716_v18 = vpop.f32.mrf.mxu1  ;;  %v4703_v23 = vadd.f32 %v4702_v17, %v4689_v42  ;;  %v2367_v17 = vunpack.c.h.bf16 %v2265_v1  ;;  %v2321_v42 = vld [vmem:[%s7507_s16 + $0x1c8] sm:$0xff] }
 0x4ac   : > { %v2281_v1 = vld [vmem:[%s7507_s16 + $0x88] sm:$0xff] }
 0x4ad   : > { %v4717_v27 = vadd.f32 %v4716_v18, %v4703_v23  ;;  %v2271_v18 = vld [vmem:[%s7507_s16 + $0x38] sm:$0xff]  ;;  %v2471_v23 = vunpack.c.h.bf16 %v2317_v5  ;;  %v2398_v11 = vunpack.c.l.bf16 %v2281_v1 }
 0x4b2   : > { %v4730_v21 = vpop.f32.mrf.mxu2  ;;  %v4704_v35 = vpop.f32.mrf.mxu0 }
 0x4b3   : > { %v4744_v24 = vpop.f32.mrf.mxu3  ;;  %v4705_v28 = vadd.f32 %v4704_v35, %v4691_v22  ;;  %v4718_v25 = vpop.f32.mrf.mxu1  ;;  %v4731_v31 = vadd.f32 %v4730_v21, %v4717_v27  ;;  %v2371_v21 = vunpack.c.h.bf16 %v2267_v3  ;;  %v2467_v22 = vunpack.c.h.bf16 %v2315_v4  ;;  %v2273_v27 = vld [vmem:[%s7507_s16 + $0x48] sm:$0xff]  ;;  %v2331_v3 = vld [vmem:[%s7507_s16 + $0x218] sm:$0xff] }
 0x4b4   : > { %v2378_v35 = vunpack.c.l.bf16 %v2271_v18 }
 0x4b5   : > { %v4719_v55 = vadd.f32 %v4718_v25, %v4705_v28  ;;  %v4745_v37 = vadd.f32 %v4744_v24, %v4731_v31  ;;  %v2478_v24 = vunpack.c.l.bf16 %v2321_v42  ;;  %v2628_v28 = vmax.f32 %v2627_v16, %v2374_v15  ;;  %v2283_v15 = vld [vmem:[%s7507_s16 + $0x98] sm:$0xff] }
 0x4b6   : > { %v2375_v25 = vunpack.c.h.bf16 %v2269_v13  ;;  %v2475_v31 = vunpack.c.h.bf16 %v2319_v43  ;;  %v2498_v13 = vunpack.c.l.bf16 %v2331_v3 }
 0x4ba   : > { %v4732_v30 = vpop.f32.mrf.mxu2 }
 0x4bb   : > { %v4733_v32 = vadd.f32 %v4732_v30, %v4719_v55  ;;  %v4746_v29 = vpop.f32.mrf.mxu3  ;;  %v2323_v55 = vld [vmem:[%s7507_s16 + $0x1d8] sm:$0xff]  ;;  %v2752_v30 = vmax.f32 %v2751_v20, %v2474_v26  ;;  %v2333_v26 = vld [vmem:[%s7507_s16 + $0x228] sm:$0xff]  ;;  %v2402_v20 = vunpack.c.l.bf16 %v2283_v15 }
 0x4bd   : > { %v4747_v34 = vadd.f32 %v4746_v29, %v4733_v32  ;;  %v2658_v32 = vmax.f32 %v2367_v17, %v2371_v21  ;;  %v2782_v29 = vmax.f32 %v2467_v22, %v2471_v23  ;;  %v2502_v21 = vunpack.c.l.bf16 %v2333_v26 }
 0x4be   : > { %v2399_v23 = vunpack.c.h.bf16 %v2281_v1 }
 0x4bf   : > { %4930 = vmatpush.msra.mxu2 %v4747_v34  ;;  %v2382_v34 = vunpack.c.l.bf16 %v2273_v27 }
 0x4c1   : > { %4931 = vmatpush.msra.mxu2 %v4745_v37  ;;  %v2482_v37 = vunpack.c.l.bf16 %v2323_v55 }
 0x4c2   : > { %6274 = vmatmul.msk.f32.vlgmr.msra.gmra.mxu2 %vm4863_vm11, %v4861_v54 }
 0x4ca   : > { %v4758_v8 = vpop.f32.mrf.mxu0  ;;  %6275 = vmatmul.msk.f32.gmra.mxu2 %vm4863_vm11, %v4862_v36 }
 0x4cb   : > { %v4772_v12 = vpop.f32.mrf.mxu1 }
 0x4cc   : > { %v4773_v60 = vadd.f32 %v4772_v12, %v4758_v8  ;;  %v2379_v8 = vunpack.c.h.bf16 %v2271_v18  ;;  %v2275_v12 = vld [vmem:[%s7507_s16 + $0x58] sm:$0xff] }
 0x4d2   : > { %v4786_v33 = vpop.f32.mrf.mxu2  ;;  %v4760_v40 = vpop.f32.mrf.mxu0 }
 0x4d3   : > { %v4800_v39 = vpop.f32.mrf.mxu3  ;;  %v4774_v41 = vpop.f32.mrf.mxu1  ;;  %v4787_v49 = vadd.f32 %v4786_v33, %v4773_v60  ;;  %v2753_v33 = vmax.f32 %v2752_v30, %v2478_v24  ;;  %v2335_v24 = vld [vmem:[%s7507_s16 + $0x238] sm:$0xff] }
 0x4d4   : > { %v4775_v46 = vadd.f32 %v4774_v41, %v4760_v40  ;;  %v2659_v40 = vmax.f32 %v2658_v32, %v2375_v25  ;;  %v2783_v41 = vmax.f32 %v2782_v29, %v2475_v31  ;;  %v2499_v25 = vunpack.c.h.bf16 %v2331_v3 }
 0x4d5   : > { %v4801_v51 = vadd.f32 %v4800_v39, %v4787_v49  ;;  %v2479_v39 = vunpack.c.h.bf16 %v2321_v42  ;;  %v2754_v49 = vmax.f32 %v2753_v33, %v2482_v37  ;;  %v2506_v31 = vunpack.c.l.bf16 %v2335_v24  ;;  %v2337_v37 = vld [vmem:[%s7507_s16 + $0x248] sm:$0xff] }
 0x4d6   : > { %v2403_v29 = vunpack.c.h.bf16 %v2283_v15 }
 0x4da   : > { %v4788_v44 = vpop.f32.mrf.mxu2 }
 0x4db   : > { %v4802_v19 = vpop.f32.mrf.mxu3  ;;  %v4789_v50 = vadd.f32 %v4788_v44, %v4775_v46  ;;  %v2386_v44 = vunpack.c.l.bf16 %v2275_v12 }
 0x4dd   : > { %v4803_v57 = vadd.f32 %v4802_v19, %v4789_v50  ;;  %v2383_v19 = vunpack.c.h.bf16 %v2273_v27  ;;  %v2483_v50 = vunpack.c.h.bf16 %v2323_v55 }
 0x4ea   : > { %v4814_v47 = vpop.f32.mrf.mxu0 }
 0x4eb   : > { %v4828_v48 = vpop.f32.mrf.mxu1  ;;  %v4815_v56 = vadd.f32 %v4814_v47, %v4801_v51  ;;  %v2277_v47 = vld [vmem:[%s7507_s16 + $0x68] sm:$0xff]  ;;  %v2784_v51 = vmax.f32 %v2783_v41, %v2479_v39  ;;  %v2510_v39 = vunpack.c.l.bf16 %v2337_v37 }
 0x4ed   : > { %v4829_v7 = vadd.f32 %v4828_v48, %v4815_v56  ;;  %v2327_v48 = vld [vmem:[%s7507_s16 + $0x1f8] sm:$0xff]  ;;  %v2387_v56 = vunpack.c.h.bf16 %v2275_v12 }
 0x4ee   : > { %v2491_v5 = vunpack.c.h.bf16 %v2327_v48 }
 0x4f2   : > { %v4842_v53 = vpop.f32.mrf.mxu2  ;;  %v4816_v38 = vpop.f32.mrf.mxu0 }
 0x4f3   : > { %v4856_v52 = vpop.f32.mrf.mxu3  ;;  %v4817_v2 = vadd.f32 %v4816_v38, %v4803_v57  ;;  %v4830_v45 = vpop.f32.mrf.mxu1  ;;  %v4843_v61 = vadd.f32 %v4842_v53, %v4829_v7  ;;  %v2660_v53 = vmax.f32 %v2659_v40, %v2379_v8  ;;  %v2390_v57 = vunpack.c.l.bf16 %v2277_v47 }
 0x4f4   : > { %v2503_v8 = vunpack.c.h.bf16 %v2333_v26 }
 0x4f5   : > { %v4831_v58 = vadd.f32 %v4830_v45, %v4817_v2  ;;  %v4857_v0 = vadd.f32 %v4856_v52, %v4843_v61  ;;  %v2490_v52 = vunpack.c.l.bf16 %v2327_v48  ;;  %v2279_v2 = vld [vmem:[%s7507_s16 + $0x78] sm:$0xff]  ;;  %v2329_v45 = vld [vmem:[%s7507_s16 + $0x208] sm:$0xff]  ;;  %v2785_v61 = vmax.f32 %v2784_v51, %v2483_v50 }
 0x4f6   : > { %v2395_v14 = vunpack.c.h.bf16 %v2279_v2  ;;  %v2495_v17 = vunpack.c.h.bf16 %v2329_v45 }
 0x4fa   : > { %v4844_v6 = vpop.f32.mrf.mxu2 }
 0x4fb   : > { %v4845_v62 = vadd.f32 %v4844_v6, %v4831_v58  ;;  %v4858_v10 = vpop.f32.mrf.mxu3  ;;  %v2661_v6 = vmax.f32 %v2660_v53, %v2383_v19  ;;  %v2507_v19 = vunpack.c.h.bf16 %v2335_v24 }
 0x4fd   : > { %v4859_v63 = vadd.f32 %v4858_v10, %v4845_v62  ;;  %v2394_v62 = vunpack.c.l.bf16 %v2279_v2  ;;  %v2494_v10 = vunpack.c.l.bf16 %v2329_v45  ;;  %v2662_v9 = vmax.f32 %v2661_v6, %v2387_v56 }
 0x4fe   : > { %v2511_v56 = vunpack.c.h.bf16 %v2337_v37 }
 0x4ff   : > { %4953 = vmatpush.msra.mxu3 %v4859_v63 }
 0x501   : > { %4954 = vmatpush.msra.mxu3 %v4857_v0  ;;  %v2391_v0 = vunpack.c.h.bf16 %v2277_v47 }
 0x502   : > { %6276 = vmatmul.msk.f32.vlgmr.msra.gmra.mxu3 %vm4863_vm11, %v4861_v54  ;;  %v2629_v54 = vmax.f32 %v2628_v28, %v2378_v35  ;;  %v2285_v35 = vld [vmem:[%s7507_s16 + $0xa8] sm:$0xff] }
 0x503   : > { %v2663_v18 = vmax.f32 %v2662_v9, %v2391_v0  ;;  %v2406_v30 = vunpack.c.l.bf16 %v2285_v35  ;;  %v2407_v41 = vunpack.c.h.bf16 %v2285_v35 }
 0x504   : > { %v2630_v46 = vmax.f32 %v2629_v54, %v2382_v34  ;;  %v2287_v34 = vld [vmem:[%s7507_s16 + $0xb8] sm:$0xff] }
 0x505   : > { %v2664_v27 = vmax.f32 %v2663_v18, %v2395_v14  ;;  %v2410_v33 = vunpack.c.l.bf16 %v2287_v34  ;;  %v2411_v51 = vunpack.c.h.bf16 %v2287_v34 }
 0x506   : > { %v2631_v38 = vmax.f32 %v2630_v46, %v2386_v44  ;;  %v2289_v44 = vld [vmem:[%s7507_s16 + $0xc8] sm:$0xff] }
 0x507   : > { %v2665_v12 = vmax.f32 %v2664_v27, %v2399_v23 }
 0x508   : > { %v2632_v63 = vmax.f32 %v2631_v38, %v2390_v57  ;;  %v2291_v57 = vld [vmem:[%s7507_s16 + $0xd8] sm:$0xff] }
 0x509   : > { %v2666_v47 = vmax.f32 %v2665_v12, %v2403_v29 }
 0x50a   : > { %6277 = vmatmul.msk.f32.gmra.mxu3 %vm4863_vm11, %v4862_v36  ;;  %v2325_v36 = vld [vmem:[%s7507_s16 + $0x1e8] sm:$0xff]  ;;  %v2633_v43 = vmax.f32 %v2632_v63, %v2394_v62 }
 0x50b   : > { %v2486_v60 = vunpack.c.l.bf16 %v2325_v36  ;;  %v2487_v58 = vunpack.c.h.bf16 %v2325_v36  ;;  %v2667_v2 = vmax.f32 %v2666_v47, %v2407_v41  ;;  %v2293_v62 = vld [vmem:[%s7507_s16 + $0xe8] sm:$0xff] }
 0x50c   : > { %v2634_v22 = vmax.f32 %v2633_v43, %v2398_v11  ;;  %v2295_v11 = vld [vmem:[%s7507_s16 + $0xf8] sm:$0xff] }
 0x50d   : > { %v2755_v7 = vmax.f32 %v2754_v49, %v2486_v60  ;;  %v2786_v59 = vmax.f32 %v2785_v61, %v2487_v58  ;;  %v2339_v60 = vld [vmem:[%s7507_s16 + $0x258] sm:$0xff]  ;;  %v2414_v49 = vunpack.c.l.bf16 %v2289_v44  ;;  %v2415_v61 = vunpack.c.h.bf16 %v2289_v44 }
 0x50e   : > { %v2635_v32 = vmax.f32 %v2634_v22, %v2402_v20  ;;  %v2514_v50 = vunpack.c.l.bf16 %v2339_v60  ;;  %v2515_v0 = vunpack.c.h.bf16 %v2339_v60  ;;  %v2668_v1 = vmax.f32 %v2667_v2, %v2411_v51  ;;  %v2297_v20 = vld [vmem:[%s7507_s16 + $0x108] sm:$0xff] }
 0x50f   : > { %v2756_v4 = vmax.f32 %v2755_v7, %v2490_v52  ;;  %v2787_v42 = vmax.f32 %v2786_v59, %v2491_v5  ;;  %v2341_v52 = vld [vmem:[%s7507_s16 + $0x268] sm:$0xff]  ;;  %v2418_v7 = vunpack.c.l.bf16 %v2291_v57  ;;  %v2419_v59 = vunpack.c.h.bf16 %v2291_v57 }
 0x510   : > { %v2636_v40 = vmax.f32 %v2635_v32, %v2406_v30  ;;  %v2518_v58 = vunpack.c.l.bf16 %v2341_v52  ;;  %v2519_v14 = vunpack.c.h.bf16 %v2341_v52  ;;  %v2669_v15 = vmax.f32 %v2668_v1, %v2415_v61  ;;  %v2299_v30 = vld [vmem:[%s7507_s16 + $0x118] sm:$0xff]  ;;  %v2305_v61 = vld [vmem:[%s7507_s16 + $0x148] sm:$0xff] }
 0x511   : > { %v2757_v16 = vmax.f32 %v2756_v4, %v2494_v10  ;;  %v2788_v55 = vmax.f32 %v2787_v42, %v2495_v17  ;;  %v2343_v10 = vld [vmem:[%s7507_s16 + $0x278] sm:$0xff]  ;;  %v2422_v4 = vunpack.c.l.bf16 %v2293_v62  ;;  %v2423_v42 = vunpack.c.h.bf16 %v2293_v62 }
 0x512   : > { %v2637_v53 = vmax.f32 %v2636_v40, %v2410_v33  ;;  %v2522_v5 = vunpack.c.l.bf16 %v2343_v10  ;;  %v2523_v23 = vunpack.c.h.bf16 %v2343_v10  ;;  %v2670_v35 = vmax.f32 %v2669_v15, %v2419_v59  ;;  %v2301_v33 = vld [vmem:[%s7507_s16 + $0x128] sm:$0xff]  ;;  %v2355_v62 = vld [vmem:[%s7507_s16 + $0x2d8] sm:$0xff] }
 0x513   : > { %v2758_v28 = vmax.f32 %v2757_v16, %v2498_v13  ;;  %v2789_v36 = vmax.f32 %v2788_v55, %v2499_v25  ;;  %v2345_v13 = vld [vmem:[%s7507_s16 + $0x288] sm:$0xff]  ;;  %v2426_v16 = vunpack.c.l.bf16 %v2295_v11  ;;  %v2427_v55 = vunpack.c.h.bf16 %v2295_v11  ;;  %v2307_v59 = vld [vmem:[%s7507_s16 + $0x158] sm:$0xff] }
 0x514   : > { %v2638_v6 = vmax.f32 %v2637_v53, %v2414_v49  ;;  %v2526_v17 = vunpack.c.l.bf16 %v2345_v13  ;;  %v2527_v29 = vunpack.c.h.bf16 %v2345_v13  ;;  %v2671_v34 = vmax.f32 %v2670_v35, %v2423_v42  ;;  %v2353_v53 = vld [vmem:[%s7507_s16 + $0x2c8] sm:$0xff]  ;;  %v2359_v42 = vld [vmem:[%s7507_s16 + $0x2f8] sm:$0xff] }
 0x515   : > { %v2759_v54 = vmax.f32 %v2758_v28, %v2502_v21  ;;  %v2790_v48 = vmax.f32 %v2789_v36, %v2503_v8  ;;  %v2347_v21 = vld [vmem:[%s7507_s16 + $0x298] sm:$0xff]  ;;  %v2430_v28 = vunpack.c.l.bf16 %v2297_v20  ;;  %v2431_v36 = vunpack.c.h.bf16 %v2297_v20  ;;  %v2357_v11 = vld [vmem:[%s7507_s16 + $0x2e8] sm:$0xff] }
 0x516   : > { %v2639_v9 = vmax.f32 %v2638_v6, %v2418_v7  ;;  %v2530_v25 = vunpack.c.l.bf16 %v2347_v21  ;;  %v2531_v41 = vunpack.c.h.bf16 %v2347_v21  ;;  %v2672_v44 = vmax.f32 %v2671_v34, %v2427_v55  ;;  %v9243_v6 = vpop.f32.mrf.mxu1 }
 0x517   : > { %v2760_v46 = vmax.f32 %v2759_v54, %v2506_v31  ;;  %v2791_v45 = vmax.f32 %v2790_v48, %v2507_v19  ;;  %v2349_v31 = vld [vmem:[%s7507_s16 + $0x2a8] sm:$0xff]  ;;  %v2434_v54 = vunpack.c.l.bf16 %v2299_v30  ;;  %v2435_v48 = vunpack.c.h.bf16 %v2299_v30 }
 0x518   : > { %v2640_v18 = vmax.f32 %v2639_v9, %v2422_v4  ;;  %v2534_v8 = vunpack.c.l.bf16 %v2349_v31  ;;  %v2535_v57 = vunpack.c.h.bf16 %v2349_v31  ;;  %v2673_v52 = vmax.f32 %v2672_v44, %v2431_v36  ;;  %v2313_v31 = vld [vmem:[%s7507_s16 + $0x188] sm:$0x33] }
 0x519   : > { %v2761_v38 = vmax.f32 %v2760_v46, %v2510_v39  ;;  %v2792_v3 = vmax.f32 %v2791_v45, %v2511_v56  ;;  %v2351_v39 = vld [vmem:[%s7507_s16 + $0x2b8] sm:$0xff]  ;;  %v2438_v46 = vunpack.c.l.bf16 %v2301_v33  ;;  %v2542_v2 = vunpack.c.l.bf16 %v2353_v53 }
 0x51a   : > { %v2641_v27 = vmax.f32 %v2640_v18, %v2426_v16  ;;  %v2538_v19 = vunpack.c.l.bf16 %v2351_v39  ;;  %v2439_v7 = vunpack.c.h.bf16 %v2301_v33  ;;  %v2546_v4 = vunpack.c.l.bf16 %v2355_v62  ;;  %v2309_v18 = vld [vmem:[%s7507_s16 + $0x168] sm:$0xff] }
 0x51b   : > { %v2762_v63 = vmax.f32 %v2761_v38, %v2514_v50  ;;  %v2793_v26 = vmax.f32 %v2792_v3, %v2515_v0  ;;  %v2303_v50 = vld [vmem:[%s7507_s16 + $0x138] sm:$0xff]  ;;  %v2674_v0 = vmax.f32 %v2673_v52, %v2435_v48  ;;  %v2446_v3 = vunpack.c.l.bf16 %v2305_v61 }
 0x51c   : > { %v2642_v12 = vmax.f32 %v2641_v27, %v2430_v28  ;;  %v2442_v56 = vunpack.c.l.bf16 %v2303_v50  ;;  %v2443_v9 = vunpack.c.h.bf16 %v2303_v50  ;;  %v2450_v15 = vunpack.c.l.bf16 %v2307_v59  ;;  %v2361_v27 = vld [vmem:[%s7507_s16 + $0x308] sm:$0xff] }
 0x51d   : > { %v2763_v43 = vmax.f32 %v2762_v63, %v2518_v58  ;;  %v2794_v24 = vmax.f32 %v2793_v26, %v2519_v14  ;;  %v9241_v58 = vpop.f32.mrf.mxu0  ;;  %v2539_v63 = vunpack.c.h.bf16 %v2351_v39  ;;  %v2675_v14 = vmax.f32 %v2674_v0, %v2439_v7 }
 0x51e   : > { %v2643_v47 = vmax.f32 %v2642_v12, %v2434_v54  ;;  %v2550_v26 = vunpack.c.l.bf16 %v2357_v11  ;;  %v2447_v21 = vunpack.c.h.bf16 %v2305_v61  ;;  %v2547_v30 = vunpack.c.h.bf16 %v2355_v62  ;;  %v4913_v44 = vpop.f32.mrf.mxu1 }
 0x51f   : > { %v2764_v22 = vmax.f32 %v2763_v43, %v2522_v5  ;;  %v2795_v37 = vmax.f32 %v2794_v24, %v2523_v23  ;;  %v2543_v43 = vunpack.c.h.bf16 %v2353_v53  ;;  %v2554_v23 = vunpack.c.l.bf16 %v2359_v42  ;;  %5014 = vmatpush.xpose.msrb.mxu1 %v4913_v44  ;;  %v9309_v44 = vld [vmem:[%s7507_s16 + $0x60] sm:$0xff] }
 0x520   : > { %v2644_v45 = vmax.f32 %v2643_v47, %v2438_v46  ;;  %v2676_v24 = vmax.f32 %v2675_v14, %v2443_v9  ;;  %v2558_v34 = vunpack.c.l.bf16 %v2361_v27  ;;  %v2451_v39 = vunpack.c.h.bf16 %v2307_v59 }
 0x521   : > { %v2765_v32 = vmax.f32 %v2764_v22, %v2526_v17  ;;  %v2796_v60 = vmax.f32 %v2795_v37, %v2527_v29  ;;  %v2454_v22 = vunpack.c.l.bf16 %v2309_v18  ;;  %v2551_v48 = vunpack.c.h.bf16 %v2357_v11 }
 0x522   : > { %v2645_v5 = vmax.f32 %v2644_v45, %v2442_v56  ;;  %v2463_v0 = vunpack.c.h.bf16 %v2313_v31 }
 0x523   : > { %v2766_v40 = vmax.f32 %v2765_v32, %v2530_v25  ;;  %v2797_v38 = vmax.f32 %v2796_v60, %v2531_v41  ;;  %v2311_v25 = vld [vmem:[%s7507_s16 + $0x178] sm:$0xff]  ;;  %5015 = vmatpush.xpose.msrb.mxu1 %v9243_v6 }
 0x524   : > { %v2646_v16 = vmax.f32 %v2645_v5, %v2446_v3  ;;  %v2363_v32 = vld [vmem:[%s7507_s16 + $0x318] sm:$0x33]  ;;  %v2458_v29 = vunpack.c.l.bf16 %v2311_v25  ;;  %v2459_v62 = vunpack.c.h.bf16 %v2311_v25  ;;  %v2681_v59 = vsel %vm2587_vm12, %v2463_v0, -inf  ;;  %v9335_v0 = vld [vmem:[%s7507_s16 + $0x210] sm:$0xff] }
 0x525   : > { %v2767_v51 = vmax.f32 %v2766_v40, %v2534_v8  ;;  %v2798_v1 = vmax.f32 %v2797_v38, %v2535_v57  ;;  %v2462_v8 = vunpack.c.l.bf16 %v2313_v31  ;;  %v2562_v12 = vunpack.c.l.bf16 %v2363_v32  ;;  %v4890_v41 = vpop.f32.mrf.mxu0  ;;  %v9292_v31 = vld [vmem:[%s7507_s16 + $0x40] sm:$0xff] }
 0x526   : > { %v2647_v35 = vmax.f32 %v2646_v16, %v2450_v15  ;;  %v2677_v40 = vmax.f32 %v2676_v24, %v2447_v21  ;;  %4994 = vmatpush.xpose.msrb.mxu0 %v4890_v41  ;;  %v2455_v57 = vunpack.c.h.bf16 %v2309_v18  ;;  %v9270_v18 = vld [vmem:[%s7507_s16 + $0x190] sm:$0xff]  ;;  %v9276_v21 = vld [vmem:[%s7507_s16 + $0x20] sm:$0xff] }
 0x527   : > { %v2768_v10 = vmax.f32 %v2767_v51, %v2538_v19  ;;  %v2799_v17 = vmax.f32 %v2798_v1, %v2539_v63  ;;  %v2650_v60 = vsel %vm2587_vm12, %v2462_v8, -inf  ;;  %v2774_v19 = vsel %vm2587_vm12, %v2562_v12, -inf  ;;  %v9283_v24 = vld [vmem:[%s7507_s16 + $0x30] sm:$0xff] }
 0x528   : > { %v2648_v37 = vmax.f32 %v2647_v35, %v2454_v22  ;;  %v2678_v52 = vmax.f32 %v2677_v40, %v2451_v39  ;;  %v2559_v1 = vunpack.c.h.bf16 %v2361_v27  ;;  %v9279_v22 = vld [vmem:[%s7507_s16 + $0x1b0] sm:$0xff]  ;;  %v2464_v25 = vunpack.c.l.bf16 %v9270_v18  ;;  %v9305_v39 = vld [vmem:[%s7507_s16 + $0x1e0] sm:$0xff] }
 0x529   : > { %v2769_v13 = vmax.f32 %v2768_v10, %v2542_v2  ;;  %v2800_v54 = vmax.f32 %v2799_v17, %v2543_v43  ;;  %v2555_v2 = vunpack.c.h.bf16 %v2359_v42  ;;  %v9267_v17 = vld [vmem:[%s7507_s16 + $0x10] sm:$0xff]  ;;  %v9273_v42 = vld [vmem:[%s7507_s16 + $0x1a0] sm:$0xff]  ;;  %v2380_v40 = vunpack.c.l.bf16 %v9292_v31 }
 0x52a   : > { %v2649_v33 = vmax.f32 %v2648_v37, %v2458_v29  ;;  %4995 = vmatpush.xpose.msrb.mxu0 %v9241_v58  ;;  %v2679_v10 = vmax.f32 %v2678_v52, %v2455_v57  ;;  %v2563_v58 = vunpack.c.h.bf16 %v2363_v32  ;;  %v2468_v27 = vunpack.c.l.bf16 %v9273_v42  ;;  %v9301_v8 = vld [vmem:[%s7507_s16 + $0x50] sm:$0xff] }
 0x52b   : > { %v2770_v20 = vmax.f32 %v2769_v13, %v2546_v4  ;;  %v2801_v50 = vmax.f32 %v2800_v54, %v2547_v30  ;;  %v2372_v32 = vunpack.c.l.bf16 %v9276_v21  ;;  %v2472_v29 = vunpack.c.l.bf16 %v9279_v22 }
 0x52c   : > { %v2651_v47 = vmax.f32 %v2649_v33, %v2650_v60  ;;  %v2680_v6 = vmax.f32 %v2679_v10, %v2459_v62  ;;  %v2805_v14 = vsel %vm2587_vm12, %v2563_v58, -inf  ;;  %v2376_v37 = vunpack.c.l.bf16 %v9283_v24  ;;  %v9345_v58 = vld [vmem:[%s7507_s16 + $0xd0] sm:$0xff] }
 0x52d   : > { %v2771_v55 = vmax.f32 %v2770_v20, %v2550_v26  ;;  %v2802_v45 = vmax.f32 %v2801_v50, %v2551_v48  ;;  %v9263_v26 = vld [vmem:[%s7507_s16] sm:$0xff]  ;;  %v2689_v33 = vmax.f32 %v2464_v25, %v2468_v27  ;;  %v2384_v48 = vunpack.c.l.bf16 %v9301_v8 }
 0x52e   : > { %v2652_v51 = vrot.slane %v2651_v47, 4  ;;  %v2682_v15 = vmax.f32 %v2680_v6, %v2681_v59  ;;  %v9349_v59 = vld [vmem:[%s7507_s16 + $0x220] sm:$0xff]  ;;  %v2416_v27 = vunpack.c.l.bf16 %v9345_v58 }
 0x52f   : > { %v2772_v36 = vmax.f32 %v2771_v55, %v2554_v23  ;;  %v2803_v3 = vmax.f32 %v2802_v45, %v2555_v2  ;;  %v2364_v23 = vunpack.c.l.bf16 %v9263_v26  ;;  %v9289_v55 = vld [vmem:[%s7507_s16 + $0x1c0] sm:$0xff] }
 0x530   : > { %v2653_v56 = vmax.f32 %v2651_v47, %v2652_v51  ;;  %v2683_v35 = vrot.slane %v2682_v15, 4  ;;  %v2476_v12 = vunpack.c.l.bf16 %v9289_v55  ;;  %v9313_v47 = vld [vmem:[%s7507_s16 + $0x1f0] sm:$0xff]  ;;  %v2484_v51 = vunpack.c.l.bf16 %v9305_v39  ;;  %v9325_v45 = vld [vmem:[%s7507_s16 + $0x80] sm:$0xff] }
 0x531   : > { %v2773_v46 = vmax.f32 %v2772_v36, %v2558_v34  ;;  %v2804_v13 = vmax.f32 %v2803_v3, %v2559_v1  ;;  %v9297_v34 = vld [vmem:[%s7507_s16 + $0x1d0] sm:$0xff] }
 0x532   : > { %v2654_v61 = vrot.slane %v2653_v56, 2  ;;  %v2684_v54 = vmax.f32 %v2682_v15, %v2683_v35  ;;  %v2480_v60 = vunpack.c.l.bf16 %v9297_v34  ;;  %v9339_v3 = vld [vmem:[%s7507_s16 + $0xb0] sm:$0xff]  ;;  %v2496_v15 = vunpack.c.l.bf16 %v9335_v0 }
 0x533   : > { %v2775_v53 = vmax.f32 %v2773_v46, %v2774_v19  ;;  %v2806_v20 = vmax.f32 %v2804_v13, %v2805_v14  ;;  %v2690_v19 = vmax.f32 %v2689_v33, %v2472_v29  ;;  %v9367_v29 = vld [vmem:[%s7507_s16 + $0xf0] sm:$0xff]  ;;  %v2365_v33 = vunpack.c.h.bf16 %v9263_v26 }
 0x534   : > { %v2685_v50 = vrot.slane %v2684_v54, 2  ;;  %v2373_v26 = vunpack.c.h.bf16 %v9276_v21 }
 0x535   : > { %v2776_v38 = vrot.slane %v2775_v53, 4  ;;  %v2807_v30 = vrot.slane %v2806_v20, 4  ;;  %v2691_v52 = vmax.f32 %v2690_v19, %v2476_v12 }
 0x536   : > { %v2686_v1 = vmax.f32 %v2684_v54, %v2685_v50 }
 0x537   : > { %v2777_v7 = vmax.f32 %v2775_v53, %v2776_v38  ;;  %v2808_v41 = vmax.f32 %v2806_v20, %v2807_v30  ;;  %v9317_v53 = vld [vmem:[%s7507_s16 + $0x70] sm:$0xff]  ;;  %v9321_v38 = vld [vmem:[%s7507_s16 + $0x200] sm:$0xff]  ;;  %v2692_v10 = vmax.f32 %v2691_v52, %v2480_v60  ;;  %v2469_v60 = vunpack.c.h.bf16 %v9273_v42 }
 0x538   : > { %v2687_v30 = vrot.slane %v2686_v1, 1  ;;  %v2424_v52 = vunpack.c.l.bf16 %v9367_v29 }
 0x539   : > { %v2778_v63 = vrot.slane %v2777_v7, 2  ;;  %v2809_v2 = vrot.slane %v2808_v41, 2 }
 0x53b   : > { %v2779_v4 = vmax.f32 %v2777_v7, %v2778_v63  ;;  %v9328_v7 = vld [vmem:[%s7507_s16 + $0x90] sm:$0xff]  ;;  %v9332_v63 = vld [vmem:[%s7507_s16 + $0xa0] sm:$0xff]  ;;  %v2810_v14 = vmax.f32 %v2808_v41, %v2809_v2  ;;  %v2465_v41 = vunpack.c.h.bf16 %v9270_v18 }
 0x53c   : > { %v2400_v13 = vunpack.c.l.bf16 %v9328_v7  ;;  %v2404_v35 = vunpack.c.l.bf16 %v9332_v63 }
 0x53d   : > { %v2780_v9 = vrot.slane %v2779_v4, 1 }
 0x53f   : > { %v2781_v43 = vmax.f32 %v2779_v4, %v2780_v9  ;;  %v9342_v4 = vld [vmem:[%s7507_s16 + $0xc0] sm:$0xff]  ;;  %v2693_v9 = vmax.f32 %v2692_v10, %v2484_v51  ;;  %v9379_v51 = vld [vmem:[%s7507_s16 + $0x250] sm:$0xff]  ;;  %v2377_v10 = vunpack.c.h.bf16 %v9283_v24 }
 0x540   : > { %v2412_v25 = vunpack.c.l.bf16 %v9342_v4 }
 0x545   : > { %v9237_v49 = vpop.f32.mrf.mxu2 }
 0x54d   : > { %v4936_v28 = vpop.f32.mrf.mxu2 }
 0x54e   : > { %5034 = vmatpush.xpose.msrb.mxu2 %v4936_v28  ;;  %v2368_v28 = vunpack.c.l.bf16 %v9267_v17 }
 0x550   : > { %v2564_v36 = vmax.f32 %v2364_v23, %v2368_v28  ;;  %v9357_v23 = vld [vmem:[%s7507_s16 + $0x230] sm:$0xff]  ;;  %v2408_v28 = vunpack.c.l.bf16 %v9339_v3 }
 0x551   : > { %v2504_v19 = vunpack.c.l.bf16 %v9357_v23 }
 0x552   : > { %5035 = vmatpush.xpose.msrb.mxu2 %v9237_v49  ;;  %v2655_v49 = vmax.f32 %v2653_v56, %v2654_v61  ;;  %v2565_v46 = vmax.f32 %v2564_v36, %v2372_v32  ;;  %v2388_v56 = vunpack.c.l.bf16 %v9309_v44  ;;  %v2488_v61 = vunpack.c.l.bf16 %v9313_v47  ;;  %v9364_v32 = vld [vmem:[%s7507_s16 + $0xe0] sm:$0xff] }
 0x553   : > { %v9371_v36 = vld [vmem:[%s7507_s16 + $0x240] sm:$0xff] }
 0x554   : > { %v2656_v5 = vrot.slane %v2655_v49, 1  ;;  %v2566_v57 = vmax.f32 %v2565_v46, %v2376_v37  ;;  %v2694_v20 = vmax.f32 %v2693_v9, %v2488_v61  ;;  %v2500_v37 = vunpack.c.l.bf16 %v9349_v59  ;;  %v9387_v61 = vld [vmem:[%s7507_s16 + $0x100] sm:$0xff] }
 0x555   : > { %v2811_v46 = vrot.slane %v2810_v14, 1  ;;  %v2508_v18 = vunpack.c.l.bf16 %v9371_v36 }
 0x556   : > { %v2657_v11 = vmax.f32 %v2655_v49, %v2656_v5  ;;  %v2567_v62 = vmax.f32 %v2566_v57, %v2380_v40  ;;  %v2392_v49 = vunpack.c.l.bf16 %v9317_v53  ;;  %v2492_v5 = vunpack.c.l.bf16 %v9321_v38 }
 0x557   : > { %v2369_v40 = vunpack.c.h.bf16 %v9267_v17  ;;  %v2420_v57 = vunpack.c.l.bf16 %v9364_v32  ;;  %v2473_v17 = vunpack.c.h.bf16 %v9279_v22  ;;  %v2812_v22 = vmax.f32 %v2810_v14, %v2811_v46 }
 0x558   : > { %v4974_v16 = vsel %vm4971_vm13, %v2781_v43, %v2657_v11  ;;  %v2568_v6 = vmax.f32 %v2567_v62, %v2384_v48  ;;  %v2396_v11 = vunpack.c.l.bf16 %v9325_v45  ;;  %v2695_v12 = vmax.f32 %v2694_v20, %v2492_v5  ;;  %v9390_v62 = vld [vmem:[%s7507_s16 + $0x260] sm:$0xff] }
 0x559   : > { %5036 = vmatmul.f32.vlgmr.msrb.gmra.mxu2 %v4974_v16  ;;  %v2596_v5 = vmax.f32 %v2365_v33, %v2369_v40 }
 0x55a   : > { %v2569_v16 = vmax.f32 %v2568_v6, %v2388_v56  ;;  %v2696_v50 = vmax.f32 %v2695_v12, %v2496_v15  ;;  %v2688_v56 = vmax.f32 %v2686_v1, %v2687_v30  ;;  %v2720_v6 = vmax.f32 %v2465_v41, %v2469_v60 }
 0x55b   : > { %v2512_v1 = vunpack.c.l.bf16 %v9379_v51  ;;  %v2381_v15 = vunpack.c.h.bf16 %v9292_v31  ;;  %v2597_v24 = vmax.f32 %v2596_v5, %v2373_v26  ;;  %v2516_v30 = vunpack.c.l.bf16 %v9390_v62 }
 0x55c   : > { %v2570_v54 = vmax.f32 %v2569_v16, %v2392_v49  ;;  %v2697_v2 = vmax.f32 %v2696_v50, %v2500_v37  ;;  %v2477_v49 = vunpack.c.h.bf16 %v9289_v55  ;;  %v2481_v16 = vunpack.c.h.bf16 %v9297_v34 }
 0x55d   : > { %v2721_v20 = vmax.f32 %v2720_v6, %v2473_v17  ;;  %v2428_v55 = vunpack.c.l.bf16 %v9387_v61  ;;  %v2385_v12 = vunpack.c.h.bf16 %v9301_v8  ;;  %v2485_v31 = vunpack.c.h.bf16 %v9305_v39  ;;  %v9436_v6 = vld [vmem:[%s7507_s16 + $0x140] sm:$0xff] }
 0x55e   : > { %v2571_v48 = vmax.f32 %v2570_v54, %v2396_v11  ;;  %v2698_v11 = vmax.f32 %v2697_v2, %v2504_v19  ;;  %v9403_v54 = vld [vmem:[%s7507_s16 + $0x110] sm:$0xff]  ;;  %v2598_v33 = vmax.f32 %v2597_v24, %v2377_v10  ;;  %v4975_v40 = vsel %vm4971_vm13, %v2812_v22, %v2688_v56  ;;  %v9451_v24 = vld [vmem:[%s7507_s16 + $0x2c0] sm:$0xff] }
 0x55f   : > { %v2722_v34 = vmax.f32 %v2721_v20, %v2477_v49  ;;  %v9417_v19 = vld [vmem:[%s7507_s16 + $0x290] sm:$0xff]  ;;  %v2389_v8 = vunpack.c.h.bf16 %v9309_v44  ;;  %v2489_v39 = vunpack.c.h.bf16 %v9313_v47  ;;  %v2432_v26 = vunpack.c.l.bf16 %v9403_v54 }
 0x560   : > { %v2572_v42 = vmax.f32 %v2571_v48, %v2400_v13  ;;  %v9396_v13 = vld [vmem:[%s7507_s16 + $0x270] sm:$0xff]  ;;  %v2699_v37 = vmax.f32 %v2698_v11, %v2508_v18  ;;  %v2599_v48 = vmax.f32 %v2598_v33, %v2381_v15  ;;  %v9429_v18 = vld [vmem:[%s7507_s16 + $0x2a0] sm:$0xff]  ;;  %v2393_v44 = vunpack.c.h.bf16 %v9317_v53 }
 0x561   : > { %v2520_v41 = vunpack.c.l.bf16 %v9396_v13  ;;  %v2723_v50 = vmax.f32 %v2722_v34, %v2481_v16  ;;  %v9426_v56 = vld [vmem:[%s7507_s16 + $0x130] sm:$0xff]  ;;  %v2493_v47 = vunpack.c.h.bf16 %v9321_v38  ;;  %v2528_v49 = vunpack.c.l.bf16 %v9417_v19 }
 0x562   : > { %v2573_v9 = vmax.f32 %v2572_v42, %v2404_v35  ;;  %v9406_v35 = vld [vmem:[%s7507_s16 + $0x280] sm:$0xff]  ;;  %v2700_v46 = vmax.f32 %v2699_v37, %v2512_v1  ;;  %v2600_v42 = vmax.f32 %v2599_v48, %v2385_v12  ;;  %v2397_v22 = vunpack.c.h.bf16 %v9325_v45  ;;  %v9448_v16 = vld [vmem:[%s7507_s16 + $0x150] sm:$0xff] }
 0x563   : > { %v2524_v17 = vunpack.c.l.bf16 %v9406_v35  ;;  %v2724_v2 = vmax.f32 %v2723_v50, %v2485_v31  ;;  %v2497_v53 = vunpack.c.h.bf16 %v9335_v0  ;;  %v2532_v11 = vunpack.c.l.bf16 %v9429_v18  ;;  %v9461_v33 = vld [vmem:[%s7507_s16 + $0x2d0] sm:$0xff] }
 0x564   : > { %v2574_v14 = vmax.f32 %v2573_v9, %v2408_v28  ;;  %v9414_v28 = vld [vmem:[%s7507_s16 + $0x120] sm:$0xff]  ;;  %v2601_v38 = vmax.f32 %v2600_v42, %v2389_v8  ;;  %v2440_v9 = vunpack.c.l.bf16 %v9426_v56  ;;  %v2401_v45 = vunpack.c.h.bf16 %v9328_v7 }
 0x565   : > { %v2436_v10 = vunpack.c.l.bf16 %v9414_v28  ;;  %v2725_v1 = vmax.f32 %v2724_v2, %v2489_v39  ;;  %v2501_v0 = vunpack.c.h.bf16 %v9349_v59  ;;  %v2405_v34 = vunpack.c.h.bf16 %v9332_v63  ;;  %v9471_v39 = vld [vmem:[%s7507_s16 + $0x2e0] sm:$0xff] }
 0x566   : > { %v2575_v60 = vmax.f32 %v2574_v14, %v2412_v25  ;;  %v2602_v20 = vmax.f32 %v2601_v38, %v2393_v44  ;;  %v2444_v14 = vunpack.c.l.bf16 %v9436_v6  ;;  %v2505_v7 = vunpack.c.h.bf16 %v9357_v23 }
 0x567   : > { %v2409_v48 = vunpack.c.h.bf16 %v9339_v3  ;;  %v2509_v63 = vunpack.c.h.bf16 %v9371_v36  ;;  %v2413_v42 = vunpack.c.h.bf16 %v9342_v4  ;;  %v2513_v3 = vunpack.c.h.bf16 %v9379_v51 }
 0x568   : > { %v2576_v25 = vmax.f32 %v2575_v60, %v2416_v27  ;;  %v2540_v60 = vunpack.c.l.bf16 %v9451_v24  ;;  %v2417_v38 = vunpack.c.h.bf16 %v9345_v58 }
 0x56a   : > { %v2577_v5 = vmax.f32 %v2576_v25, %v2420_v57  ;;  %v2544_v25 = vunpack.c.l.bf16 %v9461_v33 }
 0x56c   : > { %v2578_v57 = vmax.f32 %v2577_v5, %v2424_v52  ;;  %v9458_v52 = vld [vmem:[%s7507_s16 + $0x160] sm:$0xff]  ;;  %v2548_v5 = vunpack.c.l.bf16 %v9471_v39 }
 0x56e   : > { %v2579_v12 = vmax.f32 %v2578_v57, %v2428_v55  ;;  %v9468_v55 = vld [vmem:[%s7507_s16 + $0x180] sm:$0x33] }
 0x585   : > { %v9353_v43 = vpop.f32.mrf.mxu3 }
 0x58d   : > { %v4959_v21 = vpop.f32.mrf.mxu3 }
 0x58e   : > { %5054 = vmatpush.xpose.msrb.mxu3 %v4959_v21  ;;  %v9439_v21 = vld [vmem:[%s7507_s16 + $0x2b0] sm:$0xff] }
 0x58f   : > { %v2536_v37 = vunpack.c.l.bf16 %v9439_v21 }
 0x592   : > { %5055 = vmatpush.xpose.msrb.mxu3 %v9353_v43  ;;  %v2701_v43 = vmax.f32 %v2700_v46, %v2516_v30  ;;  %v2726_v30 = vmax.f32 %v2725_v1, %v2493_v47  ;;  %v2580_v46 = vmax.f32 %v2579_v12, %v2432_v26  ;;  %v9478_v26 = vld [vmem:[%s7507_s16 + $0x2f0] sm:$0xff]  ;;  %v2517_v1 = vunpack.c.h.bf16 %v9390_v62 }
 0x593   : > { %v9481_v47 = vld [vmem:[%s7507_s16 + $0x310] sm:$0x33]  ;;  %v2552_v51 = vunpack.c.l.bf16 %v9478_v26 }
 0x594   : > { %v2702_v27 = vmax.f32 %v2701_v43, %v2520_v41  ;;  %v2727_v59 = vmax.f32 %v2726_v30, %v2497_v53  ;;  %v2448_v41 = vunpack.c.l.bf16 %v9448_v16  ;;  %v2581_v43 = vmax.f32 %v2580_v46, %v2436_v10  ;;  %v9488_v53 = vld [vmem:[%s7507_s16 + $0x170] sm:$0xff]  ;;  %v9491_v10 = vld [vmem:[%s7507_s16 + $0x300] sm:$0xff] }
 0x595   : > { %5056 = vmatmul.f32.vlgmr.msrb.gmra.mxu3 %v4975_v40  ;;  %v2603_v40 = vmax.f32 %v2602_v20, %v2397_v22  ;;  %v2560_v57 = vunpack.c.l.bf16 %v9481_v47  ;;  %v2556_v58 = vunpack.c.l.bf16 %v9491_v10  ;;  %v2529_v46 = vunpack.c.h.bf16 %v9417_v19 }
 0x596   : > { %v2703_v15 = vmax.f32 %v2702_v27, %v2524_v17  ;;  %v2728_v23 = vmax.f32 %v2727_v59, %v2501_v0  ;;  %v2452_v17 = vunpack.c.l.bf16 %v9458_v52  ;;  %v2582_v27 = vmax.f32 %v2581_v43, %v2440_v9 }
 0x597   : > { %v2604_v50 = vmax.f32 %v2603_v40, %v2401_v45  ;;  %v2421_v0 = vunpack.c.h.bf16 %v9364_v32  ;;  %v2521_v9 = vunpack.c.h.bf16 %v9396_v13  ;;  %v2429_v13 = vunpack.c.h.bf16 %v9387_v61 }
 0x598   : > { %v2704_v31 = vmax.f32 %v2703_v15, %v2528_v49  ;;  %v2729_v36 = vmax.f32 %v2728_v23, %v2505_v7  ;;  %v2460_v49 = vunpack.c.l.bf16 %v9468_v55  ;;  %v2583_v15 = vmax.f32 %v2582_v27, %v2444_v14 }
 0x599   : > { %v2605_v2 = vmax.f32 %v2604_v50, %v2405_v34  ;;  %v2525_v34 = vunpack.c.h.bf16 %v9406_v35  ;;  %v2533_v35 = vunpack.c.h.bf16 %v9429_v18  ;;  %v2437_v43 = vunpack.c.h.bf16 %v9414_v28 }
 0x59a   : > { %v2705_v8 = vmax.f32 %v2704_v31, %v2532_v11  ;;  %v2730_v4 = vmax.f32 %v2729_v36, %v2509_v63  ;;  %v2584_v12 = vmax.f32 %v2583_v15, %v2448_v41  ;;  %v2425_v31 = vunpack.c.h.bf16 %v9367_v29 }
 0x59b   : > { %v2606_v11 = vmax.f32 %v2605_v2, %v2409_v48  ;;  %v2588_v59 = vsel %vm2587_vm12, %v2460_v49, -inf  ;;  %v2433_v29 = vunpack.c.h.bf16 %v9403_v54  ;;  %v2537_v61 = vunpack.c.h.bf16 %v9439_v21 }
 0x59c   : > { %v2706_v44 = vmax.f32 %v2705_v8, %v2536_v37  ;;  %v2731_v30 = vmax.f32 %v2730_v4, %v2513_v3  ;;  %v2456_v37 = vunpack.c.l.bf16 %v9488_v53  ;;  %v2585_v14 = vmax.f32 %v2584_v12, %v2452_v17 }
 0x59d   : > { %v2607_v20 = vmax.f32 %v2606_v11, %v2413_v42  ;;  %v2441_v2 = vunpack.c.h.bf16 %v9426_v56  ;;  %v2541_v36 = vunpack.c.h.bf16 %v9451_v24  ;;  %v2445_v27 = vunpack.c.h.bf16 %v9436_v6 }
 0x59e   : > { %v2707_v22 = vmax.f32 %v2706_v44, %v2540_v60  ;;  %v2732_v40 = vmax.f32 %v2731_v30, %v2517_v1  ;;  %v2712_v60 = vsel %vm2587_vm12, %v2560_v57, -inf  ;;  %v2586_v41 = vmax.f32 %v2585_v14, %v2456_v37 }
 0x59f   : > { %v2608_v7 = vmax.f32 %v2607_v20, %v2417_v38  ;;  %v2449_v11 = vunpack.c.h.bf16 %v9448_v16  ;;  %v2549_v4 = vunpack.c.h.bf16 %v9471_v39  ;;  %v2453_v15 = vunpack.c.h.bf16 %v9458_v52 }
 0x5a0   : > { %v2708_v45 = vmax.f32 %v2707_v22, %v2544_v25  ;;  %v2733_v48 = vmax.f32 %v2732_v40, %v2521_v9  ;;  %v2589_v17 = vmax.f32 %v2586_v41, %v2588_v59  ;;  %v2545_v22 = vunpack.c.h.bf16 %v9461_v33 }
 0x5a1   : > { %v2609_v8 = vmax.f32 %v2608_v7, %v2421_v0  ;;  %v2461_v20 = vunpack.c.h.bf16 %v9468_v55  ;;  %v2561_v30 = vunpack.c.h.bf16 %v9481_v47  ;;  %v2457_v16 = vunpack.c.h.bf16 %v9488_v53 }
 0x5a2   : > { %v2709_v62 = vmax.f32 %v2708_v45, %v2548_v5  ;;  %v2734_v23 = vmax.f32 %v2733_v48, %v2525_v34  ;;  %v2590_v3 = vrot.slane %v2589_v17, 4  ;;  %v2553_v45 = vunpack.c.h.bf16 %v9478_v26 }
 0x5a3   : > { %v2610_v50 = vmax.f32 %v2609_v8, %v2425_v31  ;;  %v2557_v39 = vunpack.c.h.bf16 %v9491_v10  ;;  %v2619_v34 = vsel %vm2587_vm12, %v2461_v20, -inf  ;;  %v2743_v7 = vsel %vm2587_vm12, %v2561_v30, -inf }
 0x5a4   : > { %v2710_v32 = vmax.f32 %v2709_v62, %v2552_v51  ;;  %v2735_v42 = vmax.f32 %v2734_v23, %v2529_v46  ;;  %v2591_v5 = vmax.f32 %v2589_v17, %v2590_v3 }
 0x5a5   : > { %v2611_v44 = vmax.f32 %v2610_v50, %v2429_v13 }
 0x5a6   : > { %v2711_v63 = vmax.f32 %v2710_v32, %v2556_v58  ;;  %v2736_v54 = vmax.f32 %v2735_v42, %v2533_v35  ;;  %v2592_v1 = vrot.slane %v2591_v5, 2 }
 0x5a7   : > { %v2612_v49 = vmax.f32 %v2611_v44, %v2433_v29  ;;  %v4962_v44 = vld [vmem:[%s7505_s15] sm:$0x3] }
 0x5a8   : > { %v2713_v25 = vmax.f32 %v2711_v63, %v2712_v60  ;;  %v2737_v28 = vmax.f32 %v2736_v54, %v2537_v61  ;;  %v2593_v57 = vmax.f32 %v2591_v5, %v2592_v1 }
 0x5a9   : > { %v2613_v38 = vmax.f32 %v2612_v49, %v2437_v43 }
 0x5aa   : > { %v2714_v19 = vrot.slane %v2713_v25, 4  ;;  %v2738_v56 = vmax.f32 %v2737_v28, %v2541_v36  ;;  %v2594_v9 = vrot.slane %v2593_v57, 1 }
 0x5ab   : > { %v2614_v51 = vmax.f32 %v2613_v38, %v2441_v2 }
 0x5ac   : > { %v2715_v18 = vmax.f32 %v2713_v25, %v2714_v19  ;;  %v2739_v6 = vmax.f32 %v2738_v56, %v2545_v22  ;;  %v2595_v12 = vmax.f32 %v2593_v57, %v2594_v9 }
 0x5ad   : > { %v2615_v0 = vmax.f32 %v2614_v51, %v2445_v27 }
 0x5ae   : > { %v2716_v21 = vrot.slane %v2715_v18, 2  ;;  %v2740_v58 = vmax.f32 %v2739_v6, %v2549_v4 }
 0x5af   : > { %v2616_v37 = vmax.f32 %v2615_v0, %v2449_v11 }
 0x5b0   : > { %v2717_v24 = vmax.f32 %v2715_v18, %v2716_v21  ;;  %v2741_v52 = vmax.f32 %v2740_v58, %v2553_v45 }
 0x5b1   : > { %v2617_v31 = vmax.f32 %v2616_v37, %v2453_v15 }
 0x5b2   : > { %v2718_v33 = vrot.slane %v2717_v24, 1  ;;  %v2742_v40 = vmax.f32 %v2741_v52, %v2557_v39 }
 0x5b3   : > { %v2618_v55 = vmax.f32 %v2617_v31, %v2457_v16 }
 0x5b4   : > { %v2719_v62 = vmax.f32 %v2717_v24, %v2718_v33  ;;  %v2744_v14 = vmax.f32 %v2742_v40, %v2743_v7 }
 0x5b5   : > { %v2620_v47 = vmax.f32 %v2618_v55, %v2619_v34 }
 0x5b6   : > { %v4972_v26 = vsel %vm4971_vm13, %v2719_v62, %v2595_v12  ;;  %v2745_v59 = vrot.slane %v2744_v14, 4 }
 0x5b7   : > { %4996 = vmatmul.f32.vlgmr.msrb.gmra.mxu0 %v4972_v26  ;;  %v2621_v53 = vrot.slane %v2620_v47, 4 }
 0x5b8   : > { %v2746_v32 = vmax.f32 %v2744_v14, %v2745_v59 }
 0x5b9   : > { %v2622_v10 = vmax.f32 %v2620_v47, %v2621_v53 }
 0x5ba   : > { %v2747_v60 = vrot.slane %v2746_v32, 2 }
 0x5bb   : > { %v2623_v13 = vrot.slane %v2622_v10, 2 }
 0x5bc   : > { %v2748_v8 = vmax.f32 %v2746_v32, %v2747_v60 }
 0x5bd   : > { %v2624_v46 = vmax.f32 %v2622_v10, %v2623_v13 }
 0x5be   : > { %v2749_v41 = vrot.slane %v2748_v8, 1 }
 0x5bf   : > { %v2625_v48 = vrot.slane %v2624_v46, 1 }
 0x5c0   : > { %v2750_v29 = vmax.f32 %v2748_v8, %v2749_v41 }
 0x5c1   : > { %v2626_v63 = vmax.f32 %v2624_v46, %v2625_v48 }
 0x5c3   : > { %v4973_v35 = vsel %vm4971_vm13, %v2750_v29, %v2626_v63 }
 0x5c4   : > { %5016 = vmatmul.f32.vlgmr.msrb.gmra.mxu1 %v4973_v35 }
 0x5dc   : > { %v5037_v17 = vpop.f32.mrf.mxu2 }
 0x618   : > { %v5057_v43 = vpop.f32.mrf.mxu3 }
 0x634   : > { %v4997_v50 = vpop.f32.mrf.mxu0 }
 0x641   : > { %v5017_v23 = vpop.f32.mrf.mxu1 }
 0x642   : > { %v5018_v25 = vadd.f32 %v5017_v23, %v4997_v50 }
 0x644   : > { %v5038_v61 = vadd.f32 %v5037_v17, %v5018_v25 }
 0x646   : > { %v5058_v42 = vadd.f32 %v5057_v43, %v5038_v61 }
 0x648   : > { %v5060_v3 = vadd.f32 %v5058_v42, %v4962_v44 }
 0x64a   : > { %5062 = vst.msk [vmem:[%s7505_s15] sm:$0x3] %vm5061_vm14, %v5060_v3 }
 0x64b PF: > { %s15_s24 = sadd.s32 1, %s6669_s24   ;;  %s9557_s18 = smov %s6649_s19 }
 0x64c   : > { %p12_p12 = scmp.ge.s32.totalorder %s15_s24, 6   ;;  %s9558_s19 = smov %s6760_s9 }
 0x64d   : > { %s9559_s20 = smov %s6661_s22  ;;  %s9560_s21 = smov %s6665_s23 }
 0x64e   : > { %s9561_s22 = smov %s9564_s25  ;;  %s9562_s23 = smov %s9568_s26 }
 0x64f   :  { %14 = sbr.rel (!%p12_p12) target bundleno = 4 (0x4), region = 133 }

</bundles_post_ra>
